<compile_context>
chip_gen: v5e
topology: v5e:2x2
jax: 0.10.0
libtpu: 0.0.40
codegen_flags: <defaults>
</compile_context>

<pallas_src>
import functools

import jax
import jax.numpy as jnp
from jax.experimental import pallas as pl
from jax.experimental.pallas import tpu as pltpu


def _round_up(n, m):
    return (n + m - 1) // m * m


def _pad_to(a, shape):
    return jnp.pad(a, [(0, t - s) for s, t in zip(a.shape, shape)])


def mlp_kernel(x_ref, w1_ref, b1_ref, w2_ref, b2_ref, w3_ref, b3_ref, o_ref):
    # layer1 + relu (bf16 operands, f32 accumulation on the MXU)
    h1 = jnp.dot(x_ref[...], w1_ref[...], preferred_element_type=jnp.float32)
    h1 = jnp.maximum(h1 + b1_ref[...], 0.0).astype(jnp.bfloat16)
    # layer2 + relu; keep h2 in f32 (fed straight to the VPU reduction below).
    h2 = jnp.dot(h1, w2_ref[...], preferred_element_type=jnp.float32)
    h2 = jnp.maximum(h2 + b2_ref[...], 0.0)
    # layer3 has a single output unit: VPU multiply + lane reduction instead of
    # an MXU matmul against a 128-wide zero-padded weight slab.
    out = jnp.sum(h2 * w3_ref[...], axis=-1, keepdims=True) + b3_ref[...]
    o_ref[...] = out.astype(o_ref.dtype)


def prepare_params(w1, b1, w2, b2, w3, b3):
    """One-time padding / casting of the weights (hoisted out of the forward)."""
    K, H1 = w1.shape
    H2, N = w3.shape
    assert w2.shape == (H1, H2)
    assert N == 1, "this kernel specializes layer3 to a single output unit"

    Kp = _round_up(K, 8)          # 13   -> 16
    H1p = _round_up(H1, 128)      # 600  -> 640
    H2p = _round_up(H2, 128)      # 1200 -> 1280

    bf16 = jnp.bfloat16
    w1_p = _pad_to(w1, (Kp, H1p)).astype(bf16)
    b1_p = _pad_to(b1.reshape(1, H1), (1, H1p)).astype(jnp.float32)
    w2_p = _pad_to(w2, (H1p, H2p)).astype(bf16)
    b2_p = _pad_to(b2.reshape(1, H2), (1, H2p)).astype(jnp.float32)
    # layer3 weight stays f32 (it is only ~5 KiB) and is stored as a row vector
    # for the in-kernel broadcast-multiply + reduce.
    w3_p = _pad_to(w3.T, (1, H2p)).astype(jnp.float32)
    b3_p = b3.reshape(1, 1).astype(jnp.float32)
    return w1_p, b1_p, w2_p, b2_p, w3_p, b3_p


@functools.partial(jax.jit, static_argnames=("batch_tile",))
def mlp_forward(x, w1_p, b1_p, w2_p, b2_p, w3_p, b3_p, *, batch_tile=256):
    B, K = x.shape
    Kp, H1p = w1_p.shape
    H2p = w2_p.shape[1]

    # Batch tile: multiple of 16 (bf16 sublane packing), adapted to the actual
    # batch so small batches are not rounded up to a full tile.
    bm = min(_round_up(batch_tile, 16), _round_up(B, 16))
    Bp = _round_up(B, bm)
    grid = (Bp // bm,)

    x_p = _pad_to(x, (Bp, Kp)).astype(jnp.bfloat16)

    # Weights/biases: constant block index across the batch grid -> fetched
    # once and kept resident in VMEM while batch tiles stream through.
    const = lambda a: pl.BlockSpec(a.shape, lambda i: (0,) * a.ndim)

    # Only shard the batch axis across TensorCores (v7x megacore) when the
    # per-core compute clearly exceeds the (duplicated) weight-stream time.
    semantics = ("parallel",) if Bp >= 512 else ("arbitrary",)

    flops = Bp * (2 * Kp * H1p + 2 * H1p * H2p + 2 * H2p)
    bytes_accessed = (
        x_p.size * 2 + w1_p.size * 2 + w2_p.size * 2
        + (b1_p.size + b2_p.size + w3_p.size + b3_p.size) * 4
        + Bp * 1 * 4)

    out = pl.pallas_call(
        mlp_kernel,
        out_shape=jax.ShapeDtypeStruct((Bp, 1), jnp.float32),
        grid=grid,
        in_specs=[
            pl.BlockSpec((bm, Kp), lambda i: (i, 0)),   # x: per-batch-tile
            const(w1_p), const(b1_p),
            const(w2_p), const(b2_p),
            const(w3_p), const(b3_p),
        ],
        out_specs=pl.BlockSpec((bm, 1), lambda i: (i, 0)),
        compiler_params=pltpu.CompilerParams(
            dimension_semantics=semantics,
            vmem_limit_bytes=32 * 1024 * 1024,
        ),
        cost_estimate=pl.CostEstimate(
            flops=flops, transcendentals=0, bytes_accessed=bytes_accessed),
    )(x_p, w1_p, b1_p, w2_p, b2_p, w3_p, b3_p)

    return out[:B, :]


def init_linear(key, fan_in, fan_out):
    # Deterministic init mimicking torch.nn.Linear default: U(-1/sqrt(fan_in), +)
    kw, kb = jax.random.split(key)
    bound = 1.0 / jnp.sqrt(jnp.float32(fan_in))
    w = jax.random.uniform(kw, (fan_in, fan_out), jnp.float32, -bound, bound)
    b = jax.random.uniform(kb, (1, fan_out), jnp.float32, -bound, bound)
    return w, b


def reference_forward(x, w1, b1, w2, b2, w3, b3):
    # Reference with the SAME quantization choices as the kernel
    # (bf16 operands for layers 1-2, f32 accumulation, f32 layer-3).
    bf = jnp.bfloat16
    h1 = jnp.dot(x.astype(bf), w1.astype(bf),
                 preferred_element_type=jnp.float32) + b1
    h1 = jnp.maximum(h1, 0.0).astype(bf)
    h2 = jnp.dot(h1, w2.astype(bf),
                 preferred_element_type=jnp.float32) + b2
    h2 = jnp.maximum(h2, 0.0)
    return jnp.dot(h2, w3) + b3


if __name__ == "__main__":
    # "boshidun" = Boston housing: 13 features, 1 output.
    n_feature, n_output = 13, 1
    batch = 8

    key = jax.random.PRNGKey(0)
    kx, k1, k2, k3 = jax.random.split(key, 4)

    x = jax.random.normal(kx, (batch, n_feature), jnp.float32)
    w1, b1 = init_linear(k1, n_feature, 600)
    w2, b2 = init_linear(k2, 600, 1200)
    w3, b3 = init_linear(k3, 1200, n_output)

    params = prepare_params(w1, b1, w2, b2, w3, b3)   # one-time prep, not per call

    out = mlp_forward(x, *params)
    out = jax.block_until_ready(out)

    ref = reference_forward(x, w1, b1, w2, b2, w3, b3)
    assert out.shape == (batch, n_output)
    assert jnp.allclose(out, ref, atol=5e-3, rtol=5e-3), (
        float(jnp.max(jnp.abs(out - ref))))

    print("KERNEL_OK")
</pallas_src>

<mosaic_0001>
module attributes {stable_mosaic.version = 11 : i64} {
  func.func @mlp_kernel(%arg0: i32, %arg1: memref<16x16xbf16, #tpu.memory_space<vmem>>, %arg2: memref<16x640xbf16, #tpu.memory_space<vmem>>, %arg3: memref<1x640xf32, #tpu.memory_space<vmem>>, %arg4: memref<640x1280xbf16, #tpu.memory_space<vmem>>, %arg5: memref<1x1280xf32, #tpu.memory_space<vmem>>, %arg6: memref<1x1280xf32, #tpu.memory_space<vmem>>, %arg7: memref<1x1xf32, #tpu.memory_space<vmem>>, %arg8: memref<16x1xf32, #tpu.memory_space<vmem>>) attributes {dimension_semantics = [#tpu.dimension_semantics<arbitrary>], iteration_bounds = array<i64: 1>, scalar_prefetch = 0 : i64, scratch_operands = 0 : i64, tpu.core_type = #tpu.core_type<tc>, window_params = [{transform_indices = @transform_0, window_bounds = array<i64: 16, 16>}, {pipeline_mode = #tpu.pipeline_mode<synchronous>, transform_indices = @transform_1, window_bounds = array<i64: 16, 640>}, {pipeline_mode = #tpu.pipeline_mode<synchronous>, transform_indices = @transform_2, window_bounds = array<i64: 1, 640>}, {pipeline_mode = #tpu.pipeline_mode<synchronous>, transform_indices = @transform_3, window_bounds = array<i64: 640, 1280>}, {pipeline_mode = #tpu.pipeline_mode<synchronous>, transform_indices = @transform_4, window_bounds = array<i64: 1, 1280>}, {pipeline_mode = #tpu.pipeline_mode<synchronous>, transform_indices = @transform_5, window_bounds = array<i64: 1, 1280>}, {pipeline_mode = #tpu.pipeline_mode<synchronous>, transform_indices = @transform_6, window_bounds = array<i64: 1, 1>}, {transform_indices = @transform_7, window_bounds = array<i64: 16, 1>}]} {
    %c0 = arith.constant 0 : index
    %c0_0 = arith.constant 0 : index
    %0 = vector.load %arg1[%c0, %c0_0] : memref<16x16xbf16, #tpu.memory_space<vmem>>, vector<16x16xbf16>
    %c0_1 = arith.constant 0 : index
    %c0_2 = arith.constant 0 : index
    %1 = vector.load %arg2[%c0_1, %c0_2] : memref<16x640xbf16, #tpu.memory_space<vmem>>, vector<16x640xbf16>
    %cst = arith.constant dense<0.000000e+00> : vector<16x640xf32>
    %2 = tpu.matmul %0, %1, %cst {dimension_numbers = #tpu.dot_dimension_numbers<[1], [0], [0], [1], [0, 0, 1, 1], [], []>} : vector<16x16xbf16>, vector<16x640xbf16>, vector<16x640xf32> -> vector<16x640xf32>
    %c0_3 = arith.constant 0 : index
    %c0_4 = arith.constant 0 : index
    %3 = vector.load %arg3[%c0_3, %c0_4] : memref<1x640xf32, #tpu.memory_space<vmem>>, vector<1x640xf32>
    %4 = vector.broadcast %3 : vector<1x640xf32> to vector<16x640xf32>
    %5 = arith.addf %2, %4 : vector<16x640xf32>
    %cst_5 = arith.constant 0.000000e+00 : f32
    %6 = vector.broadcast %cst_5 : f32 to vector<16x640xf32>
    %7 = arith.maximumf %5, %6 : vector<16x640xf32>
    %8 = arith.truncf %7 : vector<16x640xf32> to vector<16x640xbf16>
    %c0_6 = arith.constant 0 : index
    %c0_7 = arith.constant 0 : index
    %9 = vector.load %arg4[%c0_6, %c0_7] : memref<640x1280xbf16, #tpu.memory_space<vmem>>, vector<640x1280xbf16>
    %cst_8 = arith.constant dense<0.000000e+00> : vector<16x1280xf32>
    %10 = tpu.matmul %8, %9, %cst_8 {dimension_numbers = #tpu.dot_dimension_numbers<[1], [0], [0], [1], [0, 0, 1, 1], [], []>} : vector<16x640xbf16>, vector<640x1280xbf16>, vector<16x1280xf32> -> vector<16x1280xf32>
    %c0_9 = arith.constant 0 : index
    %c0_10 = arith.constant 0 : index
    %11 = vector.load %arg5[%c0_9, %c0_10] : memref<1x1280xf32, #tpu.memory_space<vmem>>, vector<1x1280xf32>
    %12 = vector.broadcast %11 : vector<1x1280xf32> to vector<16x1280xf32>
    %13 = arith.addf %10, %12 : vector<16x1280xf32>
    %cst_11 = arith.constant 0.000000e+00 : f32
    %14 = vector.broadcast %cst_11 : f32 to vector<16x1280xf32>
    %15 = arith.maximumf %13, %14 : vector<16x1280xf32>
    %c0_12 = arith.constant 0 : index
    %c0_13 = arith.constant 0 : index
    %16 = vector.load %arg6[%c0_12, %c0_13] : memref<1x1280xf32, #tpu.memory_space<vmem>>, vector<1x1280xf32>
    %17 = vector.broadcast %16 : vector<1x1280xf32> to vector<16x1280xf32>
    %18 = arith.mulf %15, %17 : vector<16x1280xf32>
    %cst_14 = arith.constant dense<0.000000e+00> : vector<16xf32>
    %19 = vector.multi_reduction <add>, %18, %cst_14 [1] : vector<16x1280xf32> to vector<16xf32>
    %20 = vector.shape_cast %19 : vector<16xf32> to vector<16x1xf32>
    %c0_15 = arith.constant 0 : index
    %c0_16 = arith.constant 0 : index
    %21 = vector.load %arg7[%c0_15, %c0_16] : memref<1x1xf32, #tpu.memory_space<vmem>>, vector<1x1xf32>
    %22 = vector.broadcast %21 : vector<1x1xf32> to vector<16x1xf32>
    %23 = arith.addf %20, %22 : vector<16x1xf32>
    %c0_17 = arith.constant 0 : index
    %c0_18 = arith.constant 0 : index
    %24 = vector.load %arg8[%c0_17, %c0_18] : memref<16x1xf32, #tpu.memory_space<vmem>>, vector<16x1xf32>
    tpu.vector_store %arg8[%c0_17, %c0_18], %23 {strides = array<i32>} : memref<16x1xf32, #tpu.memory_space<vmem>>, vector<16x1xf32>,
    return
  }
  func.func @transform_0(%arg0: i32) -> (i32, i32) {
    %c0_i32 = arith.constant 0 : i32
    %c0_i32_0 = arith.constant 0 : i32
    return %arg0, %c0_i32 : i32, i32
  }
  func.func @transform_1(%arg0: i32) -> (i32, i32) {
    %c0_i32 = arith.constant 0 : i32
    %c0_i32_0 = arith.constant 0 : i32
    %c0_i32_1 = arith.constant 0 : i32
    return %c0_i32, %c0_i32_0 : i32, i32
  }
  func.func @transform_2(%arg0: i32) -> (i32, i32) {
    %c0_i32 = arith.constant 0 : i32
    %c0_i32_0 = arith.constant 0 : i32
    %c0_i32_1 = arith.constant 0 : i32
    return %c0_i32, %c0_i32_0 : i32, i32
  }
  func.func @transform_3(%arg0: i32) -> (i32, i32) {
    %c0_i32 = arith.constant 0 : i32
    %c0_i32_0 = arith.constant 0 : i32
    %c0_i32_1 = arith.constant 0 : i32
    return %c0_i32, %c0_i32_0 : i32, i32
  }
  func.func @transform_4(%arg0: i32) -> (i32, i32) {
    %c0_i32 = arith.constant 0 : i32
    %c0_i32_0 = arith.constant 0 : i32
    %c0_i32_1 = arith.constant 0 : i32
    return %c0_i32, %c0_i32_0 : i32, i32
  }
  func.func @transform_5(%arg0: i32) -> (i32, i32) {
    %c0_i32 = arith.constant 0 : i32
    %c0_i32_0 = arith.constant 0 : i32
    %c0_i32_1 = arith.constant 0 : i32
    return %c0_i32, %c0_i32_0 : i32, i32
  }
  func.func @transform_6(%arg0: i32) -> (i32, i32) {
    %c0_i32 = arith.constant 0 : i32
    %c0_i32_0 = arith.constant 0 : i32
    %c0_i32_1 = arith.constant 0 : i32
    return %c0_i32, %c0_i32_0 : i32, i32
  }
  func.func @transform_7(%arg0: i32) -> (i32, i32) {
    %c0_i32 = arith.constant 0 : i32
    %c0_i32_0 = arith.constant 0 : i32
    return %arg0, %c0_i32 : i32, i32
  }
}

</mosaic_0001>

<bundles_post_ra>
// kernel: mlp_forward.1
= control target key start
LH: loop header
LB: loop body
LE: loop exit
PB: predicated region body
PF: predicated region fallthrough
CT: control target
= control target key end

     0   :  { %s5897_s0 = inlined_call_operand.vmem [shape: bf16[16,16], index: 0, kind: input, shape index: {}]   ;;  %s5898_s1 = inlined_call_operand.hbm [shape: bf16[16,640], index: 1, kind: input, shape index: {}]   ;;  %s5899_s2 = inlined_call_operand.hbm [shape: f32[1,640], index: 2, kind: input, shape index: {}]   ;;  %s5900_s3 = inlined_call_operand.hbm [shape: bf16[640,1280], index: 3, kind: input, shape index: {}]   ;;  %s5901_s4 = inlined_call_operand.hbm [shape: f32[1,1280], index: 4, kind: input, shape index: {}]   ;;  %s5902_s5 = inlined_call_operand.hbm [shape: f32[1,1280], index: 5, kind: input, shape index: {}]   ;;  %s5903_s6 = inlined_call_operand.<no memory space> [shape: f32[1,1], index: 6, kind: input, shape index: {}]   ;;  %s5904_s7 = inlined_call_operand.vmem [shape: f32[16,1], index: 7, kind: output, shape index: {}]  }
   0x1   :  { %v12_v0 = vstv %s5903_s6 }
   0x2   :  { %13 = vst [vmem:[#allocation2] sm:$0x1] %v12_v0 }
   0x3   :  { %14 = vsyncpa [#allocation4], 0 }
   0x4   :  { %15 = vsyncpa [#allocation6], 0  ;;  %s37_s28 = sshll.u32 %s5899_s2, 4  ;;  %s38_s28 = int_to_ptr.hbm [resolvable:$true] %s37_s28 }
   0x5   :  { %16 = vsyncpa [#allocation9], 0  ;;  %s5640_s29 = smov [#allocation5]   ;;  %s61_s10 = sshll.u32 %s5901_s4, 4  ;;  %s62_s10 = int_to_ptr.hbm [resolvable:$true] %s61_s10 }
   0x6   :  { %s39_s30 = sshll.u32 %s5640_s29, 4  ;;  %s5641_s11 = smov [#allocation8]   ;;  %s40_s30 = int_to_ptr.vmem [resolvable:$true] %s39_s30 }
   0x7   :  { %42 = dma.hbm_to_vmem [thread:$0]  %s38_s28, 80, %s40_s30, [#allocation6]  }
   0x8   :  { %s63_s6 = sshll.u32 %s5641_s11, 4  ;;  %s23_s14 = sshll.u32 %s5898_s1, 4  ;;  %s64_s6 = int_to_ptr.vmem [resolvable:$true] %s63_s6  ;;  %s24_s14 = int_to_ptr.hbm [resolvable:$true] %s23_s14 }
   0x9   :  { %66 = dma.hbm_to_vmem [thread:$0]  %s62_s10, 160, %s64_s6, [#allocation9]  }
   0xa   :  { %s5642_s2 = smov [#allocation3]   ;;  %s47_s18 = sshll.u32 %s5900_s3, 4  ;;  %s48_s18 = int_to_ptr.hbm [resolvable:$true] %s47_s18 }
   0xb   :  { %s25_s15 = sshll.u32 %s5642_s2, 4  ;;  %s5643_s19 = smov 320   ;;  %s26_s15 = int_to_ptr.vmem [resolvable:$true] %s25_s15 }
   0xc   :  { %s5644_s4 = smov 20   ;;  %s5645_s20 = smov [#allocation7]  }
   0xd   :  { %31 = dma.hbm_to_vmem [thread:$0]  %s24_s14, 640, %s26_s15, [#allocation4], %s5643_s19, %s5643_s19, %s5644_s4  }
   0xe   :  { %s49_s21 = sshll.u32 %s5645_s20, 4  ;;  %s5646_s22 = smov 640   ;;  %s50_s21 = int_to_ptr.vmem [resolvable:$true] %s49_s21 }
   0xf   :  { %s5647_s23 = smov 40   ;;  %s72_s25 = sshll.u32 %s5902_s5, 4  ;;  %s73_s25 = int_to_ptr.hbm [resolvable:$true] %s72_s25 }
  0x10   :  { %55 = dma.hbm_to_vmem [thread:$0]  %s48_s18, 51200, %s50_s21, [#allocation6], %s5646_s22, %s5646_s22, %s5647_s23  }
  0x11   :  { %s5648_s26 = smov [#allocation10]  }
  0x12   :  { %s74_s27 = sshll.u32 %s5648_s26, 4  ;;  %s75_s27 = int_to_ptr.vmem [resolvable:$true] %s74_s27 }
  0x13   :  { %77 = dma.hbm_to_vmem [thread:$0]  %s73_s25, 160, %s75_s27, [#allocation9]  }
  0x14   :  { %5634 = dma.done.wait [#allocation4], 640  }
  0x15   :  { %5635 = vsyncadd [#allocation4], 4294966656 }
  0x16   :  { %5636 = dma.done.wait [#allocation6], 51280  }
  0x17   :  { %5637 = vsyncadd [#allocation6], 4294916016 }
  0x18   :  { %5638 = dma.done.wait [#allocation9], 320  }
  0x19   :  { %5639 = vsyncadd [#allocation9], 4294966976  ;;  %v3473_v1 = vld [vmem:[#allocation3] sm:$0xf]  ;;  %v5099_v2 = vld [vmem:[#allocation3 + $0x10] sm:$0xf0] }
  0x1a   :  { %v5097_v3 = vld [vmem:[#allocation3 + $0x4] sm:$0xf]  ;;  %v3474_v4 = vor.u32 %v5099_v2, %v3473_v1  ;;  %v3475_v5 = vld [vmem:[#allocation3 + $0x14] sm:$0xf0]  ;;  %v3481_v6 = vld [vmem:[#allocation3 + $0x8] sm:$0xf] }
  0x1b   :  { %v5100_v7 = vld [vmem:[#allocation3 + $0x18] sm:$0xf0]  ;;  %v3478_v8 = vor.u32 %v5097_v3, %v3475_v5  ;;  %vm152_vm0 = vcmask 130048   ;;  %v5098_v11 = vld [vmem:[#allocation3 + $0xc] sm:$0xf]  ;;  %vm3457_vm1 = vcmask 7168  }
  0x1c   :  { %v3482_v9 = vor.u32 %v5100_v7, %v3481_v6  ;;  %v5710_v10 = vld [vmem:[%s5897_s0] sm:$0xff]  ;;  %163 = vmatpush.bf16.msra.mxu0 %v3474_v4  ;;  %v3489_v14 = vld [vmem:[#allocation3 + $0x10] sm:$0xf]  ;;  %v5167_v20 = vld [vmem:[#allocation7 + $0x204] sm:$0xf0] }
  0x1d   :  { %v3483_v12 = vld [vmem:[#allocation3 + $0x1c] sm:$0xf0]  ;;  %v5101_v15 = vld [vmem:[#allocation3 + $0x20] sm:$0xf0]  ;;  %177 = vmatpush.bf16.msra.mxu3 %v3478_v8  ;;  %v3738_v19 = vld [vmem:[#allocation7 + $0x1e0] sm:$0xf] }
  0x1e   :  { %v3486_v13 = vor.u32 %v5098_v11, %v3483_v12  ;;  %v3778_v16 = vld [vmem:[#allocation7 + $0x230] sm:$0xf]  ;;  %191 = vmatpush.bf16.msra.mxu2 %v3482_v9  ;;  %v3490_v17 = vor.u32 %v5101_v15, %v3489_v14  ;;  %v5177_v18 = vld [vmem:[#allocation7 + $0x254] sm:$0xf0]  ;;  %v4058_v28 = vld [vmem:[#allocation7 + $0x460] sm:$0xf]  ;;  %v3739_v31 = vor.u32 %v5167_v20, %v3738_v19 }
  0x1f   :  { %v3779_v21 = vor.u32 %v5177_v18, %v3778_v16  ;;  %v4098_v22 = vld [vmem:[#allocation7 + $0x4b0] sm:$0xf]  ;;  %v5257_v23 = vld [vmem:[#allocation7 + $0x4d4] sm:$0xf0]  ;;  %3491 = vmatmul.msk.bf16.vlgmr.msra.gmra.mxu0 %vm152_vm0, %v5710_v10  ;;  %v5247_v29 = vld [vmem:[#allocation7 + $0x484] sm:$0xf0] }
  0x20   :  { %v4418_v24 = vld [vmem:[#allocation7 + $0x730] sm:$0xf]  ;;  %v4099_v25 = vor.u32 %v5257_v23, %v4098_v22  ;;  %v5337_v26 = vld [vmem:[#allocation7 + $0x754] sm:$0xf0]  ;;  %3492 = vmatmul.msk.bf16.vlgmr.msra.gmra.mxu3 %vm152_vm0, %v5710_v10  ;;  %v4378_v30 = vld [vmem:[#allocation7 + $0x6e0] sm:$0xf]  ;;  %219 = vmatpush.bf16.msrb.mxu0 %v3490_v17  ;;  %v4059_v35 = vor.u32 %v5247_v29, %v4058_v28 }
  0x21   :  { %205 = vmatpush.bf16.msrb.mxu3 %v3486_v13  ;;  %3493 = vmatmul.msk.bf16.vlgmr.msra.gmra.mxu2 %vm152_vm0, %v5710_v10  ;;  %v4419_v27 = vor.u32 %v5337_v26, %v4418_v24  ;;  %v5327_v32 = vld [vmem:[#allocation7 + $0x704] sm:$0xf0]  ;;  %v3698_v33 = vld [vmem:[#allocation7 + $0x190] sm:$0xf]  ;;  %v5157_v34 = vld [vmem:[#allocation7 + $0x1b4] sm:$0xf0] }
  0x22   :  { %2665 = vmatpush.bf16.msra.mxu1 %v3779_v21  ;;  %2679 = vmatpush.bf16.msrb.mxu2 %v4099_v25  ;;  %v4379_v36 = vor.u32 %v5327_v32, %v4378_v30  ;;  %v4018_v37 = vld [vmem:[#allocation7 + $0x410] sm:$0xf]  ;;  %v5237_v38 = vld [vmem:[#allocation7 + $0x434] sm:$0xf0]  ;;  %v3699_v41 = vor.u32 %v5157_v34, %v3698_v33  ;;  %v3658_v42 = vld [vmem:[#allocation7 + $0x140] sm:$0xf] }
  0x23   :  { %v4338_v39 = vld [vmem:[#allocation7 + $0x690] sm:$0xf]  ;;  %v5317_v40 = vld [vmem:[#allocation7 + $0x6b4] sm:$0xf0]  ;;  %v5147_v43 = vld [vmem:[#allocation7 + $0x164] sm:$0xf0]  ;;  %v4019_v44 = vor.u32 %v5237_v38, %v4018_v37 }
  0x24   :  { %v4339_v45 = vor.u32 %v5317_v40, %v4338_v39  ;;  %v3978_v46 = vld [vmem:[#allocation7 + $0x3c0] sm:$0xf]  ;;  %v5227_v47 = vld [vmem:[#allocation7 + $0x3e4] sm:$0xf0]  ;;  %v4738_v50 = vld [vmem:[#allocation7 + $0x9b0] sm:$0xf]  ;;  %v3659_v53 = vor.u32 %v5147_v43, %v3658_v42 }
  0x25   :  { %2693 = vmatpush.bf16.msra.mxu3 %v4419_v27  ;;  %v4298_v48 = vld [vmem:[#allocation7 + $0x640] sm:$0xf]  ;;  %v5307_v49 = vld [vmem:[#allocation7 + $0x664] sm:$0xf0]  ;;  %v5417_v51 = vld [vmem:[#allocation7 + $0x9d4] sm:$0xf0]  ;;  %v3979_v56 = vor.u32 %v5227_v47, %v3978_v46 }
  0x26   :  { %2666 = vmatpush.bf16.msra.mxu1 %v3739_v31  ;;  %2680 = vmatpush.bf16.msrb.mxu2 %v4059_v35  ;;  %v4739_v52 = vor.u32 %v5417_v51, %v4738_v50  ;;  %v3618_v54 = vld [vmem:[#allocation7 + $0xf0] sm:$0xf]  ;;  %v5137_v55 = vld [vmem:[#allocation7 + $0x114] sm:$0xf0]  ;;  %v4299_v57 = vor.u32 %v5307_v49, %v4298_v48  ;;  %v4698_v59 = vld [vmem:[#allocation7 + $0x960] sm:$0xf] }
  0x27   :  { %v3938_v58 = vld [vmem:[#allocation7 + $0x370] sm:$0xf]  ;;  %v5407_v60 = vld [vmem:[#allocation7 + $0x984] sm:$0xf0]  ;;  %v5217_v61 = vld [vmem:[#allocation7 + $0x394] sm:$0xf0]  ;;  %v3619_v1 = vor.u32 %v5137_v55, %v3618_v54 }
  0x28   :  { %v4258_v62 = vld [vmem:[#allocation7 + $0x5f0] sm:$0xf]  ;;  %v5297_v63 = vld [vmem:[#allocation7 + $0x614] sm:$0xf0]  ;;  %2707 = vmatpush.bf16.msra.mxu0 %v4739_v52  ;;  %v4699_v0 = vor.u32 %v5407_v60, %v4698_v59  ;;  %v3578_v4 = vld [vmem:[#allocation7 + $0xa0] sm:$0xf]  ;;  %v3939_v6 = vor.u32 %v5217_v61, %v3938_v58 }
  0x29   :  { %2694 = vmatpush.bf16.msra.mxu3 %v4379_v36  ;;  %v4658_v2 = vld [vmem:[#allocation7 + $0x910] sm:$0xf]  ;;  %v5397_v3 = vld [vmem:[#allocation7 + $0x934] sm:$0xf0]  ;;  %v5127_v5 = vld [vmem:[#allocation7 + $0xc4] sm:$0xf0]  ;;  %v4259_v7 = vor.u32 %v5297_v63, %v4258_v62 }
  0x2a   :  { %2667 = vmatpush.bf16.msra.mxu1 %v3699_v41  ;;  %2681 = vmatpush.bf16.msrb.mxu2 %v4019_v44  ;;  %v3898_v8 = vld [vmem:[#allocation7 + $0x320] sm:$0xf]  ;;  %v5207_v9 = vld [vmem:[#allocation7 + $0x344] sm:$0xf0]  ;;  %v4659_v13 = vor.u32 %v5397_v3, %v4658_v2  ;;  %v3579_v14 = vor.u32 %v5127_v5, %v3578_v4  ;;  %v3538_v17 = vld [vmem:[#allocation7 + $0x50] sm:$0xf] }
  0x2b   :  { %v4218_v11 = vld [vmem:[#allocation7 + $0x5a0] sm:$0xf]  ;;  %v5287_v12 = vld [vmem:[#allocation7 + $0x5c4] sm:$0xf0]  ;;  %v5117_v18 = vld [vmem:[#allocation7 + $0x74] sm:$0xf0]  ;;  %v3899_v19 = vor.u32 %v5207_v9, %v3898_v8 }
  0x2c   :  { %2708 = vmatpush.bf16.msra.mxu0 %v4699_v0  ;;  %v4618_v15 = vld [vmem:[#allocation7 + $0x8c0] sm:$0xf]  ;;  %v5387_v16 = vld [vmem:[#allocation7 + $0x8e4] sm:$0xf0]  ;;  %v4219_v20 = vor.u32 %v5287_v12, %v4218_v11  ;;  %v3858_v21 = vld [vmem:[#allocation7 + $0x2d0] sm:$0xf]  ;;  %v3539_v27 = vor.u32 %v5117_v18, %v3538_v17 }
  0x2d   :  { %2695 = vmatpush.bf16.msra.mxu3 %v4339_v45  ;;  %v5197_v22 = vld [vmem:[#allocation7 + $0x2f4] sm:$0xf0]  ;;  %v4178_v23 = vld [vmem:[#allocation7 + $0x550] sm:$0xf]  ;;  %v3498_v25 = vld [vmem:[#allocation7] sm:$0xf] }
  0x2e   :  { %2668 = vmatpush.bf16.msra.mxu1 %v3659_v53  ;;  %2682 = vmatpush.bf16.msrb.mxu2 %v3979_v56  ;;  %v5277_v24 = vld [vmem:[#allocation7 + $0x574] sm:$0xf0]  ;;  %v5107_v26 = vld [vmem:[#allocation7 + $0x24] sm:$0xf0]  ;;  %v5058_v28 = vld [vmem:[#allocation7 + $0xc30] sm:$0xf]  ;;  %v3859_v32 = vor.u32 %v5197_v22, %v3858_v21 }
  0x2f   :  { %3495 = vmatmul.msk.bf16.vlgmr.msrb.gmra.mxu0 %vm152_vm0, %v5710_v10  ;;  %v4578_v29 = vld [vmem:[#allocation7 + $0x870] sm:$0xf]  ;;  %v5377_v30 = vld [vmem:[#allocation7 + $0x894] sm:$0xf0]  ;;  %v4179_v33 = vor.u32 %v5277_v24, %v4178_v23  ;;  %v3818_v34 = vld [vmem:[#allocation7 + $0x280] sm:$0xf]  ;;  %v3499_v42 = vor.u32 %v5107_v26, %v3498_v25 }
  0x30   :  { %3494 = vmatmul.msk.bf16.vlgmr.msrb.gmra.mxu3 %vm152_vm0, %v5710_v10  ;;  %2709 = vmatpush.bf16.msra.mxu0 %v4659_v13  ;;  %v4619_v10 = vor.u32 %v5387_v16, %v4618_v15  ;;  %v5497_v31 = vld [vmem:[#allocation7 + $0xc54] sm:$0xf0]  ;;  %v5187_v35 = vld [vmem:[#allocation7 + $0x2a4] sm:$0xf0]  ;;  %v4138_v36 = vld [vmem:[#allocation7 + $0x500] sm:$0xf]  ;;  %v4579_v41 = vor.u32 %v5377_v30, %v4578_v29 }
  0x31   :  { %2696 = vmatpush.bf16.msra.mxu3 %v4299_v57  ;;  %v5267_v37 = vld [vmem:[#allocation7 + $0x524] sm:$0xf0]  ;;  %v5172_v38 = vld [vmem:[#allocation7 + $0x234] sm:$0xf]  ;;  %v3780_v39 = vld [vmem:[#allocation7 + $0x258] sm:$0xf0]  ;;  %v5059_v46 = vor.u32 %v5497_v31, %v5058_v28  ;;  %v3819_v47 = vor.u32 %v5187_v35, %v3818_v34 }
  0x32   :  { %2669 = vmatpush.bf16.msra.mxu1 %v3619_v1  ;;  %2683 = vmatpush.bf16.msrb.mxu2 %v3939_v6  ;;  %v5252_v40 = vld [vmem:[#allocation7 + $0x4b4] sm:$0xf]  ;;  %v4100_v43 = vld [vmem:[#allocation7 + $0x4d8] sm:$0xf0]  ;;  %v4538_v44 = vld [vmem:[#allocation7 + $0x820] sm:$0xf]  ;;  %v4139_v50 = vor.u32 %v5267_v37, %v4138_v36  ;;  %v3783_v51 = vor.u32 %v5172_v38, %v3780_v39 }
  0x33   :  { %v5367_v45 = vld [vmem:[#allocation7 + $0x844] sm:$0xf0]  ;;  %v5018_v48 = vld [vmem:[#allocation7 + $0xbe0] sm:$0xf]  ;;  %v4103_v52 = vor.u32 %v5252_v40, %v4100_v43  ;;  %v5162_v53 = vld [vmem:[#allocation7 + $0x1e4] sm:$0xf] }
  0x34   :  { %2710 = vmatpush.bf16.msra.mxu0 %v4619_v10  ;;  %v5487_v49 = vld [vmem:[#allocation7 + $0xc04] sm:$0xf0]  ;;  %v3740_v54 = vld [vmem:[#allocation7 + $0x208] sm:$0xf0]  ;;  %v4539_v55 = vor.u32 %v5367_v45, %v4538_v44  ;;  %v5242_v56 = vld [vmem:[#allocation7 + $0x464] sm:$0xf] }
  0x35   :  { %2697 = vmatpush.bf16.msra.mxu3 %v4259_v7  ;;  %v4060_v57 = vld [vmem:[#allocation7 + $0x488] sm:$0xf0]  ;;  %v5019_v58 = vor.u32 %v5487_v49, %v5018_v48  ;;  %v4978_v59 = vld [vmem:[#allocation7 + $0xb90] sm:$0xf]  ;;  %v5477_v60 = vld [vmem:[#allocation7 + $0xbb4] sm:$0xf0]  ;;  %v3743_v61 = vor.u32 %v5162_v53, %v3740_v54 }
  0x36   :  { %2670 = vmatpush.bf16.msra.mxu1 %v3579_v14  ;;  %2684 = vmatpush.bf16.msrb.mxu2 %v3899_v19  ;;  %v4063_v62 = vor.u32 %v5242_v56, %v4060_v57  ;;  %v4979_v63 = vor.u32 %v5477_v60, %v4978_v59  ;;  %v4938_v0 = vld [vmem:[#allocation7 + $0xb40] sm:$0xf]  ;;  %v5467_v1 = vld [vmem:[#allocation7 + $0xb64] sm:$0xf0]  ;;  %v5152_v3 = vld [vmem:[#allocation7 + $0x194] sm:$0xf] }
  0x37   :  { %v4939_v2 = vor.u32 %v5467_v1, %v4938_v0  ;;  %v3700_v4 = vld [vmem:[#allocation7 + $0x1b8] sm:$0xf0]  ;;  %v5232_v5 = vld [vmem:[#allocation7 + $0x414] sm:$0xf]  ;;  %v4898_v9 = vld [vmem:[#allocation7 + $0xaf0] sm:$0xf] }
  0x38   :  { %2711 = vmatpush.bf16.msra.mxu0 %v4579_v41  ;;  %v3703_v6 = vor.u32 %v5152_v3, %v3700_v4  ;;  %v4020_v7 = vld [vmem:[#allocation7 + $0x438] sm:$0xf0]  ;;  %v5457_v11 = vld [vmem:[#allocation7 + $0xb14] sm:$0xf0]  ;;  %v4498_v13 = vld [vmem:[#allocation7 + $0x7d0] sm:$0xf] }
  0x39   :  { %2698 = vmatpush.bf16.msra.mxu3 %v4219_v20  ;;  %v4023_v8 = vor.u32 %v5232_v5, %v4020_v7  ;;  %v4899_v12 = vor.u32 %v5457_v11, %v4898_v9  ;;  %v5357_v14 = vld [vmem:[#allocation7 + $0x7f4] sm:$0xf0]  ;;  %v5142_v16 = vld [vmem:[#allocation7 + $0x144] sm:$0xf]  ;;  %v3660_v17 = vld [vmem:[#allocation7 + $0x168] sm:$0xf0] }
  0x3a   :  { %2671 = vmatpush.bf16.msra.mxu1 %v3539_v27  ;;  %2685 = vmatpush.bf16.msrb.mxu2 %v3859_v32  ;;  %v4499_v15 = vor.u32 %v5357_v14, %v4498_v13  ;;  %v5222_v18 = vld [vmem:[#allocation7 + $0x3c4] sm:$0xf]  ;;  %v3663_v19 = vor.u32 %v5142_v16, %v3660_v17  ;;  %v3980_v20 = vld [vmem:[#allocation7 + $0x3e8] sm:$0xf0]  ;;  %v4858_v22 = vld [vmem:[#allocation7 + $0xaa0] sm:$0xf] }
  0x3b   :  { %v3983_v21 = vor.u32 %v5222_v18, %v3980_v20  ;;  %v5447_v23 = vld [vmem:[#allocation7 + $0xac4] sm:$0xf0]  ;;  %v4458_v25 = vld [vmem:[#allocation7 + $0x780] sm:$0xf]  ;;  %v5132_v27 = vld [vmem:[#allocation7 + $0xf4] sm:$0xf] }
  0x3c   :  { %2712 = vmatpush.bf16.msra.mxu0 %v4539_v55  ;;  %v4859_v24 = vor.u32 %v5447_v23, %v4858_v22  ;;  %v5347_v26 = vld [vmem:[#allocation7 + $0x7a4] sm:$0xf0]  ;;  %v3620_v28 = vld [vmem:[#allocation7 + $0x118] sm:$0xf0]  ;;  %v5212_v29 = vld [vmem:[#allocation7 + $0x374] sm:$0xf] }
  0x3d   :  { %2699 = vmatpush.bf16.msra.mxu3 %v4179_v33  ;;  %v4459_v10 = vor.u32 %v5347_v26, %v4458_v25  ;;  %v3623_v30 = vor.u32 %v5132_v27, %v3620_v28  ;;  %v3940_v31 = vld [vmem:[#allocation7 + $0x398] sm:$0xf0]  ;;  %v5332_v32 = vld [vmem:[#allocation7 + $0x734] sm:$0xf]  ;;  %v4818_v36 = vld [vmem:[#allocation7 + $0xa50] sm:$0xf] }
  0x3e   :  { %2672 = vmatpush.bf16.msra.mxu1 %v3499_v42  ;;  %2686 = vmatpush.bf16.msrb.mxu2 %v3819_v47  ;;  %v4420_v33 = vld [vmem:[#allocation7 + $0x758] sm:$0xf0]  ;;  %v3943_v34 = vor.u32 %v5212_v29, %v3940_v31  ;;  %v5437_v37 = vld [vmem:[#allocation7 + $0xa74] sm:$0xf0]  ;;  %v5122_v39 = vld [vmem:[#allocation7 + $0xa4] sm:$0xf] }
  0x3f   :  { %v4423_v35 = vor.u32 %v5332_v32, %v4420_v33  ;;  %v4819_v38 = vor.u32 %v5437_v37, %v4818_v36  ;;  %v3580_v40 = vld [vmem:[#allocation7 + $0xc8] sm:$0xf0]  ;;  %v5202_v42 = vld [vmem:[#allocation7 + $0x324] sm:$0xf]  ;;  %v4778_v47 = vld [vmem:[#allocation7 + $0xa00] sm:$0xf] }
  0x40   :  { %2713 = vmatpush.bf16.msra.mxu0 %v4499_v15  ;;  %v3583_v41 = vor.u32 %v5122_v39, %v3580_v40  ;;  %v3900_v43 = vld [vmem:[#allocation7 + $0x348] sm:$0xf0]  ;;  %v5322_v44 = vld [vmem:[#allocation7 + $0x6e4] sm:$0xf]  ;;  %v5427_v48 = vld [vmem:[#allocation7 + $0xa24] sm:$0xf0] }
  0x41   :  { %2700 = vmatpush.bf16.msra.mxu3 %v4139_v50  ;;  %v3903_v45 = vor.u32 %v5202_v42, %v3900_v43  ;;  %v4779_v50 = vor.u32 %v5427_v48, %v4778_v47  ;;  %v5192_v53 = vld [vmem:[#allocation7 + $0x2d4] sm:$0xf]  ;;  %v3860_v55 = vld [vmem:[#allocation7 + $0x2f8] sm:$0xf0]  ;;  %v5102_v60 = vld [vmem:[#allocation7 + $0x4] sm:$0xf] }
  0x42   :  { %2721 = vmatpush.bf16.msrb.mxu1 %v5059_v46  ;;  %2735 = vmatpush.bf16.msra.mxu2 %v3783_v51  ;;  %v4380_v46 = vld [vmem:[#allocation7 + $0x708] sm:$0xf0]  ;;  %v5112_v51 = vld [vmem:[#allocation7 + $0x54] sm:$0xf]  ;;  %v4340_v57 = vld [vmem:[#allocation7 + $0x6b8] sm:$0xf0] }
  0x43   :  { %v4383_v49 = vor.u32 %v5322_v44, %v4380_v46  ;;  %v5312_v56 = vld [vmem:[#allocation7 + $0x694] sm:$0xf]  ;;  %v3820_v0 = vld [vmem:[#allocation7 + $0x2a8] sm:$0xf0]  ;;  %v5302_v1 = vld [vmem:[#allocation7 + $0x644] sm:$0xf] }
  0x44   :  { %2714 = vmatpush.bf16.msra.mxu0 %v4459_v10  ;;  %v4343_v59 = vor.u32 %v5312_v56, %v4340_v57  ;;  %v5292_v5 = vld [vmem:[#allocation7 + $0x5f4] sm:$0xf]  ;;  %v4220_v9 = vld [vmem:[#allocation7 + $0x5c8] sm:$0xf0]  ;;  %v4180_v13 = vld [vmem:[#allocation7 + $0x578] sm:$0xf0] }
  0x45   :  { %2749 = vmatpush.bf16.msrb.mxu3 %v4103_v52  ;;  %v3540_v52 = vld [vmem:[#allocation7 + $0x78] sm:$0xf0]  ;;  %v5262_v18 = vld [vmem:[#allocation7 + $0x504] sm:$0xf]  ;;  %v5412_v27 = vld [vmem:[#allocation7 + $0x9b4] sm:$0xf] }
  0x46   :  { %2722 = vmatpush.bf16.msrb.mxu1 %v5019_v58  ;;  %2736 = vmatpush.bf16.msra.mxu2 %v3743_v61  ;;  %v3543_v54 = vor.u32 %v5112_v51, %v3540_v52  ;;  %v3863_v58 = vor.u32 %v5192_v53, %v3860_v55  ;;  %v3500_v61 = vld [vmem:[#allocation7 + $0x28] sm:$0xf0]  ;;  %v5722_v14 = vld [vmem:[#allocation5] sm:$0x1f]  ;;  %v5492_v39 = vld [vmem:[#allocation7 + $0xc34] sm:$0xf] }
  0x47   :  { %v111_v17 = vperm.slane %v5722_v14, 0  ;;  %v4740_v28 = vld [vmem:[#allocation7 + $0x9d8] sm:$0xf0]  ;;  %v112_v29 = vperm.slane %v5722_v14, 1  ;;  %v3786_v46 = vld [vmem:[#allocation7 + $0x238] sm:$0xf] }
  0x48   :  { %2763 = vmatpush.bf16.msrb.mxu0 %v4423_v35  ;;  %v4743_v32 = vor.u32 %v5412_v27, %v4740_v28  ;;  %v4700_v35 = vld [vmem:[#allocation7 + $0x988] sm:$0xf0]  ;;  %v5060_v40 = vld [vmem:[#allocation7 + $0xc58] sm:$0xf0]  ;;  %v5178_v47 = vld [vmem:[#allocation7 + $0x25c] sm:$0xf0] }
  0x49   :  { %2750 = vmatpush.bf16.msrb.mxu3 %v4063_v62  ;;  %v5182_v62 = vld [vmem:[#allocation7 + $0x284] sm:$0xf]  ;;  %v115_v48 = vperm.slane %v5722_v14, 4  ;;  %v3787_v55 = vor.u32 %v5178_v47, %v3786_v46  ;;  %v4540_v27 = vld [vmem:[#allocation7 + $0x848] sm:$0xf0] }
  0x4a   :  { %2723 = vmatpush.bf16.msrb.mxu1 %v4979_v63  ;;  %2737 = vmatpush.bf16.msra.mxu2 %v3703_v6  ;;  %v3503_v63 = vor.u32 %v5102_v60, %v3500_v61  ;;  %v3823_v3 = vor.u32 %v5182_v62, %v3820_v0  ;;  %v4260_v6 = vld [vmem:[#allocation7 + $0x618] sm:$0xf0]  ;;  %v5482_v56 = vld [vmem:[#allocation7 + $0xbe4] sm:$0xf]  ;;  %v5020_v60 = vld [vmem:[#allocation7 + $0xc08] sm:$0xf0] }
  0x4b   :  { %v4263_v7 = vor.u32 %v5292_v5, %v4260_v6  ;;  %v3746_v61 = vld [vmem:[#allocation7 + $0x1e8] sm:$0xf]  ;;  %v5168_v62 = vld [vmem:[#allocation7 + $0x20c] sm:$0xf0]  ;;  %v5382_v0 = vld [vmem:[#allocation7 + $0x8c4] sm:$0xf] }
  0x4c   :  { %2764 = vmatpush.bf16.msrb.mxu0 %v4383_v49  ;;  %v5392_v49 = vld [vmem:[#allocation7 + $0x914] sm:$0xf]  ;;  %v3747_v5 = vor.u32 %v5168_v62, %v3746_v61  ;;  %v5338_v61 = vld [vmem:[#allocation7 + $0x75c] sm:$0xf0] }
  0x4d   :  { %2751 = vmatpush.bf16.msrb.mxu3 %v4023_v8  ;;  %v5282_v8 = vld [vmem:[#allocation7 + $0x5a4] sm:$0xf]  ;;  %v5472_v6 = vld [vmem:[#allocation7 + $0xb94] sm:$0xf] }
  0x4e   :  { %2724 = vmatpush.bf16.msrb.mxu1 %v4939_v2  ;;  %2738 = vmatpush.bf16.msra.mxu2 %v3663_v19  ;;  %v4300_v2 = vld [vmem:[#allocation7 + $0x668] sm:$0xf0]  ;;  %v4223_v11 = vor.u32 %v5282_v8, %v4220_v9  ;;  %v4980_v9 = vld [vmem:[#allocation7 + $0xbb8] sm:$0xf0] }
  0x4f   :  { %v4303_v4 = vor.u32 %v5302_v1, %v4300_v2  ;;  %v4140_v19 = vld [vmem:[#allocation7 + $0x528] sm:$0xf0]  ;;  %v114_v2 = vperm.slane %v5722_v14, 3 }
  0x50   :  { %2765 = vmatpush.bf16.msrb.mxu0 %v4343_v59  ;;  %v4143_v20 = vor.u32 %v5262_v18, %v4140_v19  ;;  %v4620_v1 = vld [vmem:[#allocation7 + $0x8e8] sm:$0xf0]  ;;  %v4983_v19 = vor.u32 %v5472_v6, %v4980_v9  ;;  %v5238_v6 = vld [vmem:[#allocation7 + $0x43c] sm:$0xf0]  ;;  %v4386_v9 = vld [vmem:[#allocation7 + $0x6e8] sm:$0xf] }
  0x51   :  { %2752 = vmatpush.bf16.msrb.mxu3 %v3983_v21  ;;  %v4623_v8 = vor.u32 %v5382_v0, %v4620_v1  ;;  %v5432_v0 = vld [vmem:[#allocation7 + $0xa54] sm:$0xf]  ;;  %v4820_v1 = vld [vmem:[#allocation7 + $0xa78] sm:$0xf0] }
  0x52   :  { %2725 = vmatpush.bf16.msrb.mxu1 %v4899_v12  ;;  %2739 = vmatpush.bf16.msra.mxu2 %v3623_v30  ;;  %v5272_v12 = vld [vmem:[#allocation7 + $0x554] sm:$0xf] }
  0x53   :  { %v4183_v16 = vor.u32 %v5272_v12, %v4180_v13  ;;  %v5158_v12 = vld [vmem:[#allocation7 + $0x1bc] sm:$0xf0] }
  0x54   :  { %2766 = vmatpush.bf16.msrb.mxu0 %v4303_v4  ;;  %v5023_v4 = vor.u32 %v5482_v56, %v5020_v60  ;;  %v4460_v56 = vld [vmem:[#allocation7 + $0x7a8] sm:$0xf0]  ;;  %v4426_v60 = vld [vmem:[#allocation7 + $0x738] sm:$0xf] }
  0x55   :  { %2753 = vmatpush.bf16.msrb.mxu3 %v3943_v34  ;;  %v5402_v34 = vld [vmem:[#allocation7 + $0x964] sm:$0xf] }
  0x56   :  { %2726 = vmatpush.bf16.msrb.mxu1 %v4859_v24  ;;  %2740 = vmatpush.bf16.msra.mxu2 %v3583_v41  ;;  %v113_v24 = vperm.slane %v5722_v14, 2  ;;  %v5462_v14 = vld [vmem:[#allocation7 + $0xb44] sm:$0xf] }
  0x58   :  { %2767 = vmatpush.bf16.msrb.mxu0 %v4263_v7 }
  0x59   :  { %2754 = vmatpush.bf16.msrb.mxu3 %v3903_v45  ;;  %v4703_v45 = vor.u32 %v5402_v34, %v4700_v35  ;;  %v4900_v35 = vld [vmem:[#allocation7 + $0xb18] sm:$0xf0] }
  0x5a   :  { %2727 = vmatpush.bf16.msrb.mxu1 %v4819_v38  ;;  %2741 = vmatpush.bf16.msra.mxu2 %v3543_v54  ;;  %v5063_v54 = vor.u32 %v5492_v39, %v5060_v40  ;;  %v4106_v39 = vld [vmem:[#allocation7 + $0x4b8] sm:$0xf]  ;;  %v5258_v40 = vld [vmem:[#allocation7 + $0x4dc] sm:$0xf0] }
  0x5b   :  { %v4107_v47 = vor.u32 %v5258_v40, %v4106_v39  ;;  %v5488_v39 = vld [vmem:[#allocation7 + $0xc0c] sm:$0xf0]  ;;  %v4306_v40 = vld [vmem:[#allocation7 + $0x648] sm:$0xf] }
  0x5c   :  { %2768 = vmatpush.bf16.msrb.mxu0 %v4223_v11  ;;  %v3706_v11 = vld [vmem:[#allocation7 + $0x198] sm:$0xf] }
  0x5d   :  { %2755 = vmatpush.bf16.msrb.mxu3 %v3863_v58 }
  0x5e   :  { %2728 = vmatpush.bf16.msrb.mxu1 %v4779_v50  ;;  %2742 = vmatpush.bf16.msra.mxu2 %v3503_v63  ;;  %v4660_v50 = vld [vmem:[#allocation7 + $0x938] sm:$0xf0] }
  0x5f   :  { %v4663_v59 = vor.u32 %v5392_v49, %v4660_v50  ;;  %v4860_v49 = vld [vmem:[#allocation7 + $0xac8] sm:$0xf0]  ;;  %v3586_v50 = vld [vmem:[#allocation7 + $0xa8] sm:$0xf] }
  0x60   :  { %2769 = vmatpush.bf16.msrb.mxu0 %v4183_v16  ;;  %v5372_v16 = vld [vmem:[#allocation7 + $0x874] sm:$0xf] }
  0x61   :  { %2756 = vmatpush.bf16.msrb.mxu3 %v3823_v3 }
  0x64   :  { %2770 = vmatpush.bf16.msrb.mxu0 %v4143_v20  ;;  %v3707_v20 = vor.u32 %v5158_v12, %v3706_v11  ;;  %v5328_v11 = vld [vmem:[#allocation7 + $0x70c] sm:$0xf0]  ;;  %v5422_v12 = vld [vmem:[#allocation7 + $0xa04] sm:$0xf] }
  0x9c   :  { %v165_v15 = vpop.f32.mrf.mxu0 }
  0x9d   :  { %v166_v21 = vadd.f32 %v165_v15, %v111_v17 }
  0x9f   :  { %v226_v26 = vmax.f32 %v166_v21, 0.0 }
  0xa3   :  { %v179_v22 = vpop.f32.mrf.mxu3 }
  0xa4   :  { %v193_v23 = vpop.f32.mrf.mxu2  ;;  %v167_v25 = vpop.f32.mrf.mxu0  ;;  %v180_v36 = vadd.f32 %v179_v22, %v112_v29  ;;  %v4940_v22 = vld [vmem:[#allocation7 + $0xb68] sm:$0xf0] }
  0xa5   :  { %v168_v10 = vadd.f32 %v167_v25, %v111_v17  ;;  %v194_v31 = vadd.f32 %v193_v23, %v113_v24  ;;  %v4580_v17 = vld [vmem:[#allocation7 + $0x898] sm:$0xf0]  ;;  %v3666_v23 = vld [vmem:[#allocation7 + $0x148] sm:$0xf] }
  0xa6   :  { %v227_v51 = vmax.f32 %v180_v36, 0.0  ;;  %v3626_v36 = vld [vmem:[#allocation7 + $0xf8] sm:$0xf] }
  0xa7   :  { %v231_v30 = vmax.f32 %v168_v10, 0.0  ;;  %v228_v41 = vmax.f32 %v194_v31, 0.0  ;;  %v5362_v10 = vld [vmem:[#allocation7 + $0x824] sm:$0xf]  ;;  %v5452_v31 = vld [vmem:[#allocation7 + $0xaf4] sm:$0xf] }
  0xa9   :  { %v5727_v33 = vpack.c.bf16 %v231_v30, %v226_v26  ;;  %v4583_v26 = vor.u32 %v5372_v16, %v4580_v17  ;;  %v4780_v16 = vld [vmem:[#allocation7 + $0xa28] sm:$0xf0]  ;;  %v3506_v17 = vld [vmem:[#allocation7 + $0x8] sm:$0xf] }
  0xab   :  { %v181_v37 = vpop.f32.mrf.mxu3  ;;  %2673 = vmatmul.bf16.vlgmr.msra.gmra.mxu1 %v5727_v33 }
  0xac   :  { %v195_v38 = vpop.f32.mrf.mxu2  ;;  %v182_v42 = vadd.f32 %v181_v37, %v112_v29  ;;  %2777 = vmatpush.bf16.msra.mxu1 %v4743_v32  ;;  %v221_v44 = vpop.f32.mrf.mxu0  ;;  %v4943_v29 = vor.u32 %v5462_v14, %v4940_v22  ;;  %v4543_v37 = vor.u32 %v5362_v10, %v4540_v27  ;;  %v4746_v14 = vld [vmem:[#allocation7 + $0x9b8] sm:$0xf]  ;;  %v5418_v22 = vld [vmem:[#allocation7 + $0x9dc] sm:$0xf0] }
  0xad   :  { %v196_v43 = vadd.f32 %v195_v38, %v113_v24  ;;  %v222_v63 = vadd.f32 %v221_v44, %v115_v48  ;;  %v5148_v24 = vld [vmem:[#allocation7 + $0x16c] sm:$0xf0]  ;;  %v5138_v38 = vld [vmem:[#allocation7 + $0x11c] sm:$0xf0]  ;;  %v4903_v44 = vor.u32 %v5452_v31, %v4900_v35  ;;  %v4346_v10 = vld [vmem:[#allocation7 + $0x698] sm:$0xf] }
  0xae   :  { %v232_v52 = vmax.f32 %v182_v42, 0.0  ;;  %v3667_v30 = vor.u32 %v5148_v24, %v3666_v23  ;;  %v5352_v42 = vld [vmem:[#allocation7 + $0x7d4] sm:$0xf]  ;;  %v3627_v46 = vor.u32 %v5138_v38, %v3626_v36  ;;  %v5066_v23 = vld [vmem:[#allocation7 + $0xc38] sm:$0xf] }
  0xaf   :  { %v233_v53 = vmax.f32 %v196_v43, 0.0  ;;  %v230_v13 = vmax.f32 %v222_v63, 0.0  ;;  %v4500_v43 = vld [vmem:[#allocation7 + $0x7f8] sm:$0xf0]  ;;  %v5498_v24 = vld [vmem:[#allocation7 + $0xc5c] sm:$0xf0] }
  0xb0   :  { %v5731_v57 = vpack.c.bf16 %v232_v52, %v227_v51  ;;  %2778 = vmatpush.bf16.msra.mxu1 %v4703_v45  ;;  %v4503_v51 = vor.u32 %v5352_v42, %v4500_v43  ;;  %v5128_v52 = vld [vmem:[#allocation7 + $0xcc] sm:$0xf0]  ;;  %v5318_v27 = vld [vmem:[#allocation7 + $0x6bc] sm:$0xf0]  ;;  %v5067_v31 = vor.u32 %v5498_v24, %v5066_v23  ;;  %v4706_v35 = vld [vmem:[#allocation7 + $0x968] sm:$0xf] }
  0xb1   :  { %v5733_v58 = vpack.c.bf16 %v233_v53, %v228_v41  ;;  %v4066_v53 = vld [vmem:[#allocation7 + $0x468] sm:$0xf]  ;;  %v3587_v62 = vor.u32 %v5128_v52, %v3586_v50  ;;  %v4347_v36 = vor.u32 %v5318_v27, %v4346_v10  ;;  %v5398_v50 = vld [vmem:[#allocation7 + $0x93c] sm:$0xf0]  ;;  %v5368_v24 = vld [vmem:[#allocation7 + $0x84c] sm:$0xf0] }
  0xb2   :  { %2687 = vmatmul.bf16.vlgmr.msrb.gmra.mxu2 %v5731_v57  ;;  %v5026_v38 = vld [vmem:[#allocation7 + $0xbe8] sm:$0xf]  ;;  %v5478_v52 = vld [vmem:[#allocation7 + $0xbbc] sm:$0xf0] }
  0xb3   :  { %2701 = vmatmul.bf16.vlgmr.msra.gmra.mxu3 %v5733_v58  ;;  %2791 = vmatpush.bf16.msrb.mxu2 %v5063_v54  ;;  %v207_v3 = vpop.f32.mrf.mxu3  ;;  %v5248_v54 = vld [vmem:[#allocation7 + $0x48c] sm:$0xf0]  ;;  %v4546_v23 = vld [vmem:[#allocation7 + $0x828] sm:$0xf] }
  0xb4   :  { %2805 = vmatpush.bf16.msra.mxu3 %v3787_v55  ;;  %2779 = vmatpush.bf16.msra.mxu1 %v4663_v59  ;;  %v223_v7 = vpop.f32.mrf.mxu0  ;;  %v208_v21 = vadd.f32 %v207_v3, %v114_v2  ;;  %v5342_v55 = vld [vmem:[#allocation7 + $0x784] sm:$0xf]  ;;  %v4067_v63 = vor.u32 %v5248_v54, %v4066_v53  ;;  %v4266_v53 = vld [vmem:[#allocation7 + $0x5f8] sm:$0xf]  ;;  %v5298_v54 = vld [vmem:[#allocation7 + $0x61c] sm:$0xf0] }
  0xb5   :  { %v224_v15 = vadd.f32 %v223_v7, %v115_v48  ;;  %v5442_v48 = vld [vmem:[#allocation7 + $0xaa4] sm:$0xf]  ;;  %v4463_v3 = vor.u32 %v5342_v55, %v4460_v56  ;;  %v4427_v7 = vor.u32 %v5338_v61, %v4426_v60  ;;  %v3866_v60 = vld [vmem:[#allocation7 + $0x2d8] sm:$0xf]  ;;  %v5198_v61 = vld [vmem:[#allocation7 + $0x2fc] sm:$0xf0] }
  0xb6   :  { %v229_v32 = vmax.f32 %v208_v21, 0.0  ;;  %v4863_v59 = vor.u32 %v5442_v48, %v4860_v49  ;;  %v4387_v21 = vor.u32 %v5328_v11, %v4386_v9  ;;  %v4666_v48 = vld [vmem:[#allocation7 + $0x918] sm:$0xf]  ;;  %v5188_v9 = vld [vmem:[#allocation7 + $0x2ac] sm:$0xf0] }
  0xb7   :  { %v235_v18 = vmax.f32 %v224_v15, 0.0  ;;  %2792 = vmatpush.bf16.msrb.mxu2 %v5023_v4  ;;  %v5118_v4 = vld [vmem:[#allocation7 + $0x7c] sm:$0xf0]  ;;  %v4667_v56 = vor.u32 %v5398_v50, %v4666_v48  ;;  %v4586_v11 = vld [vmem:[#allocation7 + $0x878] sm:$0xf] }
  0xb8   :  { %2806 = vmatpush.bf16.msra.mxu3 %v3747_v5  ;;  %2780 = vmatpush.bf16.msra.mxu1 %v4623_v8  ;;  %v4026_v5 = vld [vmem:[#allocation7 + $0x418] sm:$0xf]  ;;  %v4823_v8 = vor.u32 %v5432_v0, %v4820_v1  ;;  %v5388_v0 = vld [vmem:[#allocation7 + $0x8ec] sm:$0xf0]  ;;  %v4946_v1 = vld [vmem:[#allocation7 + $0xb48] sm:$0xf] }
  0xb9   :  { %v5738_v25 = vpack.c.bf16 %v235_v18, %v230_v13  ;;  %v4027_v15 = vor.u32 %v5238_v6, %v4026_v5  ;;  %v5108_v18 = vld [vmem:[#allocation7 + $0x2c] sm:$0xf0]  ;;  %v3867_v5 = vor.u32 %v5198_v61, %v3866_v60  ;;  %v3826_v6 = vld [vmem:[#allocation7 + $0x288] sm:$0xf]  ;;  %v5243_v48 = vld [vmem:[#allocation7 + $0x46c] sm:$0xf] }
  0xba   :  { %v4866_v27 = vld [vmem:[#allocation7 + $0xaa8] sm:$0xf]  ;;  %v3668_v60 = vld [vmem:[#allocation7 + $0x170] sm:$0xf0] }
  0xbb   :  { %2793 = vmatpush.bf16.msrb.mxu2 %v4983_v19  ;;  %v209_v28 = vpop.f32.mrf.mxu3  ;;  %2729 = vmatmul.bf16.vlgmr.msrb.gmra.mxu1 %v5738_v25  ;;  %v3986_v19 = vld [vmem:[#allocation7 + $0x3c8] sm:$0xf] }
  0xbc   :  { %2807 = vmatpush.bf16.msra.mxu3 %v3707_v20  ;;  %v210_v34 = vadd.f32 %v209_v28, %v114_v2  ;;  %2781 = vmatpush.bf16.msra.mxu1 %v4583_v26  ;;  %v3546_v2 = vld [vmem:[#allocation7 + $0x58] sm:$0xf]  ;;  %v5228_v20 = vld [vmem:[#allocation7 + $0x3ec] sm:$0xf0]  ;;  %v4783_v26 = vor.u32 %v5422_v12, %v4780_v16  ;;  %v3507_v28 = vor.u32 %v5108_v18, %v3506_v17  ;;  %v5378_v12 = vld [vmem:[#allocation7 + $0x89c] sm:$0xf0] }
  0xbd   :  { %v3547_v13 = vor.u32 %v5118_v4, %v3546_v2  ;;  %v5468_v2 = vld [vmem:[#allocation7 + $0xb6c] sm:$0xf0]  ;;  %v5458_v16 = vld [vmem:[#allocation7 + $0xb1c] sm:$0xf0]  ;;  %v5173_v17 = vld [vmem:[#allocation7 + $0x23c] sm:$0xf] }
  0xbe   :  { %v234_v41 = vmax.f32 %v210_v34, 0.0  ;;  %v5218_v34 = vld [vmem:[#allocation7 + $0x39c] sm:$0xf0]  ;;  %v5288_v4 = vld [vmem:[#allocation7 + $0x5cc] sm:$0xf0] }
  0xbf   :  { %2794 = vmatpush.bf16.msrb.mxu2 %v4943_v29  ;;  %v3987_v29 = vor.u32 %v5228_v20, %v3986_v19  ;;  %v3788_v18 = vld [vmem:[#allocation7 + $0x260] sm:$0xf0]  ;;  %v4186_v19 = vld [vmem:[#allocation7 + $0x558] sm:$0xf]  ;;  %v5278_v20 = vld [vmem:[#allocation7 + $0x57c] sm:$0xf0] }
  0xc0   :  { %2808 = vmatpush.bf16.msra.mxu3 %v3667_v30  ;;  %v5741_v45 = vpack.c.bf16 %v234_v41, %v229_v32  ;;  %2782 = vmatpush.bf16.msra.mxu1 %v4543_v37  ;;  %v4747_v30 = vor.u32 %v5418_v22, %v4746_v14  ;;  %v3946_v32 = vld [vmem:[#allocation7 + $0x378] sm:$0xf]  ;;  %v5408_v37 = vld [vmem:[#allocation7 + $0x98c] sm:$0xf0]  ;;  %v3827_v14 = vor.u32 %v5188_v9, %v3826_v6  ;;  %v3628_v9 = vld [vmem:[#allocation7 + $0x120] sm:$0xf0] }
  0xc1   :  { %v5308_v41 = vld [vmem:[#allocation7 + $0x66c] sm:$0xf0]  ;;  %v3947_v42 = vor.u32 %v5218_v34, %v3946_v32  ;;  %v4707_v43 = vor.u32 %v5408_v37, %v4706_v35  ;;  %v4187_v10 = vor.u32 %v5278_v20, %v4186_v19  ;;  %v5253_v34 = vld [vmem:[#allocation7 + $0x4bc] sm:$0xf]  ;;  %v4108_v35 = vld [vmem:[#allocation7 + $0x4e0] sm:$0xf0] }
  0xc2   :  { %2715 = vmatmul.bf16.vlgmr.msra.gmra.mxu0 %v5741_v45  ;;  %2743 = vmatmul.bf16.vlgmr.msra.gmra.mxu2 %v5727_v33  ;;  %v4307_v49 = vor.u32 %v5308_v41, %v4306_v40  ;;  %v5268_v32 = vld [vmem:[#allocation7 + $0x52c] sm:$0xf0]  ;;  %v5358_v41 = vld [vmem:[#allocation7 + $0x7fc] sm:$0xf0]  ;;  %v3988_v19 = vld [vmem:[#allocation7 + $0x3f0] sm:$0xf0] }
  0xc3   :  { %2757 = vmatmul.bf16.vlgmr.msrb.gmra.mxu3 %v5731_v57  ;;  %2795 = vmatpush.bf16.msrb.mxu2 %v4903_v44  ;;  %v5027_v44 = vor.u32 %v5488_v39, %v5026_v38  ;;  %v4506_v38 = vld [vmem:[#allocation7 + $0x7d8] sm:$0xf] }
  0xc4   :  { %2809 = vmatpush.bf16.msra.mxu3 %v3627_v46  ;;  %2819 = vmatpush.bf16.msra.mxu0 %v4107_v47  ;;  %v3906_v46 = vld [vmem:[#allocation7 + $0x328] sm:$0xf]  ;;  %v5208_v47 = vld [vmem:[#allocation7 + $0x34c] sm:$0xf0]  ;;  %v4507_v50 = vor.u32 %v5358_v41, %v4506_v38  ;;  %v5303_v38 = vld [vmem:[#allocation7 + $0x64c] sm:$0xf] }
  0xc5   :  { %2783 = vmatpush.bf16.msra.mxu1 %v4503_v51  ;;  %v4986_v51 = vld [vmem:[#allocation7 + $0xb98] sm:$0xf]  ;;  %v3907_v55 = vor.u32 %v5208_v47, %v3906_v46  ;;  %v5153_v46 = vld [vmem:[#allocation7 + $0x19c] sm:$0xf]  ;;  %v3708_v47 = vld [vmem:[#allocation7 + $0x1c0] sm:$0xf0] }
  0xc6   :  { %v4628_v41 = vld [vmem:[#allocation7 + $0x8f0] sm:$0xf0] }
  0xc7   :  { %2796 = vmatpush.bf16.msrb.mxu2 %v4863_v59  ;;  %v4987_v59 = vor.u32 %v5478_v52, %v4986_v51  ;;  %v4466_v52 = vld [vmem:[#allocation7 + $0x788] sm:$0xf] }
  0xc8   :  { %2810 = vmatpush.bf16.msra.mxu3 %v3587_v62  ;;  %2820 = vmatpush.bf16.msra.mxu0 %v4067_v63  ;;  %v4626_v62 = vld [vmem:[#allocation7 + $0x8c8] sm:$0xf]  ;;  %v4267_v63 = vor.u32 %v5298_v54, %v4266_v53  ;;  %v5348_v53 = vld [vmem:[#allocation7 + $0x7ac] sm:$0xf0] }
  0xc9   :  { %2784 = vmatpush.bf16.msra.mxu1 %v4463_v3  ;;  %v4226_v3 = vld [vmem:[#allocation7 + $0x5a8] sm:$0xf] }
  0xca   :  { %v4786_v54 = vld [vmem:[#allocation7 + $0xa08] sm:$0xf] }
  0xcb   :  { %2797 = vmatpush.bf16.msrb.mxu2 %v4823_v8  ;;  %v4947_v8 = vor.u32 %v5468_v2, %v4946_v1  ;;  %v4748_v1 = vld [vmem:[#allocation7 + $0x9e0] sm:$0xf0]  ;;  %v5233_v2 = vld [vmem:[#allocation7 + $0x41c] sm:$0xf] }
  0xcc   :  { %2811 = vmatpush.bf16.msra.mxu3 %v3547_v13  ;;  %2821 = vmatpush.bf16.msra.mxu0 %v4027_v15  ;;  %v4227_v13 = vor.u32 %v5288_v4, %v4226_v3  ;;  %v4906_v15 = vld [vmem:[#allocation7 + $0xaf8] sm:$0xf]  ;;  %v4028_v3 = vld [vmem:[#allocation7 + $0x440] sm:$0xf0]  ;;  %v4467_v4 = vor.u32 %v5348_v53, %v4466_v52  ;;  %v5373_v53 = vld [vmem:[#allocation7 + $0x87c] sm:$0xf] }
  0xcd   :  { %2833 = vmatpush.bf16.msrb.mxu1 %v4427_v7  ;;  %v4627_v7 = vor.u32 %v5388_v0, %v4626_v62  ;;  %v4907_v22 = vor.u32 %v5458_v16, %v4906_v15  ;;  %v5333_v62 = vld [vmem:[#allocation7 + $0x73c] sm:$0xf]  ;;  %v4388_v15 = vld [vmem:[#allocation7 + $0x710] sm:$0xf0]  ;;  %v5403_v16 = vld [vmem:[#allocation7 + $0x96c] sm:$0xf] }
  0xce   :  { %2785 = vmatmul.bf16.vlgmr.msra.gmra.mxu1 %v5741_v45  ;;  %v5413_v0 = vld [vmem:[#allocation7 + $0x9bc] sm:$0xf]  ;;  %v4268_v52 = vld [vmem:[#allocation7 + $0x620] sm:$0xf0] }
  0xcf   :  { %2798 = vmatpush.bf16.msrb.mxu2 %v4783_v26  ;;  %v3791_v26 = vor.u32 %v5173_v17, %v3788_v18  ;;  %v4708_v17 = vld [vmem:[#allocation7 + $0x990] sm:$0xf0]  ;;  %v5223_v18 = vld [vmem:[#allocation7 + $0x3cc] sm:$0xf] }
  0xd0   :  { %2812 = vmatpush.bf16.msra.mxu3 %v3507_v28  ;;  %2822 = vmatpush.bf16.msra.mxu0 %v3987_v29  ;;  %v5448_v28 = vld [vmem:[#allocation7 + $0xacc] sm:$0xf0]  ;;  %v5163_v29 = vld [vmem:[#allocation7 + $0x1ec] sm:$0xf] }
  0xd1   :  { %2834 = vmatpush.bf16.msrb.mxu1 %v4387_v21  ;;  %v4587_v21 = vor.u32 %v5378_v12, %v4586_v11  ;;  %v4867_v37 = vor.u32 %v5448_v28, %v4866_v27  ;;  %v4751_v11 = vor.u32 %v5413_v0, %v4748_v1  ;;  %v4031_v12 = vor.u32 %v5233_v2, %v4028_v3  ;;  %v5393_v27 = vld [vmem:[#allocation7 + $0x91c] sm:$0xf]  ;;  %v4668_v28 = vld [vmem:[#allocation7 + $0x940] sm:$0xf0]  ;;  %v5283_v1 = vld [vmem:[#allocation7 + $0x5ac] sm:$0xf] }
  0xd2   :  { %2771 = vmatmul.bf16.vlgmr.msrb.gmra.mxu0 %v5733_v58  ;;  %2799 = vmatmul.bf16.vlgmr.msrb.gmra.mxu2 %v5738_v25  ;;  %v4228_v2 = vld [vmem:[#allocation7 + $0x5d0] sm:$0xf0]  ;;  %v5363_v3 = vld [vmem:[#allocation7 + $0x82c] sm:$0xf] }
  0xd3   :  { %2847 = vmatpush.bf16.msra.mxu2 %v4747_v30  ;;  %2813 = vmatmul.bf16.vlgmr.msra.gmra.mxu3 %v5727_v33  ;;  %v3748_v30 = vld [vmem:[#allocation7 + $0x210] sm:$0xf0] }
  0xd4   :  { %2861 = vmatpush.bf16.msrb.mxu3 %v5067_v31  ;;  %2823 = vmatpush.bf16.msra.mxu0 %v3947_v42  ;;  %v4146_v31 = vld [vmem:[#allocation7 + $0x508] sm:$0xf]  ;;  %v3751_v39 = vor.u32 %v5163_v29, %v3748_v30  ;;  %v4826_v42 = vld [vmem:[#allocation7 + $0xa58] sm:$0xf]  ;;  %v5213_v29 = vld [vmem:[#allocation7 + $0x37c] sm:$0xf] }
  0xd5   :  { %2835 = vmatpush.bf16.msrb.mxu1 %v4347_v36  ;;  %v4547_v36 = vor.u32 %v5368_v24, %v4546_v23  ;;  %v4147_v40 = vor.u32 %v5268_v32, %v4146_v31  ;;  %v4711_v23 = vor.u32 %v5403_v16, %v4708_v17  ;;  %v3991_v24 = vor.u32 %v5223_v18, %v3988_v19  ;;  %v3948_v30 = vld [vmem:[#allocation7 + $0x3a0] sm:$0xf0]  ;;  %v5273_v17 = vld [vmem:[#allocation7 + $0x55c] sm:$0xf] }
  0xd6   :  { %v4188_v18 = vld [vmem:[#allocation7 + $0x580] sm:$0xf0]  ;;  %v5353_v19 = vld [vmem:[#allocation7 + $0x7dc] sm:$0xf] }
  0xd7   :  { %2848 = vmatpush.bf16.msra.mxu2 %v4707_v43  ;;  %v5438_v43 = vld [vmem:[#allocation7 + $0xa7c] sm:$0xf0] }
  0xd8   :  { %2862 = vmatpush.bf16.msrb.mxu3 %v5027_v44  ;;  %2824 = vmatpush.bf16.msra.mxu0 %v3907_v55  ;;  %v4111_v44 = vor.u32 %v5253_v34, %v4108_v35  ;;  %v4827_v51 = vor.u32 %v5438_v43, %v4826_v42  ;;  %v3711_v55 = vor.u32 %v5153_v46, %v3708_v47  ;;  %v5113_v34 = vld [vmem:[#allocation7 + $0x5c] sm:$0xf]  ;;  %v3548_v35 = vld [vmem:[#allocation7 + $0x80] sm:$0xf0]  ;;  %v5203_v42 = vld [vmem:[#allocation7 + $0x32c] sm:$0xf] }
  0xd9   :  { %2836 = vmatpush.bf16.msrb.mxu1 %v4307_v49  ;;  %v4068_v49 = vld [vmem:[#allocation7 + $0x490] sm:$0xf0]  ;;  %v5103_v47 = vld [vmem:[#allocation7 + $0xc] sm:$0xf] }
  0xda   :  { %v4071_v61 = vor.u32 %v5243_v48, %v4068_v49  ;;  %v3908_v43 = vld [vmem:[#allocation7 + $0x350] sm:$0xf0] }
  0xdb   :  { %2849 = vmatpush.bf16.msra.mxu2 %v4667_v56  ;;  %v5428_v56 = vld [vmem:[#allocation7 + $0xa2c] sm:$0xf0]  ;;  %v3508_v48 = vld [vmem:[#allocation7 + $0x30] sm:$0xf0] }
  0xdc   :  { %2863 = vmatpush.bf16.msrb.mxu3 %v4987_v59  ;;  %2825 = vmatpush.bf16.msra.mxu0 %v3867_v5  ;;  %v5143_v59 = vld [vmem:[#allocation7 + $0x14c] sm:$0xf]  ;;  %v4787_v5 = vor.u32 %v5428_v56, %v4786_v54  ;;  %v4588_v54 = vld [vmem:[#allocation7 + $0x8a0] sm:$0xf0] }
  0xdd   :  { %2837 = vmatpush.bf16.msrb.mxu1 %v4267_v63  ;;  %v4428_v63 = vld [vmem:[#allocation7 + $0x760] sm:$0xf0]  ;;  %v3671_v6 = vor.u32 %v5143_v59, %v3668_v60  ;;  %v5193_v59 = vld [vmem:[#allocation7 + $0x2dc] sm:$0xf] }
  0xde   :  { %v5068_v56 = vld [vmem:[#allocation7 + $0xc60] sm:$0xf0] }
  0xdf   :  { %2850 = vmatpush.bf16.msra.mxu2 %v4627_v7  ;;  %v4431_v7 = vor.u32 %v5333_v62, %v4428_v63  ;;  %v3868_v60 = vld [vmem:[#allocation7 + $0x300] sm:$0xf0]  ;;  %v4591_v63 = vor.u32 %v5373_v53, %v4588_v54  ;;  %v5249_v53 = vld [vmem:[#allocation7 + $0x494] sm:$0xf0]  ;;  %v4394_v54 = vld [vmem:[#allocation7 + $0x6f0] sm:$0xf] }
  0xe0   :  { %2864 = vmatpush.bf16.msrb.mxu3 %v4947_v8  ;;  %2826 = vmatpush.bf16.msra.mxu0 %v3827_v14  ;;  %v5133_v8 = vld [vmem:[#allocation7 + $0xfc] sm:$0xf] }
  0xe1   :  { %2838 = vmatpush.bf16.msrb.mxu1 %v4227_v13  ;;  %v5323_v13 = vld [vmem:[#allocation7 + $0x6ec] sm:$0xf]  ;;  %v3631_v20 = vor.u32 %v5133_v8, %v3628_v9  ;;  %v3828_v9 = vld [vmem:[#allocation7 + $0x2b0] sm:$0xf0] }
  0xe2   :  { %v4391_v14 = vor.u32 %v5323_v13, %v4388_v15  ;;  %v5183_v8 = vld [vmem:[#allocation7 + $0x28c] sm:$0xf]  ;;  %v5179_v13 = vld [vmem:[#allocation7 + $0x264] sm:$0xf0] }
  0xe3   :  { %2851 = vmatpush.bf16.msra.mxu2 %v4587_v21  ;;  %2827 = vmatmul.bf16.vlgmr.msra.gmra.mxu0 %v5731_v57  ;;  %v5123_v21 = vld [vmem:[#allocation7 + $0xac] sm:$0xf] }
  0xe4   :  { %2865 = vmatpush.bf16.msrb.mxu3 %v4907_v22  ;;  %2875 = vmatpush.bf16.msrb.mxu0 %v3791_v26  ;;  %v3588_v22 = vld [vmem:[#allocation7 + $0xd0] sm:$0xf0]  ;;  %v5313_v26 = vld [vmem:[#allocation7 + $0x69c] sm:$0xf] }
  0xe5   :  { %2839 = vmatpush.bf16.msrb.mxu1 %v4187_v10  ;;  %v4348_v10 = vld [vmem:[#allocation7 + $0x6c0] sm:$0xf0]  ;;  %v3591_v31 = vor.u32 %v5123_v21, %v3588_v22  ;;  %v5473_v21 = vld [vmem:[#allocation7 + $0xb9c] sm:$0xf] }
  0xe6   :  { %v4351_v32 = vor.u32 %v5313_v26, %v4348_v10  ;;  %v4988_v22 = vld [vmem:[#allocation7 + $0xbc0] sm:$0xf0]  ;;  %v3754_v26 = vld [vmem:[#allocation7 + $0x1f0] sm:$0xf]  ;;  %v5169_v10 = vld [vmem:[#allocation7 + $0x214] sm:$0xf0] }
  0xe7   :  { %2852 = vmatpush.bf16.msra.mxu2 %v4547_v36  ;;  %v4671_v36 = vor.u32 %v5393_v27, %v4668_v28  ;;  %v5263_v27 = vld [vmem:[#allocation7 + $0x50c] sm:$0xf] }
  0xe8   :  { %2866 = vmatpush.bf16.msrb.mxu3 %v4867_v37  ;;  %2876 = vmatpush.bf16.msrb.mxu0 %v3751_v39  ;;  %v3951_v37 = vor.u32 %v5213_v29, %v3948_v30  ;;  %v4308_v39 = vld [vmem:[#allocation7 + $0x670] sm:$0xf0]  ;;  %v4991_v29 = vor.u32 %v5473_v21, %v4988_v22  ;;  %v5423_v22 = vld [vmem:[#allocation7 + $0xa0c] sm:$0xf] }
  0xe9   :  { %2840 = vmatpush.bf16.msrb.mxu1 %v4147_v40  ;;  %v5383_v40 = vld [vmem:[#allocation7 + $0x8cc] sm:$0xf]  ;;  %v4311_v46 = vor.u32 %v5303_v38, %v4308_v39  ;;  %v4148_v30 = vld [vmem:[#allocation7 + $0x530] sm:$0xf0]  ;;  %v5259_v38 = vld [vmem:[#allocation7 + $0x4e4] sm:$0xf0] }
  0xea   :  { %v4631_v49 = vor.u32 %v5383_v40, %v4628_v41  ;;  %v4434_v39 = vld [vmem:[#allocation7 + $0x740] sm:$0xf]  ;;  %v5339_v40 = vld [vmem:[#allocation7 + $0x764] sm:$0xf0]  ;;  %v4151_v41 = vor.u32 %v5263_v27, %v4148_v30 }
  0xeb   :  { %2853 = vmatpush.bf16.msra.mxu2 %v4507_v50  ;;  %v3911_v50 = vor.u32 %v5203_v42, %v3908_v43  ;;  %v3714_v42 = vld [vmem:[#allocation7 + $0x1a0] sm:$0xf]  ;;  %v5159_v43 = vld [vmem:[#allocation7 + $0x1c4] sm:$0xf0] }
  0xec   :  { %2867 = vmatpush.bf16.msrb.mxu3 %v4827_v51  ;;  %2877 = vmatpush.bf16.msrb.mxu0 %v3711_v55  ;;  %v5293_v51 = vld [vmem:[#allocation7 + $0x5fc] sm:$0xf]  ;;  %v5219_v27 = vld [vmem:[#allocation7 + $0x3a4] sm:$0xf0] }
  0xed   :  { %2889 = vmatpush.bf16.msra.mxu1 %v4111_v44  ;;  %v3551_v44 = vor.u32 %v5113_v34, %v3548_v35  ;;  %v5493_v55 = vld [vmem:[#allocation7 + $0xc3c] sm:$0xf]  ;;  %v4271_v62 = vor.u32 %v5293_v51, %v4268_v52  ;;  %v5463_v34 = vld [vmem:[#allocation7 + $0xb4c] sm:$0xf]  ;;  %v4948_v35 = vld [vmem:[#allocation7 + $0xb70] sm:$0xf0]  ;;  %v3715_v52 = vor.u32 %v5159_v43, %v3714_v42 }
  0xee   :  { %2841 = vmatmul.bf16.vlgmr.msrb.gmra.mxu1 %v5733_v58  ;;  %v5071_v0 = vor.u32 %v5493_v55, %v5068_v56  ;;  %v4074_v51 = vld [vmem:[#allocation7 + $0x470] sm:$0xf]  ;;  %v5329_v55 = vld [vmem:[#allocation7 + $0x714] sm:$0xf0]  ;;  %v5299_v30 = vld [vmem:[#allocation7 + $0x624] sm:$0xf0] }
  0xef   :  { %2854 = vmatpush.bf16.msra.mxu2 %v4467_v4  ;;  %v3871_v4 = vor.u32 %v5193_v59, %v3868_v60  ;;  %v3674_v56 = vld [vmem:[#allocation7 + $0x150] sm:$0xf]  ;;  %v5149_v59 = vld [vmem:[#allocation7 + $0x174] sm:$0xf0] }
  0xf0   :  { %2868 = vmatpush.bf16.msrb.mxu3 %v4787_v5  ;;  %2878 = vmatpush.bf16.msrb.mxu0 %v3671_v6  ;;  %v4548_v5 = vld [vmem:[#allocation7 + $0x850] sm:$0xf0]  ;;  %v5483_v6 = vld [vmem:[#allocation7 + $0xbec] sm:$0xf]  ;;  %v4234_v43 = vld [vmem:[#allocation7 + $0x5b0] sm:$0xf] }
  0xf1   :  { %2890 = vmatpush.bf16.msra.mxu1 %v4071_v61  ;;  %v3511_v61 = vor.u32 %v5103_v47, %v3508_v48  ;;  %v4551_v15 = vor.u32 %v5363_v3, %v4548_v5  ;;  %v4435_v48 = vor.u32 %v5339_v40, %v4434_v39  ;;  %v5239_v3 = vld [vmem:[#allocation7 + $0x444] sm:$0xf0]  ;;  %v3914_v39 = vld [vmem:[#allocation7 + $0x330] sm:$0xf]  ;;  %v5209_v40 = vld [vmem:[#allocation7 + $0x354] sm:$0xf0] }
  0xf2   :  { %2855 = vmatmul.bf16.vlgmr.msra.gmra.mxu2 %v5741_v45  ;;  %v5319_v5 = vld [vmem:[#allocation7 + $0x6c4] sm:$0xf0] }
  0xf3   :  { %2903 = vmatpush.bf16.msrb.mxu2 %v4431_v7  ;;  %2869 = vmatmul.bf16.vlgmr.msrb.gmra.mxu3 %v5738_v25  ;;  %v5028_v7 = vld [vmem:[#allocation7 + $0xc10] sm:$0xf0] }
  0xf4   :  { %2917 = vmatpush.bf16.msra.mxu3 %v4751_v11  ;;  %2879 = vmatpush.bf16.msrb.mxu0 %v3631_v20  ;;  %v4231_v11 = vor.u32 %v5283_v1, %v4228_v2  ;;  %v5031_v16 = vor.u32 %v5483_v6, %v5028_v7  ;;  %v3831_v20 = vor.u32 %v5183_v8, %v3828_v9  ;;  %v4034_v1 = vld [vmem:[#allocation7 + $0x420] sm:$0xf]  ;;  %v5139_v7 = vld [vmem:[#allocation7 + $0x124] sm:$0xf0] }
  0xf5   :  { %2891 = vmatpush.bf16.msra.mxu1 %v4031_v12  ;;  %v3794_v12 = vld [vmem:[#allocation7 + $0x240] sm:$0xf]  ;;  %v3675_v2 = vor.u32 %v5149_v59, %v3674_v56  ;;  %v4035_v9 = vor.u32 %v5239_v3, %v4034_v1  ;;  %v5199_v59 = vld [vmem:[#allocation7 + $0x304] sm:$0xf0]  ;;  %v5034_v1 = vld [vmem:[#allocation7 + $0xbf0] sm:$0xf] }
  0xf6   :  { %v3634_v6 = vld [vmem:[#allocation7 + $0x100] sm:$0xf] }
  0xf7   :  { %2904 = vmatpush.bf16.msrb.mxu2 %v4391_v14  ;;  %v4508_v14 = vld [vmem:[#allocation7 + $0x800] sm:$0xf0] }
  0xf8   :  { %2918 = vmatpush.bf16.msra.mxu3 %v4711_v23  ;;  %2880 = vmatpush.bf16.msrb.mxu0 %v3591_v31  ;;  %v3795_v23 = vor.u32 %v5179_v13, %v3794_v12  ;;  %v4511_v28 = vor.u32 %v5353_v19, %v4508_v14  ;;  %v5343_v31 = vld [vmem:[#allocation7 + $0x78c] sm:$0xf]  ;;  %v5433_v12 = vld [vmem:[#allocation7 + $0xa5c] sm:$0xf]  ;;  %v4828_v13 = vld [vmem:[#allocation7 + $0xa80] sm:$0xf0] }
  0xf9   :  { %2892 = vmatpush.bf16.msra.mxu1 %v3991_v24  ;;  %v4191_v24 = vor.u32 %v5273_v17, %v4188_v18  ;;  %v5229_v17 = vld [vmem:[#allocation7 + $0x3f4] sm:$0xf0]  ;;  %v4314_v18 = vld [vmem:[#allocation7 + $0x650] sm:$0xf]  ;;  %v4831_v21 = vor.u32 %v5433_v12, %v4828_v13 }
  0xfa   :  { %v5309_v19 = vld [vmem:[#allocation7 + $0x674] sm:$0xf0] }
  0xfb   :  { %2905 = vmatpush.bf16.msrb.mxu2 %v4351_v32  ;;  %v4468_v32 = vld [vmem:[#allocation7 + $0x7b0] sm:$0xf0]  ;;  %v5129_v14 = vld [vmem:[#allocation7 + $0xd4] sm:$0xf0] }
  0xfc   :  { %2919 = vmatpush.bf16.msra.mxu3 %v4671_v36  ;;  %2881 = vmatpush.bf16.msrb.mxu0 %v3551_v44  ;;  %v4114_v36 = vld [vmem:[#allocation7 + $0x4c0] sm:$0xf]  ;;  %v4471_v44 = vor.u32 %v5343_v31, %v4468_v32  ;;  %v5419_v32 = vld [vmem:[#allocation7 + $0x9e4] sm:$0xf0]  ;;  %v5389_v12 = vld [vmem:[#allocation7 + $0x8f4] sm:$0xf0] }
  0xfd   :  { %2893 = vmatpush.bf16.msra.mxu1 %v3951_v37  ;;  %v3755_v37 = vor.u32 %v5169_v10, %v3754_v26  ;;  %v4115_v47 = vor.u32 %v5259_v38, %v4114_v36  ;;  %v4788_v26 = vld [vmem:[#allocation7 + $0xa30] sm:$0xf0]  ;;  %v3954_v10 = vld [vmem:[#allocation7 + $0x380] sm:$0xf] }
  0xfe   :  { %v4754_v31 = vld [vmem:[#allocation7 + $0x9c0] sm:$0xf]  ;;  %v4791_v36 = vor.u32 %v5423_v22, %v4788_v26  ;;  %v5379_v26 = vld [vmem:[#allocation7 + $0x8a4] sm:$0xf0] }
  0xff   :  { %2906 = vmatpush.bf16.msrb.mxu2 %v4311_v46  ;;  %v4951_v46 = vor.u32 %v5463_v34, %v4948_v35  ;;  %v3554_v34 = vld [vmem:[#allocation7 + $0x60] sm:$0xf]  ;;  %v5119_v35 = vld [vmem:[#allocation7 + $0x84] sm:$0xf0] }
 0x100   :  { %2920 = vmatpush.bf16.msra.mxu3 %v4631_v49  ;;  %2882 = vmatpush.bf16.msrb.mxu0 %v3511_v61  ;;  %v5453_v49 = vld [vmem:[#allocation7 + $0xafc] sm:$0xf]  ;;  %v4075_v61 = vor.u32 %v5249_v53, %v4074_v51  ;;  %v3555_v42 = vor.u32 %v5119_v35, %v3554_v34  ;;  %v5499_v51 = vld [vmem:[#allocation7 + $0xc64] sm:$0xf0]  ;;  %v5469_v34 = vld [vmem:[#allocation7 + $0xb74] sm:$0xf0] }
 0x101   :  { %2894 = vmatpush.bf16.msra.mxu1 %v3911_v50  ;;  %v4908_v50 = vld [vmem:[#allocation7 + $0xb20] sm:$0xf0] }
 0x102   :  { %v4911_v60 = vor.u32 %v5453_v49, %v4908_v50  ;;  %v5109_v49 = vld [vmem:[#allocation7 + $0x34] sm:$0xf0]  ;;  %v5074_v50 = vld [vmem:[#allocation7 + $0xc40] sm:$0xf] }
 0x103   :  { %2907 = vmatpush.bf16.msrb.mxu2 %v4271_v62  ;;  %2883 = vmatmul.bf16.vlgmr.msrb.gmra.mxu0 %v5727_v33  ;;  %v4395_v62 = vor.u32 %v5329_v55, %v4394_v54  ;;  %v3874_v54 = vld [vmem:[#allocation7 + $0x2e0] sm:$0xf] }
 0x104   :  { %2921 = vmatpush.bf16.msra.mxu3 %v4591_v63  ;;  %2931 = vmatpush.bf16.msra.mxu0 %v5071_v0  ;;  %v5443_v63 = vld [vmem:[#allocation7 + $0xaac] sm:$0xf]  ;;  %v4868_v0 = vld [vmem:[#allocation7 + $0xad0] sm:$0xf0]  ;;  %v3875_v3 = vor.u32 %v5199_v59, %v3874_v54  ;;  %v3676_v59 = vld [vmem:[#allocation7 + $0x178] sm:$0xf0] }
 0x105   :  { %2895 = vmatpush.bf16.msra.mxu1 %v3871_v4  ;;  %v4354_v4 = vld [vmem:[#allocation7 + $0x6a0] sm:$0xf]  ;;  %v4871_v8 = vor.u32 %v5443_v63, %v4868_v0  ;;  %v5399_v0 = vld [vmem:[#allocation7 + $0x944] sm:$0xf0] }
 0x106   :  { %v4674_v63 = vld [vmem:[#allocation7 + $0x920] sm:$0xf] }
 0x107   :  { %2908 = vmatpush.bf16.msrb.mxu2 %v4231_v11  ;;  %v4355_v11 = vor.u32 %v5319_v5, %v4354_v4  ;;  %v3834_v5 = vld [vmem:[#allocation7 + $0x290] sm:$0xf] }
 0x108   :  { %2922 = vmatpush.bf16.msra.mxu3 %v4551_v15  ;;  %2932 = vmatpush.bf16.msra.mxu0 %v5031_v16  ;;  %v3994_v15 = vld [vmem:[#allocation7 + $0x3d0] sm:$0xf]  ;;  %v3635_v16 = vor.u32 %v5139_v7, %v3634_v6  ;;  %v5189_v6 = vld [vmem:[#allocation7 + $0x2b4] sm:$0xf0] }
 0x109   :  { %2896 = vmatpush.bf16.msra.mxu1 %v3831_v20  ;;  %v3594_v20 = vld [vmem:[#allocation7 + $0xb0] sm:$0xf] }
 0x10a   :  { %v4154_v7 = vld [vmem:[#allocation7 + $0x510] sm:$0xf] }
 0x10b   :  { %2909 = vmatpush.bf16.msrb.mxu2 %v4191_v24  ;;  %v4315_v24 = vor.u32 %v5309_v19, %v4314_v18  ;;  %v4116_v18 = vld [vmem:[#allocation7 + $0x4e8] sm:$0xf0]  ;;  %v4994_v19 = vld [vmem:[#allocation7 + $0xba0] sm:$0xf] }
 0x10c   :  { %2923 = vmatpush.bf16.msra.mxu3 %v4511_v28  ;;  %2933 = vmatpush.bf16.msra.mxu0 %v4991_v29  ;;  %v3595_v28 = vor.u32 %v5129_v14, %v3594_v20  ;;  %v4274_v29 = vld [vmem:[#allocation7 + $0x600] sm:$0xf]  ;;  %v5479_v20 = vld [vmem:[#allocation7 + $0xbc4] sm:$0xf0]  ;;  %v3835_v14 = vor.u32 %v5189_v6, %v3834_v5  ;;  %v5349_v5 = vld [vmem:[#allocation7 + $0x7b4] sm:$0xf0] }
 0x10d   :  { %2945 = vmatpush.bf16.msrb.mxu1 %v3795_v23  ;;  %v3995_v23 = vor.u32 %v5229_v17, %v3994_v15  ;;  %v4275_v38 = vor.u32 %v5299_v30, %v4274_v29  ;;  %v5174_v15 = vld [vmem:[#allocation7 + $0x244] sm:$0xf]  ;;  %v3756_v29 = vld [vmem:[#allocation7 + $0x218] sm:$0xf0]  ;;  %v5244_v30 = vld [vmem:[#allocation7 + $0x474] sm:$0xf] }
 0x10e   :  { %2897 = vmatmul.bf16.vlgmr.msra.gmra.mxu1 %v5731_v57  ;;  %v5254_v17 = vld [vmem:[#allocation7 + $0x4c4] sm:$0xf] }
 0x10f   :  { %2910 = vmatpush.bf16.msrb.mxu2 %v4151_v41  ;;  %v4755_v41 = vor.u32 %v5419_v32, %v4754_v31  ;;  %v4076_v31 = vld [vmem:[#allocation7 + $0x498] sm:$0xf0]  ;;  %v4954_v32 = vld [vmem:[#allocation7 + $0xb50] sm:$0xf] }
 0x110   :  { %2924 = vmatpush.bf16.msra.mxu3 %v4471_v44  ;;  %2934 = vmatpush.bf16.msra.mxu0 %v4951_v46  ;;  %v5289_v44 = vld [vmem:[#allocation7 + $0x5d4] sm:$0xf0]  ;;  %v4714_v46 = vld [vmem:[#allocation7 + $0x970] sm:$0xf] }
 0x111   :  { %2946 = vmatpush.bf16.msrb.mxu1 %v3755_v37  ;;  %v3955_v37 = vor.u32 %v5219_v27, %v3954_v10  ;;  %v4235_v53 = vor.u32 %v5289_v44, %v4234_v43  ;;  %v4119_v10 = vor.u32 %v5254_v17, %v4116_v18  ;;  %v4995_v27 = vor.u32 %v5479_v20, %v4994_v19  ;;  %v3716_v43 = vld [vmem:[#allocation7 + $0x1c8] sm:$0xf0]  ;;  %v5234_v44 = vld [vmem:[#allocation7 + $0x424] sm:$0xf]  ;;  %v4834_v17 = vld [vmem:[#allocation7 + $0xa60] sm:$0xf] }
 0x112   :  { %2911 = vmatmul.bf16.vlgmr.msrb.gmra.mxu2 %v5733_v58  ;;  %v5439_v18 = vld [vmem:[#allocation7 + $0xa84] sm:$0xf0] }
 0x113   :  { %2959 = vmatpush.bf16.msra.mxu2 %v4115_v47  ;;  %2925 = vmatmul.bf16.vlgmr.msra.gmra.mxu3 %v5741_v45  ;;  %v5409_v47 = vld [vmem:[#allocation7 + $0x994] sm:$0xf0] }
 0x114   :  { %2973 = vmatpush.bf16.msrb.mxu3 %v4435_v48  ;;  %2935 = vmatpush.bf16.msra.mxu0 %v4911_v60  ;;  %v3514_v48 = vld [vmem:[#allocation7 + $0x10] sm:$0xf]  ;;  %v4715_v55 = vor.u32 %v5409_v47, %v4714_v46  ;;  %v4194_v60 = vld [vmem:[#allocation7 + $0x560] sm:$0xf]  ;;  %v4036_v46 = vld [vmem:[#allocation7 + $0x448] sm:$0xf0] }
 0x115   :  { %2947 = vmatpush.bf16.msrb.mxu1 %v3715_v52  ;;  %v3915_v52 = vor.u32 %v5209_v40, %v3914_v39  ;;  %v3515_v56 = vor.u32 %v5109_v49, %v3514_v48  ;;  %v5369_v39 = vld [vmem:[#allocation7 + $0x854] sm:$0xf0]  ;;  %v4079_v40 = vor.u32 %v5244_v30, %v4076_v31  ;;  %v4914_v47 = vld [vmem:[#allocation7 + $0xb00] sm:$0xf]  ;;  %v5459_v48 = vld [vmem:[#allocation7 + $0xb24] sm:$0xf0]  ;;  %v4039_v54 = vor.u32 %v5234_v44, %v4036_v46 }
 0x116   :  { %v5762_v49 = vld [vmem:[#allocation8] sm:$0xff]  ;;  %v5324_v30 = vld [vmem:[#allocation7 + $0x6f4] sm:$0xf]  ;;  %v4396_v31 = vld [vmem:[#allocation7 + $0x718] sm:$0xf0] }
 0x117   :  { %2960 = vmatpush.bf16.msra.mxu2 %v4075_v61  ;;  %v5279_v61 = vld [vmem:[#allocation7 + $0x584] sm:$0xf0]  ;;  %v5194_v44 = vld [vmem:[#allocation7 + $0x2e4] sm:$0xf] }
 0x118   :  { %2974 = vmatpush.bf16.msrb.mxu3 %v4395_v62  ;;  %2936 = vmatpush.bf16.msra.mxu0 %v4871_v8  ;;  %v5075_v62 = vor.u32 %v5499_v51, %v5074_v50  ;;  %v4195_v4 = vor.u32 %v5279_v61, %v4194_v60  ;;  %v4675_v8 = vor.u32 %v5399_v0, %v4674_v63  ;;  %v5224_v60 = vld [vmem:[#allocation7 + $0x3d4] sm:$0xf]  ;;  %v3996_v61 = vld [vmem:[#allocation7 + $0x3f8] sm:$0xf0]  ;;  %v5449_v63 = vld [vmem:[#allocation7 + $0xad4] sm:$0xf0] }
 0x119   :  { %2948 = vmatpush.bf16.msrb.mxu1 %v3675_v2  ;;  %v5489_v2 = vld [vmem:[#allocation7 + $0xc14] sm:$0xf0]  ;;  %v645_v0 = vperm.slane %v5762_v49, 0  ;;  %v3999_v6 = vor.u32 %v5224_v60, %v3996_v61 }
 0x11a   :  { %v5035_v13 = vor.u32 %v5489_v2, %v5034_v1 }
 0x11b   :  { %2961 = vmatpush.bf16.msra.mxu2 %v4035_v9  ;;  %v5269_v9 = vld [vmem:[#allocation7 + $0x534] sm:$0xf0] }
 0x11c   :  { %2975 = vmatpush.bf16.msrb.mxu3 %v4355_v11  ;;  %2937 = vmatpush.bf16.msra.mxu0 %v4831_v21  ;;  %v4634_v11 = vld [vmem:[#allocation7 + $0x8d0] sm:$0xf]  ;;  %v4155_v21 = vor.u32 %v5269_v9, %v4154_v7  ;;  %v3636_v9 = vld [vmem:[#allocation7 + $0x128] sm:$0xf0] }
 0x11d   :  { %2949 = vmatpush.bf16.msrb.mxu1 %v3635_v16  ;;  %v3796_v16 = vld [vmem:[#allocation7 + $0x268] sm:$0xf0]  ;;  %v4635_v22 = vor.u32 %v5389_v12, %v4634_v11  ;;  %v5214_v11 = vld [vmem:[#allocation7 + $0x384] sm:$0xf] }
 0x11e   :  { %v3956_v12 = vld [vmem:[#allocation7 + $0x3a8] sm:$0xf0] }
 0x11f   :  { %2962 = vmatpush.bf16.msra.mxu2 %v3995_v23  ;;  %v3799_v23 = vor.u32 %v5174_v15, %v3796_v16  ;;  %v4436_v15 = vld [vmem:[#allocation7 + $0x768] sm:$0xf0] }
 0x120   :  { %2976 = vmatpush.bf16.msrb.mxu3 %v4315_v24  ;;  %2938 = vmatpush.bf16.msra.mxu0 %v4791_v36  ;;  %v4594_v24 = vld [vmem:[#allocation7 + $0x880] sm:$0xf] }
 0x121   :  { %2950 = vmatpush.bf16.msrb.mxu1 %v3595_v28  ;;  %v5164_v28 = vld [vmem:[#allocation7 + $0x1f4] sm:$0xf]  ;;  %v4595_v36 = vor.u32 %v5379_v26, %v4594_v24 }
 0x122   :  { %v5124_v26 = vld [vmem:[#allocation7 + $0xb4] sm:$0xf] }
 0x123   :  { %2963 = vmatpush.bf16.msra.mxu2 %v3955_v37  ;;  %2939 = vmatmul.bf16.vlgmr.msra.gmra.mxu0 %v5738_v25  ;;  %v3759_v37 = vor.u32 %v5164_v28, %v3756_v29  ;;  %v4835_v28 = vor.u32 %v5439_v18, %v4834_v17  ;;  %v3916_v29 = vld [vmem:[#allocation7 + $0x358] sm:$0xf0]  ;;  %v5394_v17 = vld [vmem:[#allocation7 + $0x924] sm:$0xf]  ;;  %v4676_v18 = vld [vmem:[#allocation7 + $0x948] sm:$0xf0] }
 0x124   :  { %2977 = vmatpush.bf16.msrb.mxu3 %v4275_v38  ;;  %2987 = vmatpush.bf16.msrb.mxu0 %v4755_v41  ;;  %v4554_v38 = vld [vmem:[#allocation7 + $0x830] sm:$0xf]  ;;  %v4955_v41 = vor.u32 %v5469_v34, %v4954_v32 }
 0x125   :  { %2951 = vmatpush.bf16.msrb.mxu1 %v3555_v42  ;;  %v5154_v42 = vld [vmem:[#allocation7 + $0x1a4] sm:$0xf]  ;;  %v4555_v50 = vor.u32 %v5369_v39, %v4554_v38  ;;  %v4794_v34 = vld [vmem:[#allocation7 + $0xa10] sm:$0xf]  ;;  %v4756_v38 = vld [vmem:[#allocation7 + $0x9e8] sm:$0xf0] }
 0x126   :  { %v3719_v51 = vor.u32 %v5154_v42, %v3716_v43  ;;  %v5114_v42 = vld [vmem:[#allocation7 + $0x64] sm:$0xf]  ;;  %v3556_v43 = vld [vmem:[#allocation7 + $0x88] sm:$0xf0] }
 0x127   :  { %2964 = vmatpush.bf16.msra.mxu2 %v3915_v52  ;;  %v4514_v52 = vld [vmem:[#allocation7 + $0x7e0] sm:$0xf] }
 0x128   :  { %2978 = vmatpush.bf16.msrb.mxu3 %v4235_v53  ;;  %2988 = vmatpush.bf16.msrb.mxu0 %v4715_v55  ;;  %v2674_v35 = vpop.f32.mrf.mxu1  ;;  %v5359_v53 = vld [vmem:[#allocation7 + $0x804] sm:$0xf0]  ;;  %v4915_v55 = vor.u32 %v5459_v48, %v4914_v47  ;;  %v3876_v47 = vld [vmem:[#allocation7 + $0x308] sm:$0xf0]  ;;  %v5314_v48 = vld [vmem:[#allocation7 + $0x6a4] sm:$0xf] }
 0x129   :  { %2952 = vmatpush.bf16.msrb.mxu1 %v3515_v56  ;;  %v5144_v56 = vld [vmem:[#allocation7 + $0x154] sm:$0xf]  ;;  %v4515_v2 = vor.u32 %v5359_v53, %v4514_v52  ;;  %v2675_v16 = vadd.f32 %v2674_v35, %v645_v0  ;;  %v5429_v35 = vld [vmem:[#allocation7 + $0xa34] sm:$0xf0]  ;;  %v3879_v60 = vor.u32 %v5194_v44, %v3876_v47 }
 0x12a   :  { %v4795_v46 = vor.u32 %v5429_v35, %v4794_v34 }
 0x12b   :  { %2965 = vmatpush.bf16.msra.mxu2 %v3875_v3  ;;  %v3679_v3 = vor.u32 %v5144_v56, %v3676_v59  ;;  %v4716_v56 = vld [vmem:[#allocation7 + $0x998] sm:$0xf0]  ;;  %v5104_v59 = vld [vmem:[#allocation7 + $0x14] sm:$0xf] }
 0x12c   :  { %2979 = vmatpush.bf16.msrb.mxu3 %v4195_v4  ;;  %2989 = vmatpush.bf16.msrb.mxu0 %v4675_v8  ;;  %v4474_v4 = vld [vmem:[#allocation7 + $0x790] sm:$0xf]  ;;  %v5134_v8 = vld [vmem:[#allocation7 + $0x104] sm:$0xf] }
 0x12d   :  { %3001 = vmatpush.bf16.msra.mxu1 %v5075_v62  ;;  %v4874_v62 = vld [vmem:[#allocation7 + $0xab0] sm:$0xf] }
 0x12e   :  { %2953 = vmatmul.bf16.vlgmr.msrb.gmra.mxu1 %v5727_v33  ;;  %v4875_v7 = vor.u32 %v5449_v63, %v4874_v62  ;;  %v3516_v62 = vld [vmem:[#allocation7 + $0x38] sm:$0xf0]  ;;  %v5184_v63 = vld [vmem:[#allocation7 + $0x294] sm:$0xf] }
 0x12f   :  { %2966 = vmatpush.bf16.msra.mxu2 %v3835_v14  ;;  %v4475_v14 = vor.u32 %v5349_v5, %v4474_v4  ;;  %v5304_v4 = vld [vmem:[#allocation7 + $0x654] sm:$0xf]  ;;  %v4316_v5 = vld [vmem:[#allocation7 + $0x678] sm:$0xf0] }
 0x130   :  { %2980 = vmatpush.bf16.msrb.mxu3 %v4155_v21  ;;  %2990 = vmatpush.bf16.msrb.mxu0 %v4635_v22  ;;  %v5765_v1 = vpop.f32.mrf.mxu1  ;;  %v3639_v21 = vor.u32 %v5134_v8, %v3636_v9 }
 0x131   :  { %3002 = vmatpush.bf16.msra.mxu1 %v5035_v13  ;;  %v5334_v13 = vld [vmem:[#allocation7 + $0x744] sm:$0xf] }
 0x132   :  { %2967 = vmatmul.bf16.vlgmr.msra.gmra.mxu2 %v5731_v57  ;;  %v4439_v24 = vor.u32 %v5334_v13, %v4436_v15  ;;  %v5180_v13 = vld [vmem:[#allocation7 + $0x26c] sm:$0xf0]  ;;  %v3519_v15 = vor.u32 %v5104_v59, %v3516_v62  ;;  %v5464_v62 = vld [vmem:[#allocation7 + $0xb54] sm:$0xf] }
 0x133   :  { %3015 = vmatpush.bf16.msrb.mxu2 %v3799_v23  ;;  %2981 = vmatmul.bf16.vlgmr.msrb.gmra.mxu3 %v5733_v58  ;;  %v3959_v23 = vor.u32 %v5214_v11, %v3956_v12  ;;  %v5076_v11 = vld [vmem:[#allocation7 + $0xc68] sm:$0xf0]  ;;  %v3802_v12 = vld [vmem:[#allocation7 + $0x248] sm:$0xf] }
 0x134   :  { %3029 = vmatpush.bf16.msra.mxu3 %v4119_v10  ;;  %2991 = vmatpush.bf16.msrb.mxu0 %v4595_v36  ;;  %v3596_v10 = vld [vmem:[#allocation7 + $0xd8] sm:$0xf0] }
 0x135   :  { %3003 = vmatpush.bf16.msra.mxu1 %v4995_v27  ;;  %v2688_v19 = vpop.f32.mrf.mxu2  ;;  %v5204_v27 = vld [vmem:[#allocation7 + $0x334] sm:$0xf]  ;;  %v3599_v36 = vor.u32 %v5124_v26, %v3596_v10  ;;  %v4679_v10 = vor.u32 %v5394_v17, %v4676_v18  ;;  %v4156_v18 = vld [vmem:[#allocation7 + $0x538] sm:$0xf0] }
 0x136   :  { %v2702_v20 = vpop.f32.mrf.mxu3  ;;  %v2689_v22 = vadd.f32 %v2688_v19, %v2675_v16 }
 0x137   :  { %3016 = vmatpush.bf16.msrb.mxu2 %v3759_v37  ;;  %v5414_v37 = vld [vmem:[#allocation7 + $0x9c4] sm:$0xf] }
 0x138   :  { %3030 = vmatpush.bf16.msra.mxu3 %v4079_v40  ;;  %2992 = vmatpush.bf16.msrb.mxu0 %v4555_v50  ;;  %v2703_v32 = vadd.f32 %v2702_v20, %v2689_v22  ;;  %v2730_v39 = vpop.f32.mrf.mxu1  ;;  %v3919_v40 = vor.u32 %v5204_v27, %v3916_v29  ;;  %v4356_v50 = vld [vmem:[#allocation7 + $0x6c8] sm:$0xf0]  ;;  %v5294_v22 = vld [vmem:[#allocation7 + $0x604] sm:$0xf]  ;;  %v5036_v27 = vld [vmem:[#allocation7 + $0xc18] sm:$0xf0] }
 0x139   :  { %3004 = vmatpush.bf16.msra.mxu1 %v4955_v41  ;;  %v4399_v41 = vor.u32 %v5324_v30, %v4396_v31  ;;  %v4359_v61 = vor.u32 %v5314_v48, %v4356_v50  ;;  %v5170_v29 = vld [vmem:[#allocation7 + $0x21c] sm:$0xf0]  ;;  %v5384_v31 = vld [vmem:[#allocation7 + $0x8d4] sm:$0xf]  ;;  %v4996_v48 = vld [vmem:[#allocation7 + $0xbc8] sm:$0xf0] }
 0x13a   :  { %v3722_v50 = vld [vmem:[#allocation7 + $0x1a8] sm:$0xf] }
 0x13b   :  { %3017 = vmatpush.bf16.msrb.mxu2 %v3719_v51  ;;  %v4759_v51 = vor.u32 %v5414_v37, %v4756_v38 }
 0x13c   :  { %3031 = vmatpush.bf16.msra.mxu3 %v4039_v54  ;;  %2993 = vmatpush.bf16.msrb.mxu0 %v4515_v2  ;;  %v3559_v54 = vor.u32 %v5114_v42, %v3556_v43  ;;  %v3836_v2 = vld [vmem:[#allocation7 + $0x2b8] sm:$0xf0]  ;;  %v5474_v43 = vld [vmem:[#allocation7 + $0xba4] sm:$0xf] }
 0x13d   :  { %3005 = vmatpush.bf16.msra.mxu1 %v4915_v55  ;;  %v2690_v52 = vpop.f32.mrf.mxu2  ;;  %v5404_v55 = vld [vmem:[#allocation7 + $0x974] sm:$0xf]  ;;  %v3839_v16 = vor.u32 %v5184_v63, %v3836_v2  ;;  %v4236_v42 = vld [vmem:[#allocation7 + $0x5d8] sm:$0xf0] }
 0x13e   :  { %v2704_v53 = vpop.f32.mrf.mxu3  ;;  %v4719_v9 = vor.u32 %v5404_v55, %v4716_v56  ;;  %v4999_v56 = vor.u32 %v5474_v43, %v4996_v48  ;;  %v4956_v2 = vld [vmem:[#allocation7 + $0xb78] sm:$0xf0]  ;;  %v4442_v48 = vld [vmem:[#allocation7 + $0x748] sm:$0xf] }
 0x13f   :  { %3018 = vmatpush.bf16.msrb.mxu2 %v3679_v3  ;;  %v2716_v3 = vpop.f32.mrf.mxu0  ;;  %v4476_v43 = vld [vmem:[#allocation7 + $0x7b8] sm:$0xf0] }
 0x140   :  { %3032 = vmatpush.bf16.msra.mxu3 %v3999_v6  ;;  %2994 = vmatpush.bf16.msrb.mxu0 %v4475_v14  ;;  %v5494_v6 = vld [vmem:[#allocation7 + $0xc44] sm:$0xf]  ;;  %v2717_v8 = vadd.f32 %v2716_v3, %v2703_v32  ;;  %v4319_v14 = vor.u32 %v5304_v4, %v4316_v5  ;;  %v2732_v26 = vpop.f32.mrf.mxu1  ;;  %v4636_v32 = vld [vmem:[#allocation7 + $0x8f8] sm:$0xf0]  ;;  %v3682_v3 = vld [vmem:[#allocation7 + $0x158] sm:$0xf] }
 0x141   :  { %3006 = vmatpush.bf16.msra.mxu1 %v4875_v7  ;;  %v2677_v7 = vadd.f32 %v5765_v1, %v645_v0  ;;  %v5079_v0 = vor.u32 %v5494_v6, %v5076_v11  ;;  %v3803_v1 = vor.u32 %v5180_v13, %v3802_v12  ;;  %v4639_v47 = vor.u32 %v5384_v31, %v4636_v32  ;;  %v5150_v4 = vld [vmem:[#allocation7 + $0x17c] sm:$0xf0]  ;;  %v5364_v6 = vld [vmem:[#allocation7 + $0x834] sm:$0xf] }
 0x142   :  { %v5773_v20 = vadd.f32 %v2730_v39, %v2717_v8  ;;  %v5264_v12 = vld [vmem:[#allocation7 + $0x514] sm:$0xf]  ;;  %v3683_v17 = vor.u32 %v5150_v4, %v3682_v3  ;;  %v5120_v3 = vld [vmem:[#allocation7 + $0x8c] sm:$0xf0] }
 0x143   :  { %3019 = vmatpush.bf16.msrb.mxu2 %v3639_v21  ;;  %2995 = vmatmul.bf16.vlgmr.msrb.gmra.mxu0 %v5741_v45  ;;  %v2691_v19 = vadd.f32 %v2690_v52, %v2677_v7  ;;  %v646_v21 = vperm.slane %v5762_v49, 1  ;;  %v5374_v52 = vld [vmem:[#allocation7 + $0x884] sm:$0xf]  ;;  %v4556_v7 = vld [vmem:[#allocation7 + $0x858] sm:$0xf0] }
 0x144   :  { %3033 = vmatpush.bf16.msra.mxu3 %v3959_v23  ;;  %3043 = vmatpush.bf16.msra.mxu0 %v4439_v24  ;;  %v4276_v23 = vld [vmem:[#allocation7 + $0x628] sm:$0xf0]  ;;  %v5484_v24 = vld [vmem:[#allocation7 + $0xbf4] sm:$0xf] }
 0x145   :  { %3007 = vmatpush.bf16.msra.mxu1 %v4835_v28  ;;  %v3762_v28 = vld [vmem:[#allocation7 + $0x1f8] sm:$0xf]  ;;  %v2744_v30 = vpop.f32.mrf.mxu2  ;;  %v2705_v34 = vadd.f32 %v2704_v53, %v2691_v19  ;;  %v4279_v37 = vor.u32 %v5294_v22, %v4276_v23  ;;  %v5039_v39 = vor.u32 %v5484_v24, %v5036_v27  ;;  %v4596_v53 = vld [vmem:[#allocation7 + $0x8a8] sm:$0xf0]  ;;  %v5454_v19 = vld [vmem:[#allocation7 + $0xb04] sm:$0xf]  ;;  %v4559_v22 = vor.u32 %v5364_v6, %v4556_v7 }
 0x146   :  { %v2745_v35 = vadd.f32 %v2744_v30, %v646_v21  ;;  %v4599_v63 = vor.u32 %v5374_v52, %v4596_v53  ;;  %v3642_v23 = vld [vmem:[#allocation7 + $0x108] sm:$0xf]  ;;  %v5140_v24 = vld [vmem:[#allocation7 + $0x12c] sm:$0xf0]  ;;  %v4516_v27 = vld [vmem:[#allocation7 + $0x808] sm:$0xf0] }
 0x147   :  { %3020 = vmatpush.bf16.msrb.mxu2 %v3599_v36  ;;  %v2758_v36 = vpop.f32.mrf.mxu3  ;;  %v2718_v38 = vpop.f32.mrf.mxu0  ;;  %v5781_v30 = vld [vmem:[#allocation10] sm:$0xff]  ;;  %v3643_v32 = vor.u32 %v5140_v24, %v3642_v23  ;;  %v4002_v23 = vld [vmem:[#allocation7 + $0x3d8] sm:$0xf]  ;;  %v5230_v24 = vld [vmem:[#allocation7 + $0x3fc] sm:$0xf0] }
 0x148   :  { %3034 = vmatpush.bf16.msra.mxu3 %v3919_v40  ;;  %3044 = vmatpush.bf16.msra.mxu0 %v4399_v41  ;;  %v3763_v40 = vor.u32 %v5170_v29, %v3762_v28  ;;  %v5284_v41 = vld [vmem:[#allocation7 + $0x5b4] sm:$0xf]  ;;  %v2759_v44 = vadd.f32 %v2758_v36, %v2745_v35  ;;  %v4159_v28 = vor.u32 %v5264_v12, %v4156_v18  ;;  %v4876_v35 = vld [vmem:[#allocation7 + $0xad8] sm:$0xf0]  ;;  %v4042_v6 = vld [vmem:[#allocation7 + $0x428] sm:$0xf] }
 0x149   :  { %3008 = vmatpush.bf16.msra.mxu1 %v4795_v46  ;;  %v2719_v46 = vadd.f32 %v2718_v38, %v2705_v34  ;;  %v4239_v55 = vor.u32 %v5284_v41, %v4236_v42  ;;  %v5444_v34 = vld [vmem:[#allocation7 + $0xab4] sm:$0xf]  ;;  %v3602_v38 = vld [vmem:[#allocation7 + $0xb8] sm:$0xf]  ;;  %v5250_v41 = vld [vmem:[#allocation7 + $0x49c] sm:$0xf0] }
 0x14a   :  { %v5344_v42 = vld [vmem:[#allocation7 + $0x794] sm:$0xf]  ;;  %v5240_v7 = vld [vmem:[#allocation7 + $0x44c] sm:$0xf0] }
 0x14b   :  { %3021 = vmatpush.bf16.msrb.mxu2 %v3559_v54  ;;  %v5779_v54 = vadd.f32 %v2732_v26, %v2719_v46  ;;  %v2786_v8 = vpop.f32.mrf.mxu1  ;;  %v4122_v26 = vld [vmem:[#allocation7 + $0x4c8] sm:$0xf] }
 0x14c   :  { %3035 = vmatpush.bf16.msra.mxu3 %v3879_v60  ;;  %3045 = vmatpush.bf16.msra.mxu0 %v4359_v61  ;;  %v5274_v60 = vld [vmem:[#allocation7 + $0x564] sm:$0xf]  ;;  %v4196_v61 = vld [vmem:[#allocation7 + $0x588] sm:$0xf0] }
 0x14d   :  { %3057 = vmatpush.bf16.msrb.mxu1 %v4759_v51  ;;  %v5160_v51 = vld [vmem:[#allocation7 + $0x1cc] sm:$0xf0]  ;;  %v2746_v5 = vpop.f32.mrf.mxu2  ;;  %v4199_v11 = vor.u32 %v5274_v60, %v4196_v61  ;;  %v4836_v60 = vld [vmem:[#allocation7 + $0xa88] sm:$0xf0] }
 0x14e   :  { %3009 = vmatmul.bf16.vlgmr.msra.gmra.mxu1 %v5738_v25  ;;  %v3723_v59 = vor.u32 %v5160_v51, %v3722_v50  ;;  %v5340_v50 = vld [vmem:[#allocation7 + $0x76c] sm:$0xf0]  ;;  %v3365_v51 = vmax.f32 %v5773_v20, 0.0 }
 0x14f   :  { %3022 = vmatpush.bf16.msrb.mxu2 %v3519_v15  ;;  %v2760_v13 = vpop.f32.mrf.mxu3  ;;  %v2772_v15 = vpop.f32.mrf.mxu0  ;;  %v4443_v20 = vor.u32 %v5340_v50, %v4442_v48  ;;  %v4722_v48 = vld [vmem:[#allocation7 + $0x978] sm:$0xf] }
 0x150   :  { %3036 = vmatpush.bf16.msra.mxu3 %v3839_v16  ;;  %3046 = vmatpush.bf16.msra.mxu0 %v4319_v14  ;;  %v4959_v16 = vor.u32 %v5464_v62, %v4956_v2  ;;  %v4916_v14 = vld [vmem:[#allocation7 + $0xb28] sm:$0xf0]  ;;  %v3562_v2 = vld [vmem:[#allocation7 + $0x68] sm:$0xf] }
 0x151   :  { %3058 = vmatpush.bf16.msrb.mxu1 %v4719_v9  ;;  %v2747_v9 = vadd.f32 %v2746_v5, %v646_v21  ;;  %v5354_v21 = vld [vmem:[#allocation7 + $0x7e4] sm:$0xf]  ;;  %v4919_v31 = vor.u32 %v5454_v19, %v4916_v14  ;;  %v3563_v18 = vor.u32 %v5120_v3, %v3562_v2  ;;  %v5424_v19 = vld [vmem:[#allocation7 + $0xa14] sm:$0xf]  ;;  %v4796_v14 = vld [vmem:[#allocation7 + $0xa38] sm:$0xf0] }
 0x152   :  { %3023 = vmatmul.bf16.vlgmr.msrb.gmra.mxu2 %v5727_v33 }
 0x153   :  { %3071 = vmatpush.bf16.msra.mxu2 %v5079_v0  ;;  %3037 = vmatmul.bf16.vlgmr.msra.gmra.mxu3 %v5731_v57  ;;  %v2761_v0 = vadd.f32 %v2760_v13, %v2747_v9  ;;  %v2788_v4 = vpop.f32.mrf.mxu1  ;;  %v4402_v13 = vld [vmem:[#allocation7 + $0x6f8] sm:$0xf] }
 0x154   :  { %3085 = vmatpush.bf16.msrb.mxu3 %v3803_v1  ;;  %3047 = vmatpush.bf16.msra.mxu0 %v4279_v37  ;;  %v2773_v1 = vadd.f32 %v2772_v15, %v2759_v44  ;;  %v4519_v37 = vor.u32 %v5354_v21, %v4516_v27  ;;  %v3389_v44 = vperm.slane %v5781_v30, 0  ;;  %v5330_v15 = vld [vmem:[#allocation7 + $0x71c] sm:$0xf0]  ;;  %v4762_v21 = vld [vmem:[#allocation7 + $0x9c8] sm:$0xf] }
 0x155   :  { %3059 = vmatpush.bf16.msrb.mxu1 %v4679_v10  ;;  %v5260_v10 = vld [vmem:[#allocation7 + $0x4ec] sm:$0xf0]  ;;  %v2800_v46 = vpop.f32.mrf.mxu2 }
 0x156   :  { %v2787_v29 = vadd.f32 %v2786_v8, %v2773_v1  ;;  %v4123_v36 = vor.u32 %v5260_v10, %v4122_v26  ;;  %v647_v8 = vperm.slane %v5762_v49, 2  ;;  %v4043_v1 = vor.u32 %v5240_v7, %v4042_v6  ;;  %v5420_v27 = vld [vmem:[#allocation7 + $0x9ec] sm:$0xf0] }
 0x157   :  { %3072 = vmatpush.bf16.msra.mxu2 %v5039_v39  ;;  %v5130_v39 = vld [vmem:[#allocation7 + $0xdc] sm:$0xf0]  ;;  %v2774_v53 = vpop.f32.mrf.mxu0  ;;  %v2814_v9 = vpop.f32.mrf.mxu3  ;;  %v4403_v10 = vor.u32 %v5330_v15, %v4402_v13  ;;  %v5300_v13 = vld [vmem:[#allocation7 + $0x62c] sm:$0xf0] }
 0x158   :  { %3086 = vmatpush.bf16.msrb.mxu3 %v3763_v40  ;;  %3048 = vmatpush.bf16.msra.mxu0 %v4239_v55  ;;  %v4082_v40 = vld [vmem:[#allocation7 + $0x478] sm:$0xf]  ;;  %v2801_v52 = vadd.f32 %v2800_v46, %v2787_v29  ;;  %v4879_v55 = vor.u32 %v5444_v34, %v4876_v35  ;;  %v2775_v61 = vadd.f32 %v2774_v53, %v2761_v0  ;;  %v4362_v34 = vld [vmem:[#allocation7 + $0x6a8] sm:$0xf]  ;;  %v5320_v35 = vld [vmem:[#allocation7 + $0x6cc] sm:$0xf0] }
 0x159   :  { %3060 = vmatpush.bf16.msrb.mxu1 %v4639_v47  ;;  %v3390_v47 = vperm.slane %v5781_v30, 1  ;;  %v4083_v62 = vor.u32 %v5250_v41, %v4082_v40  ;;  %v3522_v0 = vld [vmem:[#allocation7 + $0x18] sm:$0xf]  ;;  %v4003_v41 = vor.u32 %v5230_v24, %v4002_v23  ;;  %v5220_v46 = vld [vmem:[#allocation7 + $0x3ac] sm:$0xf0] }
 0x15a   :  { %v3366_v5 = vmax.f32 %v2801_v52, 0.0  ;;  %v2789_v12 = vadd.f32 %v2788_v4, %v2775_v61  ;;  %v4363_v52 = vor.u32 %v5320_v35, %v4362_v34  ;;  %v5410_v53 = vld [vmem:[#allocation7 + $0x99c] sm:$0xf0]  ;;  %v3922_v4 = vld [vmem:[#allocation7 + $0x338] sm:$0xf] }
 0x15b   :  { %3073 = vmatpush.bf16.msra.mxu2 %v4999_v56  ;;  %v3603_v56 = vor.u32 %v5130_v39, %v3602_v38  ;;  %v4723_v3 = vor.u32 %v5410_v53, %v4722_v48  ;;  %v3842_v34 = vld [vmem:[#allocation7 + $0x298] sm:$0xf]  ;;  %v5190_v35 = vld [vmem:[#allocation7 + $0x2bc] sm:$0xf0]  ;;  %v4202_v48 = vld [vmem:[#allocation7 + $0x568] sm:$0xf] }
 0x15c   :  { %3087 = vmatpush.bf16.msrb.mxu3 %v3723_v59  ;;  %3049 = vmatpush.bf16.msra.mxu0 %v4199_v11  ;;  %v5434_v59 = vld [vmem:[#allocation7 + $0xa64] sm:$0xf] }
 0x15d   :  { %3061 = vmatpush.bf16.msrb.mxu1 %v4599_v63  ;;  %v4479_v63 = vor.u32 %v5344_v42, %v4476_v43  ;;  %v4839_v11 = vor.u32 %v5434_v59, %v4836_v60  ;;  %v2802_v29 = vpop.f32.mrf.mxu2  ;;  %v4763_v42 = vor.u32 %v5420_v27, %v4762_v21  ;;  %v3962_v43 = vld [vmem:[#allocation7 + $0x388] sm:$0xf]  ;;  %v4322_v59 = vld [vmem:[#allocation7 + $0x658] sm:$0xf]  ;;  %v5310_v60 = vld [vmem:[#allocation7 + $0x67c] sm:$0xf0] }
 0x15e   :  { %v2803_v38 = vadd.f32 %v2802_v29, %v2789_v12  ;;  %v3963_v2 = vor.u32 %v5220_v46, %v3962_v43  ;;  %v4323_v7 = vor.u32 %v5310_v60, %v4322_v59  ;;  %v4282_v12 = vld [vmem:[#allocation7 + $0x608] sm:$0xf]  ;;  %v5390_v21 = vld [vmem:[#allocation7 + $0x8fc] sm:$0xf0]  ;;  %v4962_v27 = vld [vmem:[#allocation7 + $0xb58] sm:$0xf] }
 0x15f   :  { %3074 = vmatpush.bf16.msra.mxu2 %v4959_v16  ;;  %v3409_v16 = vmul.f32 %v3389_v44, %v3365_v51  ;;  %v4283_v24 = vor.u32 %v5300_v13, %v4282_v12  ;;  %v4242_v29 = vld [vmem:[#allocation7 + $0x5b8] sm:$0xf]  ;;  %v3804_v43 = vld [vmem:[#allocation7 + $0x270] sm:$0xf0]  ;;  %v5370_v59 = vld [vmem:[#allocation7 + $0x85c] sm:$0xf0] }
 0x160   :  { %3088 = vmatpush.bf16.msrb.mxu3 %v3683_v17  ;;  %3050 = vmatpush.bf16.msra.mxu0 %v4159_v28  ;;  %v3410_v17 = vmul.f32 %v3390_v47, %v3366_v5  ;;  %v5082_v28 = vld [vmem:[#allocation7 + $0xc48] sm:$0xf]  ;;  %v2828_v40 = vpop.f32.mrf.mxu0  ;;  %v3376_v50 = vmax.f32 %v2803_v38, 0.0  ;;  %v5210_v5 = vld [vmem:[#allocation7 + $0x35c] sm:$0xf0] }
 0x161   :  { %3062 = vmatpush.bf16.msrb.mxu1 %v4559_v22  ;;  %v5110_v22 = vld [vmem:[#allocation7 + $0x3c] sm:$0xf0]  ;;  %v4602_v38 = vld [vmem:[#allocation7 + $0x888] sm:$0xf]  ;;  %v4882_v60 = vld [vmem:[#allocation7 + $0xab8] sm:$0xf] }
 0x162   :  { %v5792_v26 = vadd.f32 %v3410_v17, %v3409_v16  ;;  %v3523_v39 = vor.u32 %v5110_v22, %v3522_v0  ;;  %v3882_v0 = vld [vmem:[#allocation7 + $0x2e8] sm:$0xf] }
 0x163   :  { %3075 = vmatpush.bf16.msra.mxu2 %v4919_v31  ;;  %3051 = vmatmul.bf16.vlgmr.msra.gmra.mxu0 %v5733_v58  ;;  %v4799_v31 = vor.u32 %v5424_v19, %v4796_v14  ;;  %v3923_v19 = vor.u32 %v5210_v5, %v3922_v4  ;;  %v4162_v5 = vld [vmem:[#allocation7 + $0x518] sm:$0xf] }
 0x164   :  { %3089 = vmatpush.bf16.msrb.mxu3 %v3643_v32  ;;  %3099 = vmatpush.bf16.msrb.mxu0 %v4123_v36  ;;  %v5500_v32 = vld [vmem:[#allocation7 + $0xc6c] sm:$0xf0]  ;;  %v3375_v36 = vmax.f32 %v5779_v54, 0.0 }
 0x165   :  { %3063 = vmatpush.bf16.msrb.mxu1 %v4519_v37  ;;  %v2815_v37 = vadd.f32 %v2814_v9, %v647_v8  ;;  %v5083_v54 = vor.u32 %v5500_v32, %v5082_v28  ;;  %v4682_v9 = vld [vmem:[#allocation7 + $0x928] sm:$0xf]  ;;  %v5470_v28 = vld [vmem:[#allocation7 + $0xb7c] sm:$0xf0] }
 0x166   :  { %v3419_v61 = vmul.f32 %v3389_v44, %v3375_v36  ;;  %v5400_v44 = vld [vmem:[#allocation7 + $0x94c] sm:$0xf0]  ;;  %v4963_v36 = vor.u32 %v5470_v28, %v4962_v27  ;;  %v4482_v27 = vld [vmem:[#allocation7 + $0x798] sm:$0xf] }
 0x167   :  { %3076 = vmatpush.bf16.msra.mxu2 %v4879_v55  ;;  %v2829_v51 = vadd.f32 %v2828_v40, %v2815_v37  ;;  %v5042_v55 = vld [vmem:[#allocation7 + $0xbf8] sm:$0xf]  ;;  %v4683_v14 = vor.u32 %v5400_v44, %v4682_v9  ;;  %v4922_v40 = vld [vmem:[#allocation7 + $0xb08] sm:$0xf]  ;;  %v3391_v9 = vperm.slane %v5781_v30, 2 }
 0x168   :  { %3090 = vmatpush.bf16.msrb.mxu3 %v3603_v56  ;;  %3100 = vmatpush.bf16.msrb.mxu0 %v4083_v62  ;;  %v5490_v56 = vld [vmem:[#allocation7 + $0xc1c] sm:$0xf0]  ;;  %v3420_v62 = vmul.f32 %v3390_v47, %v3376_v50  ;;  %v5480_v47 = vld [vmem:[#allocation7 + $0xbcc] sm:$0xf0] }
 0x169   :  { %3064 = vmatpush.bf16.msrb.mxu1 %v4479_v63  ;;  %v2816_v63 = vpop.f32.mrf.mxu3  ;;  %v5043_v6 = vor.u32 %v5490_v56, %v5042_v55  ;;  %v5280_v50 = vld [vmem:[#allocation7 + $0x58c] sm:$0xf0]  ;;  %v4562_v56 = vld [vmem:[#allocation7 + $0x838] sm:$0xf] }
 0x16a   :  { %v2817_v15 = vadd.f32 %v2816_v63, %v647_v8  ;;  %v5290_v8 = vld [vmem:[#allocation7 + $0x5dc] sm:$0xf0]  ;;  %v5165_v63 = vld [vmem:[#allocation7 + $0x1fc] sm:$0xf]  ;;  %v4563_v44 = vor.u32 %v5370_v59, %v4562_v56 }
 0x16b   :  { %3077 = vmatpush.bf16.msra.mxu2 %v4839_v11  ;;  %v5002_v11 = vld [vmem:[#allocation7 + $0xba8] sm:$0xf]  ;;  %v2842_v16 = vpop.f32.mrf.mxu1  ;;  %v4243_v37 = vor.u32 %v5290_v8, %v4242_v29  ;;  %v5350_v8 = vld [vmem:[#allocation7 + $0x7bc] sm:$0xf0] }
 0x16c   :  { %3091 = vmatpush.bf16.msrb.mxu3 %v3563_v18  ;;  %3101 = vmatpush.bf16.msrb.mxu0 %v4043_v1  ;;  %v2843_v17 = vadd.f32 %v2842_v16, %v2829_v51  ;;  %v2830_v18 = vpop.f32.mrf.mxu0  ;;  %v5200_v1 = vld [vmem:[#allocation7 + $0x30c] sm:$0xf0]  ;;  %v5003_v23 = vor.u32 %v5480_v47, %v5002_v11  ;;  %v5255_v11 = vld [vmem:[#allocation7 + $0x4cc] sm:$0xf]  ;;  %v4124_v47 = vld [vmem:[#allocation7 + $0x4f0] sm:$0xf0] }
 0x16d   :  { %3113 = vmatpush.bf16.msra.mxu1 %v4443_v20  ;;  %v5802_v20 = vadd.f32 %v3420_v62, %v3419_v61  ;;  %v2831_v22 = vadd.f32 %v2830_v18, %v2817_v15  ;;  %v4203_v61 = vor.u32 %v5280_v50, %v4202_v48  ;;  %v5450_v62 = vld [vmem:[#allocation7 + $0xadc] sm:$0xf0]  ;;  %v4522_v15 = vld [vmem:[#allocation7 + $0x7e8] sm:$0xf]  ;;  %v5360_v16 = vld [vmem:[#allocation7 + $0x80c] sm:$0xf0]  ;;  %v4483_v48 = vor.u32 %v5350_v8, %v4482_v27 }
 0x16e   :  { %3065 = vmatmul.bf16.vlgmr.msrb.gmra.mxu1 %v5741_v45  ;;  %v4883_v12 = vor.u32 %v5450_v62, %v4882_v60  ;;  %v4842_v18 = vld [vmem:[#allocation7 + $0xa68] sm:$0xf]  ;;  %v5235_v50 = vld [vmem:[#allocation7 + $0x42c] sm:$0xf]  ;;  %v3644_v62 = vld [vmem:[#allocation7 + $0x130] sm:$0xf0] }
 0x16f   :  { %3078 = vmatpush.bf16.msra.mxu2 %v4799_v31  ;;  %v3883_v31 = vor.u32 %v5200_v1, %v3882_v0  ;;  %v5440_v0 = vld [vmem:[#allocation7 + $0xa8c] sm:$0xf0]  ;;  %v5155_v1 = vld [vmem:[#allocation7 + $0x1ac] sm:$0xf]  ;;  %v5305_v8 = vld [vmem:[#allocation7 + $0x65c] sm:$0xf] }
 0x170   :  { %3092 = vmatpush.bf16.msrb.mxu3 %v3523_v39  ;;  %3102 = vmatpush.bf16.msrb.mxu0 %v4003_v41  ;;  %v5380_v39 = vld [vmem:[#allocation7 + $0x8ac] sm:$0xf0]  ;;  %v4843_v28 = vor.u32 %v5440_v0, %v4842_v18  ;;  %v5315_v18 = vld [vmem:[#allocation7 + $0x6ac] sm:$0xf]  ;;  %v4684_v0 = vld [vmem:[#allocation7 + $0x950] sm:$0xf0] }
 0x171   :  { %3114 = vmatpush.bf16.msra.mxu1 %v4403_v10  ;;  %v4642_v10 = vld [vmem:[#allocation7 + $0x8d8] sm:$0xf]  ;;  %v5460_v41 = vld [vmem:[#allocation7 + $0xb2c] sm:$0xf0] }
 0x172   :  { %3079 = vmatmul.bf16.vlgmr.msra.gmra.mxu2 %v5738_v25  ;;  %v4643_v32 = vor.u32 %v5390_v21, %v4642_v10  ;;  %v4923_v53 = vor.u32 %v5460_v41, %v4922_v40  ;;  %v4523_v10 = vor.u32 %v5360_v16, %v4522_v15  ;;  %v4084_v21 = vld [vmem:[#allocation7 + $0x4a0] sm:$0xf0]  ;;  %v4444_v40 = vld [vmem:[#allocation7 + $0x770] sm:$0xf0]  ;;  %v5415_v41 = vld [vmem:[#allocation7 + $0x9cc] sm:$0xf] }
 0x173   :  { %3127 = vmatpush.bf16.msrb.mxu2 %v4763_v42  ;;  %3093 = vmatmul.bf16.vlgmr.msrb.gmra.mxu3 %v5727_v33  ;;  %v5175_v42 = vld [vmem:[#allocation7 + $0x24c] sm:$0xf]  ;;  %v2844_v46 = vpop.f32.mrf.mxu1  ;;  %v5125_v15 = vld [vmem:[#allocation7 + $0xbc] sm:$0xf]  ;;  %v3604_v16 = vld [vmem:[#allocation7 + $0xe0] sm:$0xf0] }
 0x174   :  { %3141 = vmatpush.bf16.msra.mxu3 %v5083_v54  ;;  %3103 = vmatpush.bf16.msrb.mxu0 %v3963_v2  ;;  %v5808_v51 = vadd.f32 %v2844_v46, %v2831_v22  ;;  %v3843_v54 = vor.u32 %v5190_v35, %v3842_v34  ;;  %v3807_v55 = vor.u32 %v5175_v42, %v3804_v43  ;;  %v3764_v2 = vld [vmem:[#allocation7 + $0x220] sm:$0xf0]  ;;  %v3724_v22 = vld [vmem:[#allocation7 + $0x1d0] sm:$0xf0]  ;;  %v5145_v35 = vld [vmem:[#allocation7 + $0x15c] sm:$0xf] }
 0x175   :  { %3115 = vmatpush.bf16.msra.mxu1 %v4363_v52  ;;  %v4603_v52 = vor.u32 %v5380_v39, %v4602_v38  ;;  %v3767_v13 = vor.u32 %v5165_v63, %v3764_v2  ;;  %v3727_v29 = vor.u32 %v5155_v1, %v3724_v22  ;;  %v4764_v42 = vld [vmem:[#allocation7 + $0x9f0] sm:$0xf0] }
 0x176   :  { %v2870_v4 = vpop.f32.mrf.mxu3  ;;  %v4767_v60 = vor.u32 %v5415_v41, %v4764_v42  ;;  %v3524_v42 = vld [vmem:[#allocation7 + $0x40] sm:$0xf0] }
 0x177   :  { %3128 = vmatpush.bf16.msrb.mxu2 %v4723_v3  ;;  %v2856_v3 = vpop.f32.mrf.mxu2 }
 0x178   :  { %3142 = vmatpush.bf16.msra.mxu3 %v5043_v6  ;;  %3104 = vmatpush.bf16.msrb.mxu0 %v3923_v19  ;;  %v5270_v6 = vld [vmem:[#allocation7 + $0x53c] sm:$0xf0] }
 0x179   :  { %3116 = vmatpush.bf16.msra.mxu1 %v4323_v7  ;;  %v2857_v7 = vadd.f32 %v2856_v3, %v2843_v17  ;;  %v4127_v17 = vor.u32 %v5255_v11, %v4124_v47  ;;  %v5405_v3 = vld [vmem:[#allocation7 + $0x97c] sm:$0xf] }
 0x17b   :  { %3129 = vmatpush.bf16.msrb.mxu2 %v4683_v14  ;;  %v2871_v19 = vadd.f32 %v2870_v4, %v2857_v7  ;;  %v4163_v14 = vor.u32 %v5270_v6, %v4162_v5  ;;  %v4724_v4 = vld [vmem:[#allocation7 + $0x9a0] sm:$0xf0]  ;;  %v648_v6 = vperm.slane %v5762_v49, 3  ;;  %v5225_v7 = vld [vmem:[#allocation7 + $0x3dc] sm:$0xf] }
 0x17c   :  { %3143 = vmatpush.bf16.msra.mxu3 %v5003_v23  ;;  %3105 = vmatpush.bf16.msrb.mxu0 %v3883_v31  ;;  %v5245_v23 = vld [vmem:[#allocation7 + $0x47c] sm:$0xf]  ;;  %v4802_v31 = vld [vmem:[#allocation7 + $0xa18] sm:$0xf] }
 0x17d   :  { %3117 = vmatpush.bf16.msra.mxu1 %v4283_v24  ;;  %v3367_v24 = vmax.f32 %v2871_v19, 0.0  ;;  %v4087_v39 = vor.u32 %v5245_v23, %v4084_v21  ;;  %v4364_v19 = vld [vmem:[#allocation7 + $0x6d0] sm:$0xf0] }
 0x17e   :  { %v4367_v21 = vor.u32 %v5315_v18, %v4364_v19  ;;  %v3810_v18 = vld [vmem:[#allocation7 + $0x250] sm:$0xf] }
 0x17f   :  { %3130 = vmatpush.bf16.msrb.mxu2 %v4643_v32  ;;  %v5430_v32 = vld [vmem:[#allocation7 + $0xa3c] sm:$0xf0]  ;;  %v3411_v34 = vmul.f32 %v3391_v9, %v3367_v24  ;;  %v2858_v38 = vpop.f32.mrf.mxu2  ;;  %v3607_v24 = vor.u32 %v5125_v15, %v3604_v16 }
 0x180   :  { %3144 = vmatpush.bf16.msra.mxu3 %v4963_v36  ;;  %3106 = vmatpush.bf16.msrb.mxu0 %v3843_v54  ;;  %v3684_v36 = vld [vmem:[#allocation7 + $0x180] sm:$0xf0]  ;;  %v2859_v46 = vadd.f32 %v2858_v38, %v5808_v51  ;;  %v4044_v54 = vld [vmem:[#allocation7 + $0x450] sm:$0xf0]  ;;  %v2884_v63 = vpop.f32.mrf.mxu0 }
 0x181   :  { %3118 = vmatpush.bf16.msra.mxu1 %v4243_v37  ;;  %v5335_v37 = vld [vmem:[#allocation7 + $0x74c] sm:$0xf]  ;;  %v5815_v43 = vadd.f32 %v5792_v26, %v3411_v34  ;;  %v5325_v26 = vld [vmem:[#allocation7 + $0x6fc] sm:$0xf]  ;;  %v4047_v2 = vor.u32 %v5235_v50, %v4044_v54  ;;  %v4404_v51 = vld [vmem:[#allocation7 + $0x720] sm:$0xf0]  ;;  %v2885_v22 = vadd.f32 %v2884_v63, %v648_v6 }
 0x182   :  { %v4447_v59 = vor.u32 %v5335_v37, %v4444_v40  ;;  %v4644_v34 = vld [vmem:[#allocation7 + $0x900] sm:$0xf0]  ;;  %v5375_v54 = vld [vmem:[#allocation7 + $0x88c] sm:$0xf] }
 0x183   :  { %3131 = vmatpush.bf16.msrb.mxu2 %v4603_v52  ;;  %3107 = vmatmul.bf16.vlgmr.msrb.gmra.mxu0 %v5731_v57  ;;  %v2872_v52 = vpop.f32.mrf.mxu3 }
 0x184   :  { %3145 = vmatpush.bf16.msra.mxu3 %v4923_v53  ;;  %3155 = vmatpush.bf16.msra.mxu0 %v3807_v55  ;;  %v4803_v53 = vor.u32 %v5430_v32, %v4802_v31  ;;  %v3687_v55 = vor.u32 %v5145_v35, %v3684_v36  ;;  %v2873_v56 = vadd.f32 %v2872_v52, %v2859_v46  ;;  %v5385_v32 = vld [vmem:[#allocation7 + $0x8dc] sm:$0xf]  ;;  %v3924_v36 = vld [vmem:[#allocation7 + $0x360] sm:$0xf0]  ;;  %v5295_v46 = vld [vmem:[#allocation7 + $0x60c] sm:$0xf] }
 0x185   :  { %3119 = vmatpush.bf16.msra.mxu1 %v4203_v61  ;;  %v5135_v61 = vld [vmem:[#allocation7 + $0x10c] sm:$0xf]  ;;  %v5205_v35 = vld [vmem:[#allocation7 + $0x33c] sm:$0xf]  ;;  %v4647_v41 = vor.u32 %v5385_v32, %v4644_v34  ;;  %v4604_v52 = vld [vmem:[#allocation7 + $0x8b0] sm:$0xf0] }
 0x186   :  { %v3377_v5 = vmax.f32 %v2873_v56, 0.0  ;;  %v3647_v11 = vor.u32 %v5135_v61, %v3644_v62  ;;  %v3927_v50 = vor.u32 %v5205_v35, %v3924_v36  ;;  %v5084_v56 = vld [vmem:[#allocation7 + $0xc70] sm:$0xf0]  ;;  %v5265_v32 = vld [vmem:[#allocation7 + $0x51c] sm:$0xf] }
 0x187   :  { %3132 = vmatpush.bf16.msrb.mxu2 %v4563_v44  ;;  %v4004_v44 = vld [vmem:[#allocation7 + $0x400] sm:$0xf0]  ;;  %v5345_v35 = vld [vmem:[#allocation7 + $0x79c] sm:$0xf] }
 0x188   :  { %3146 = vmatpush.bf16.msra.mxu3 %v4883_v12  ;;  %3156 = vmatpush.bf16.msra.mxu0 %v3767_v13  ;;  %v3421_v47 = vmul.f32 %v3391_v9, %v3377_v5  ;;  %v4407_v12 = vor.u32 %v5325_v26, %v4404_v51  ;;  %v4727_v13 = vor.u32 %v5405_v3, %v4724_v4  ;;  %v5215_v9 = vld [vmem:[#allocation7 + $0x38c] sm:$0xf]  ;;  %v2886_v37 = vpop.f32.mrf.mxu0  ;;  %v5285_v51 = vld [vmem:[#allocation7 + $0x5bc] sm:$0xf]  ;;  %v4244_v3 = vld [vmem:[#allocation7 + $0x5e0] sm:$0xf0] }
 0x189   :  { %3120 = vmatpush.bf16.msra.mxu1 %v4163_v14  ;;  %v4007_v49 = vor.u32 %v5225_v7, %v4004_v44  ;;  %v5395_v14 = vld [vmem:[#allocation7 + $0x92c] sm:$0xf]  ;;  %v5365_v7 = vld [vmem:[#allocation7 + $0x83c] sm:$0xf]  ;;  %v4564_v44 = vld [vmem:[#allocation7 + $0x860] sm:$0xf0]  ;;  %v4247_v19 = vor.u32 %v5285_v51, %v4244_v3 }
 0x18a   :  { %v5824_v1 = vadd.f32 %v5802_v20, %v3421_v47  ;;  %v4687_v27 = vor.u32 %v5395_v14, %v4684_v0  ;;  %v4324_v20 = vld [vmem:[#allocation7 + $0x680] sm:$0xf0]  ;;  %v4567_v14 = vor.u32 %v5365_v7, %v4564_v44  ;;  %v5275_v0 = vld [vmem:[#allocation7 + $0x56c] sm:$0xf]  ;;  %v4924_v3 = vld [vmem:[#allocation7 + $0xb30] sm:$0xf0] }
 0x18b   :  { %3133 = vmatpush.bf16.msrb.mxu2 %v4523_v10  ;;  %v2898_v23 = vpop.f32.mrf.mxu1  ;;  %v4327_v40 = vor.u32 %v5305_v8, %v4324_v20  ;;  %v5044_v47 = vld [vmem:[#allocation7 + $0xc20] sm:$0xf0]  ;;  %v5171_v8 = vld [vmem:[#allocation7 + $0x224] sm:$0xf0]  ;;  %v5455_v51 = vld [vmem:[#allocation7 + $0xb0c] sm:$0xf] }
 0x18c   :  { %3147 = vmatpush.bf16.msra.mxu3 %v4843_v28  ;;  %3157 = vmatpush.bf16.msra.mxu0 %v3727_v29  ;;  %v2899_v10 = vadd.f32 %v2898_v23, %v2885_v22  ;;  %v5115_v28 = vld [vmem:[#allocation7 + $0x6c] sm:$0xf]  ;;  %v3564_v29 = vld [vmem:[#allocation7 + $0x90] sm:$0xf0]  ;;  %v4164_v34 = vld [vmem:[#allocation7 + $0x540] sm:$0xf0] }
 0x18d   :  { %3169 = vmatpush.bf16.msrb.mxu1 %v4127_v17  ;;  %v3964_v17 = vld [vmem:[#allocation7 + $0x3b0] sm:$0xf0]  ;;  %v3567_v38 = vor.u32 %v5115_v28, %v3564_v29  ;;  %v3770_v29 = vld [vmem:[#allocation7 + $0x200] sm:$0xf]  ;;  %v5251_v44 = vld [vmem:[#allocation7 + $0x4a4] sm:$0xf0] }
 0x18e   :  { %3121 = vmatmul.bf16.vlgmr.msra.gmra.mxu1 %v5733_v58  ;;  %v3967_v31 = vor.u32 %v5215_v9, %v3964_v17  ;;  %v4204_v23 = vld [vmem:[#allocation7 + $0x590] sm:$0xf0]  ;;  %v4090_v7 = vld [vmem:[#allocation7 + $0x480] sm:$0xf] }
 0x18f   :  { %3134 = vmatpush.bf16.msrb.mxu2 %v4483_v48  ;;  %v4284_v48 = vld [vmem:[#allocation7 + $0x630] sm:$0xf0] }
 0x190   :  { %3148 = vmatpush.bf16.msra.mxu3 %v4803_v53  ;;  %3158 = vmatpush.bf16.msra.mxu0 %v3687_v55  ;;  %v5495_v53 = vld [vmem:[#allocation7 + $0xc4c] sm:$0xf]  ;;  %v2887_v55 = vadd.f32 %v2886_v37, %v648_v6  ;;  %v4287_v63 = vor.u32 %v5295_v46, %v4284_v48  ;;  %v5004_v28 = vld [vmem:[#allocation7 + $0xbd0] sm:$0xf0]  ;;  %v4484_v37 = vld [vmem:[#allocation7 + $0x7c0] sm:$0xf0] }
 0x191   :  { %3170 = vmatpush.bf16.msrb.mxu1 %v4087_v39  ;;  %v5105_v39 = vld [vmem:[#allocation7 + $0x1c] sm:$0xf]  ;;  %v5087_v4 = vor.u32 %v5495_v53, %v5084_v56  ;;  %v5261_v46 = vld [vmem:[#allocation7 + $0x4f4] sm:$0xf0]  ;;  %v4450_v48 = vld [vmem:[#allocation7 + $0x750] sm:$0xf]  ;;  %v4167_v56 = vor.u32 %v5265_v32, %v4164_v34 }
 0x192   :  { %3135 = vmatmul.bf16.vlgmr.msrb.gmra.mxu2 %v5741_v45  ;;  %v3527_v62 = vor.u32 %v5105_v39, %v3524_v42  ;;  %v4964_v39 = vld [vmem:[#allocation7 + $0xb80] sm:$0xf0]  ;;  %v4130_v42 = vld [vmem:[#allocation7 + $0x4d0] sm:$0xf]  ;;  %v5161_v53 = vld [vmem:[#allocation7 + $0x1d4] sm:$0xf0] }
 0x193   :  { %3183 = vmatpush.bf16.msra.mxu2 %v4447_v59  ;;  %3149 = vmatmul.bf16.vlgmr.msra.gmra.mxu3 %v5738_v25  ;;  %v5195_v59 = vld [vmem:[#allocation7 + $0x2ec] sm:$0xf]  ;;  %v2900_v61 = vpop.f32.mrf.mxu1 }
 0x194   :  { %3197 = vmatpush.bf16.msrb.mxu3 %v4767_v60  ;;  %3159 = vmatpush.bf16.msra.mxu0 %v3647_v11  ;;  %v3884_v60 = vld [vmem:[#allocation7 + $0x310] sm:$0xf0]  ;;  %v2901_v26 = vadd.f32 %v2900_v61, %v2887_v55  ;;  %v5485_v11 = vld [vmem:[#allocation7 + $0xbfc] sm:$0xf] }
 0x195   :  { %3171 = vmatpush.bf16.msrb.mxu1 %v4047_v2  ;;  %v4607_v2 = vor.u32 %v5375_v54, %v4604_v52  ;;  %v3887_v5 = vor.u32 %v5195_v59, %v3884_v60  ;;  %v2912_v6 = vpop.f32.mrf.mxu2  ;;  %v5047_v9 = vor.u32 %v5485_v11, %v5044_v47  ;;  %v5341_v54 = vld [vmem:[#allocation7 + $0x774] sm:$0xf0]  ;;  %v3730_v52 = vld [vmem:[#allocation7 + $0x1b0] sm:$0xf]  ;;  %v4487_v59 = vor.u32 %v5345_v35, %v4484_v37  ;;  %v4410_v11 = vld [vmem:[#allocation7 + $0x700] sm:$0xf] }
 0x196   :  { %v2913_v15 = vadd.f32 %v2912_v6, %v2899_v10  ;;  %v2926_v16 = vpop.f32.mrf.mxu3  ;;  %v5475_v10 = vld [vmem:[#allocation7 + $0xbac] sm:$0xf]  ;;  %v5331_v6 = vld [vmem:[#allocation7 + $0x724] sm:$0xf0]  ;;  %v3690_v47 = vld [vmem:[#allocation7 + $0x160] sm:$0xf] }
 0x197   :  { %3184 = vmatpush.bf16.msra.mxu2 %v4407_v12  ;;  %v5185_v12 = vld [vmem:[#allocation7 + $0x29c] sm:$0xf]  ;;  %v5007_v36 = vor.u32 %v5475_v10, %v5004_v28  ;;  %v4010_v35 = vld [vmem:[#allocation7 + $0x3e0] sm:$0xf] }
 0x198   :  { %3198 = vmatpush.bf16.msrb.mxu3 %v4727_v13  ;;  %3160 = vmatpush.bf16.msra.mxu0 %v3607_v24  ;;  %v3844_v13 = vld [vmem:[#allocation7 + $0x2c0] sm:$0xf0]  ;;  %v2927_v22 = vadd.f32 %v2926_v16, %v2913_v15  ;;  %v5355_v24 = vld [vmem:[#allocation7 + $0x7ec] sm:$0xf]  ;;  %v4927_v15 = vor.u32 %v5455_v51, %v4924_v3  ;;  %v4091_v16 = vor.u32 %v5251_v44, %v4090_v7  ;;  %v4330_v37 = vld [vmem:[#allocation7 + $0x660] sm:$0xf] }
 0x199   :  { %3172 = vmatpush.bf16.msrb.mxu1 %v4007_v49  ;;  %v5181_v49 = vld [vmem:[#allocation7 + $0x274] sm:$0xf0]  ;;  %v3847_v17 = vor.u32 %v5185_v12, %v3844_v13  ;;  %v5151_v12 = vld [vmem:[#allocation7 + $0x184] sm:$0xf0]  ;;  %v3930_v44 = vld [vmem:[#allocation7 + $0x340] sm:$0xf] }
 0x19a   :  { %v5421_v51 = vld [vmem:[#allocation7 + $0x9f4] sm:$0xf0] }
 0x19b   :  { %3185 = vmatpush.bf16.msra.mxu2 %v4367_v21  ;;  %v4524_v21 = vld [vmem:[#allocation7 + $0x810] sm:$0xf0] }
 0x19c   :  { %3199 = vmatpush.bf16.msrb.mxu3 %v4687_v27  ;;  %3161 = vmatpush.bf16.msra.mxu0 %v3567_v38  ;;  %v3811_v27 = vor.u32 %v5181_v49, %v3810_v18  ;;  %v4527_v20 = vor.u32 %v5355_v24, %v4524_v21  ;;  %v5465_v38 = vld [vmem:[#allocation7 + $0xb5c] sm:$0xf]  ;;  %v4884_v49 = vld [vmem:[#allocation7 + $0xae0] sm:$0xf0]  ;;  %v3650_v24 = vld [vmem:[#allocation7 + $0x110] sm:$0xf] }
 0x19d   :  { %3173 = vmatpush.bf16.msrb.mxu1 %v3967_v31  ;;  %v4207_v31 = vor.u32 %v5275_v0, %v4204_v23  ;;  %v5445_v18 = vld [vmem:[#allocation7 + $0xabc] sm:$0xf]  ;;  %v3691_v0 = vor.u32 %v5151_v12, %v3690_v47  ;;  %v5321_v23 = vld [vmem:[#allocation7 + $0x6d4] sm:$0xf0] }
 0x19e   :  { %v2928_v55 = vpop.f32.mrf.mxu3  ;;  %v5141_v21 = vld [vmem:[#allocation7 + $0x134] sm:$0xf0]  ;;  %v4887_v28 = vor.u32 %v5445_v18, %v4884_v49  ;;  %v3530_v49 = vld [vmem:[#allocation7 + $0x20] sm:$0xf] }
 0x19f   :  { %3186 = vmatpush.bf16.msra.mxu2 %v4327_v40  ;;  %v2914_v40 = vpop.f32.mrf.mxu2  ;;  %v3651_v34 = vor.u32 %v5141_v21, %v3650_v24  ;;  %v3890_v24 = vld [vmem:[#allocation7 + $0x2f0] sm:$0xf]  ;;  %v5201_v21 = vld [vmem:[#allocation7 + $0x314] sm:$0xf0] }
 0x1a0   :  { %3200 = vmatpush.bf16.msrb.mxu3 %v4647_v41  ;;  %3162 = vmatpush.bf16.msra.mxu0 %v3527_v62  ;;  %v3771_v41 = vor.u32 %v5171_v8, %v3770_v29  ;;  %v2940_v61 = vpop.f32.mrf.mxu0  ;;  %v3392_v62 = vperm.slane %v5781_v30, 3  ;;  %v5435_v8 = vld [vmem:[#allocation7 + $0xa6c] sm:$0xf] }
 0x1a1   :  { %3174 = vmatpush.bf16.msrb.mxu1 %v3927_v50  ;;  %v2915_v50 = vadd.f32 %v2914_v40, %v2901_v26  ;;  %v2941_v26 = vadd.f32 %v2940_v61, %v2927_v22  ;;  %v4050_v22 = vld [vmem:[#allocation7 + $0x430] sm:$0xf]  ;;  %v5131_v40 = vld [vmem:[#allocation7 + $0xe4] sm:$0xf0] }
 0x1a2   :  { %v4290_v61 = vld [vmem:[#allocation7 + $0x610] sm:$0xf] }
 0x1a3   :  { %3187 = vmatpush.bf16.msra.mxu2 %v4287_v63  ;;  %3163 = vmatmul.bf16.vlgmr.msra.gmra.mxu0 %v5727_v33  ;;  %v2929_v60 = vadd.f32 %v2928_v55, %v2915_v50  ;;  %v4967_v63 = vor.u32 %v5465_v38, %v4964_v39  ;;  %v3368_v13 = vmax.f32 %v2941_v26, 0.0  ;;  %v5311_v38 = vld [vmem:[#allocation7 + $0x684] sm:$0xf0]  ;;  %v3610_v39 = vld [vmem:[#allocation7 + $0xc0] sm:$0xf] }
 0x1a4   :  { %3201 = vmatpush.bf16.msrb.mxu3 %v4607_v2  ;;  %3211 = vmatpush.bf16.msrb.mxu0 %v5087_v4  ;;  %v4131_v2 = vor.u32 %v5261_v46, %v4130_v42  ;;  %v4451_v4 = vor.u32 %v5341_v54, %v4450_v48  ;;  %v5425_v50 = vld [vmem:[#allocation7 + $0xa1c] sm:$0xf]  ;;  %v4804_v54 = vld [vmem:[#allocation7 + $0xa40] sm:$0xf0]  ;;  %v4331_v55 = vor.u32 %v5311_v38, %v4330_v37  ;;  %v3570_v26 = vld [vmem:[#allocation7 + $0x70] sm:$0xf] }
 0x1a5   :  { %3175 = vmatpush.bf16.msrb.mxu1 %v3887_v5  ;;  %v3731_v5 = vor.u32 %v5161_v53, %v3730_v52  ;;  %v5491_v37 = vld [vmem:[#allocation7 + $0xc24] sm:$0xf0]  ;;  %v3850_v38 = vld [vmem:[#allocation7 + $0x2a0] sm:$0xf] }
 0x1a7   :  { %3188 = vmatpush.bf16.msra.mxu2 %v4247_v19  ;;  %v3412_v19 = vmul.f32 %v3392_v62, %v3368_v13  ;;  %v5291_v13 = vld [vmem:[#allocation7 + $0x5e4] sm:$0xf0] }
 0x1a8   :  { %3202 = vmatpush.bf16.msrb.mxu3 %v4567_v14  ;;  %3212 = vmatpush.bf16.msrb.mxu0 %v5047_v9  ;;  %v4411_v14 = vor.u32 %v5331_v6, %v4410_v11  ;;  %v5241_v9 = vld [vmem:[#allocation7 + $0x454] sm:$0xf0]  ;;  %v2942_v10 = vpop.f32.mrf.mxu0  ;;  %v5211_v11 = vld [vmem:[#allocation7 + $0x364] sm:$0xf0]  ;;  %v4250_v6 = vld [vmem:[#allocation7 + $0x5c0] sm:$0xf] }
 0x1a9   :  { %3176 = vmatpush.bf16.msrb.mxu1 %v3847_v17  ;;  %v4370_v17 = vld [vmem:[#allocation7 + $0x6b0] sm:$0xf]  ;;  %v4051_v29 = vor.u32 %v5241_v9, %v4050_v22  ;;  %v5501_v9 = vld [vmem:[#allocation7 + $0xc74] sm:$0xf0] }
 0x1aa   :  { %v4371_v32 = vor.u32 %v5321_v23, %v4370_v17  ;;  %v5090_v22 = vld [vmem:[#allocation7 + $0xc50] sm:$0xf]  ;;  %v4251_v17 = vor.u32 %v5291_v13, %v4250_v6  ;;  %v5381_v6 = vld [vmem:[#allocation7 + $0x8b4] sm:$0xf0] }
 0x1ab   :  { %3189 = vmatpush.bf16.msra.mxu2 %v4207_v31  ;;  %v4844_v31 = vld [vmem:[#allocation7 + $0xa90] sm:$0xf0]  ;;  %v2954_v52 = vpop.f32.mrf.mxu1 }
 0x1ac   :  { %3203 = vmatpush.bf16.msrb.mxu3 %v4527_v20  ;;  %3213 = vmatpush.bf16.msrb.mxu0 %v5007_v36  ;;  %v2943_v20 = vadd.f32 %v2942_v10, %v2929_v60  ;;  %v5231_v36 = vld [vmem:[#allocation7 + $0x404] sm:$0xf0]  ;;  %v4847_v46 = vor.u32 %v5435_v8, %v4844_v31  ;;  %v5221_v60 = vld [vmem:[#allocation7 + $0x3b4] sm:$0xf0]  ;;  %v4210_v10 = vld [vmem:[#allocation7 + $0x570] sm:$0xf] }
 0x1ad   :  { %3225 = vmatpush.bf16.msra.mxu1 %v3811_v27  ;;  %v5835_v27 = vadd.f32 %v5815_v43, %v3412_v19  ;;  %v4011_v48 = vor.u32 %v5231_v36, %v4010_v35  ;;  %v5111_v19 = vld [vmem:[#allocation7 + $0x44] sm:$0xf0]  ;;  %v5281_v8 = vld [vmem:[#allocation7 + $0x594] sm:$0xf0]  ;;  %v4690_v31 = vld [vmem:[#allocation7 + $0x930] sm:$0xf]  ;;  %v3891_v35 = vor.u32 %v5201_v21, %v3890_v24 }
 0x1ae   :  { %3177 = vmatmul.bf16.vlgmr.msrb.gmra.mxu1 %v5731_v57  ;;  %v3378_v43 = vmax.f32 %v2943_v20, 0.0  ;;  %v5401_v20 = vld [vmem:[#allocation7 + $0x954] sm:$0xf0]  ;;  %v5050_v36 = vld [vmem:[#allocation7 + $0xc00] sm:$0xf] }
 0x1af   :  { %3190 = vmatpush.bf16.msra.mxu2 %v4167_v56  ;;  %v3611_v56 = vor.u32 %v5131_v40, %v3610_v39  ;;  %v4211_v39 = vor.u32 %v5281_v8, %v4210_v10  ;;  %v4691_v40 = vor.u32 %v5401_v20, %v4690_v31  ;;  %v3732_v24 = vld [vmem:[#allocation7 + $0x1d8] sm:$0xf0]  ;;  %v5236_v21 = vld [vmem:[#allocation7 + $0x434] sm:$0xf]  ;;  %v5853_v31 = vld [vmem:[#allocation10] sm:$0xff] }
 0x1b0   :  { %3204 = vmatpush.bf16.msrb.mxu3 %v4487_v59  ;;  %3214 = vmatpush.bf16.msrb.mxu0 %v4967_v63  ;;  %v3422_v53 = vmul.f32 %v3392_v62, %v3378_v43  ;;  %v3970_v59 = vld [vmem:[#allocation7 + $0x390] sm:$0xf]  ;;  %v5301_v63 = vld [vmem:[#allocation7 + $0x634] sm:$0xf0]  ;;  %v5191_v43 = vld [vmem:[#allocation7 + $0x2c4] sm:$0xf0] }
 0x1b1   :  { %3226 = vmatpush.bf16.msra.mxu1 %v3771_v41  ;;  %v5837_v41 = vld [vmem:[#allocation8] sm:$0xff]  ;;  %v3971_v30 = vor.u32 %v5221_v60, %v3970_v59  ;;  %v4291_v62 = vor.u32 %v5301_v63, %v4290_v61  ;;  %v3812_v59 = vld [vmem:[#allocation7 + $0x278] sm:$0xf0]  ;;  %v5256_v60 = vld [vmem:[#allocation7 + $0x4d4] sm:$0xf]  ;;  %v3393_v20 = vperm.slane %v5853_v31, 4 }
 0x1b2   :  { %3191 = vmatmul.bf16.vlgmr.msra.gmra.mxu2 %v5733_v58  ;;  %v649_v42 = vperm.slane %v5837_v41, 4  ;;  %v5843_v3 = vadd.f32 %v5824_v1, %v3422_v53  ;;  %v4730_v1 = vld [vmem:[#allocation7 + $0x980] sm:$0xf]  ;;  %v5176_v53 = vld [vmem:[#allocation7 + $0x254] sm:$0xf] }
 0x1b3   :  { %3239 = vmatpush.bf16.msrb.mxu2 %v4131_v2  ;;  %3205 = vmatmul.bf16.vlgmr.msrb.gmra.mxu3 %v5741_v45  ;;  %v4770_v2 = vld [vmem:[#allocation7 + $0x9d0] sm:$0xf]  ;;  %v4132_v61 = vld [vmem:[#allocation7 + $0x4f8] sm:$0xf0] }
 0x1b4   :  { %3253 = vmatpush.bf16.msra.mxu3 %v4451_v4  ;;  %3215 = vmatpush.bf16.msrb.mxu0 %v4927_v15  ;;  %v5121_v4 = vld [vmem:[#allocation7 + $0x94] sm:$0xf0]  ;;  %v4771_v7 = vor.u32 %v5421_v51, %v4770_v2  ;;  %v2955_v47 = vadd.f32 %v2954_v52, %v649_v42  ;;  %v5411_v15 = vld [vmem:[#allocation7 + $0x9a4] sm:$0xf0]  ;;  %v3851_v2 = vor.u32 %v5191_v43, %v3850_v38  ;;  %v5010_v51 = vld [vmem:[#allocation7 + $0xbb0] sm:$0xf] }
 0x1b5   :  { %3227 = vmatpush.bf16.msra.mxu1 %v3731_v5  ;;  %v4807_v5 = vor.u32 %v5425_v50, %v4804_v54  ;;  %v3571_v12 = vor.u32 %v5121_v4, %v3570_v26  ;;  %v4731_v23 = vor.u32 %v5411_v15, %v4730_v1  ;;  %v4650_v54 = vld [vmem:[#allocation7 + $0x8e0] sm:$0xf]  ;;  %v5391_v52 = vld [vmem:[#allocation7 + $0x904] sm:$0xf0]  ;;  %v5481_v26 = vld [vmem:[#allocation7 + $0xbd4] sm:$0xf0] }
 0x1b6   :  { %v2982_v18 = vpop.f32.mrf.mxu3  ;;  %v5011_v13 = vor.u32 %v5481_v26, %v5010_v51  ;;  %v3772_v1 = vld [vmem:[#allocation7 + $0x228] sm:$0xf0]  ;;  %v5246_v15 = vld [vmem:[#allocation7 + $0x484] sm:$0xf]  ;;  %v4052_v10 = vld [vmem:[#allocation7 + $0x458] sm:$0xf0] }
 0x1b7   :  { %3240 = vmatpush.bf16.msrb.mxu2 %v4091_v16  ;;  %v2968_v16 = vpop.f32.mrf.mxu2  ;;  %v4530_v38 = vld [vmem:[#allocation7 + $0x7f0] sm:$0xf]  ;;  %v5136_v51 = vld [vmem:[#allocation7 + $0x114] sm:$0xf]  ;;  %v3652_v26 = vld [vmem:[#allocation7 + $0x138] sm:$0xf0] }
 0x1b8   :  { %3254 = vmatpush.bf16.msra.mxu3 %v4411_v14  ;;  %3216 = vmatpush.bf16.msrb.mxu0 %v4887_v28  ;;  %v2969_v14 = vadd.f32 %v2968_v16, %v2955_v47  ;;  %v5166_v47 = vld [vmem:[#allocation7 + $0x204] sm:$0xf]  ;;  %v4092_v16 = vld [vmem:[#allocation7 + $0x4a8] sm:$0xf0] }
 0x1b9   :  { %3228 = vmatpush.bf16.msra.mxu1 %v3691_v0  ;;  %v3931_v0 = vor.u32 %v5211_v11, %v3930_v44  ;;  %v4135_v44 = vor.u32 %v5256_v60, %v4132_v61  ;;  %v4610_v11 = vld [vmem:[#allocation7 + $0x890] sm:$0xf] }
 0x1ba   :  { %v2983_v28 = vadd.f32 %v2982_v18, %v2969_v14  ;;  %v4970_v18 = vld [vmem:[#allocation7 + $0xb60] sm:$0xf]  ;;  %v3775_v14 = vor.u32 %v5166_v47, %v3772_v1  ;;  %v3655_v1 = vor.u32 %v5136_v51, %v3652_v26  ;;  %v4332_v26 = vld [vmem:[#allocation7 + $0x688] sm:$0xf0] }
 0x1bb   :  { %3241 = vmatpush.bf16.msrb.mxu2 %v4051_v29  ;;  %v3531_v29 = vor.u32 %v5111_v19, %v3530_v49  ;;  %v5471_v49 = vld [vmem:[#allocation7 + $0xb84] sm:$0xf0]  ;;  %v4611_v19 = vor.u32 %v5381_v6, %v4610_v11  ;;  %v5441_v11 = vld [vmem:[#allocation7 + $0xa94] sm:$0xf0] }
 0x1bc   :  { %3255 = vmatpush.bf16.msra.mxu3 %v4371_v32  ;;  %3217 = vmatpush.bf16.msrb.mxu0 %v4847_v46  ;;  %v2956_v32 = vpop.f32.mrf.mxu1  ;;  %v4170_v46 = vld [vmem:[#allocation7 + $0x520] sm:$0xf] }
 0x1bd   :  { %3229 = vmatpush.bf16.msra.mxu1 %v3651_v34  ;;  %v5091_v34 = vor.u32 %v5501_v9, %v5090_v22  ;;  %v2957_v50 = vadd.f32 %v2956_v32, %v649_v42  ;;  %v4651_v42 = vor.u32 %v5391_v52, %v4650_v54  ;;  %v4570_v22 = vld [vmem:[#allocation7 + $0x840] sm:$0xf]  ;;  %v5371_v9 = vld [vmem:[#allocation7 + $0x864] sm:$0xf0]  ;;  %v4012_v54 = vld [vmem:[#allocation7 + $0x408] sm:$0xf0] }
 0x1be   :  { %v2984_v4 = vpop.f32.mrf.mxu3  ;;  %v4571_v32 = vor.u32 %v5371_v9, %v4570_v22  ;;  %v4412_v22 = vld [vmem:[#allocation7 + $0x728] sm:$0xf0] }
 0x1bf   :  { %3242 = vmatpush.bf16.msrb.mxu2 %v4011_v48  ;;  %v5271_v48 = vld [vmem:[#allocation7 + $0x544] sm:$0xf0] }
 0x1c0   :  { %3256 = vmatpush.bf16.msra.mxu3 %v4331_v55  ;;  %3218 = vmatpush.bf16.msrb.mxu0 %v4807_v5  ;;  %v2970_v55 = vpop.f32.mrf.mxu2  ;;  %v4171_v5 = vor.u32 %v5271_v48, %v4170_v46  ;;  %v3692_v48 = vld [vmem:[#allocation7 + $0x188] sm:$0xf0] }
 0x1c1   :  { %3230 = vmatpush.bf16.msra.mxu1 %v3611_v56  ;;  %v5051_v56 = vor.u32 %v5491_v37, %v5050_v36  ;;  %v2971_v63 = vadd.f32 %v2970_v55, %v2957_v50  ;;  %v4055_v37 = vor.u32 %v5236_v21, %v4052_v10  ;;  %v5226_v50 = vld [vmem:[#allocation7 + $0x3e4] sm:$0xf]  ;;  %v5451_v55 = vld [vmem:[#allocation7 + $0xae4] sm:$0xf0] }
 0x1c3   :  { %3243 = vmatpush.bf16.msrb.mxu2 %v3971_v30  ;;  %3219 = vmatmul.bf16.vlgmr.msrb.gmra.mxu0 %v5738_v25  ;;  %v2985_v30 = vadd.f32 %v2984_v4, %v2971_v63  ;;  %v4015_v63 = vor.u32 %v5226_v50, %v4012_v54  ;;  %v4372_v50 = vld [vmem:[#allocation7 + $0x6d8] sm:$0xf0]  ;;  %v5406_v54 = vld [vmem:[#allocation7 + $0x984] sm:$0xf] }
 0x1c4   :  { %3257 = vmatpush.bf16.msra.mxu3 %v4291_v62  ;;  %3267 = vmatpush.bf16.msra.mxu0 %v4771_v7  ;;  %v2996_v62 = vpop.f32.mrf.mxu0  ;;  %v3815_v7 = vor.u32 %v5176_v53, %v3812_v59  ;;  %v4890_v53 = vld [vmem:[#allocation7 + $0xac0] sm:$0xf] }
 0x1c5   :  { %3231 = vmatpush.bf16.msra.mxu1 %v3571_v12  ;;  %v2997_v12 = vadd.f32 %v2996_v62, %v2983_v28  ;;  %v4930_v28 = vld [vmem:[#allocation7 + $0xb10] sm:$0xf]  ;;  %v4490_v59 = vld [vmem:[#allocation7 + $0x7a0] sm:$0xf]  ;;  %v4891_v4 = vor.u32 %v5451_v55, %v4890_v53 }
 0x1c7   :  { %3244 = vmatpush.bf16.msrb.mxu2 %v3931_v0  ;;  %v4095_v0 = vor.u32 %v5246_v15, %v4092_v16  ;;  %v5126_v16 = vld [vmem:[#allocation7 + $0xc4] sm:$0xf] }
 0x1c8   :  { %3258 = vmatpush.bf16.msra.mxu3 %v4251_v17  ;;  %3268 = vmatpush.bf16.msra.mxu0 %v4731_v23  ;;  %v5156_v17 = vld [vmem:[#allocation7 + $0x1b4] sm:$0xf]  ;;  %v4971_v23 = vor.u32 %v5471_v49, %v4970_v18  ;;  %v3612_v18 = vld [vmem:[#allocation7 + $0xe8] sm:$0xf0]  ;;  %v5206_v49 = vld [vmem:[#allocation7 + $0x344] sm:$0xf] }
 0x1c9   :  { %3232 = vmatpush.bf16.msra.mxu1 %v3531_v29  ;;  %v5461_v29 = vld [vmem:[#allocation7 + $0xb34] sm:$0xf0]  ;;  %v3735_v36 = vor.u32 %v5156_v17, %v3732_v24  ;;  %v5431_v24 = vld [vmem:[#allocation7 + $0xa44] sm:$0xf0] }
 0x1ca   :  { %v4931_v46 = vor.u32 %v5461_v29, %v4930_v28  ;;  %v5416_v28 = vld [vmem:[#allocation7 + $0x9d4] sm:$0xf]  ;;  %v4772_v29 = vld [vmem:[#allocation7 + $0x9f8] sm:$0xf0] }
 0x1cb   :  { %3245 = vmatpush.bf16.msrb.mxu2 %v3891_v35  ;;  %v3010_v8 = vpop.f32.mrf.mxu1 }
 0x1cc   :  { %3259 = vmatpush.bf16.msra.mxu3 %v4211_v39  ;;  %3269 = vmatpush.bf16.msra.mxu0 %v4691_v40  ;;  %v2998_v35 = vpop.f32.mrf.mxu0  ;;  %v5361_v39 = vld [vmem:[#allocation7 + $0x814] sm:$0xf0]  ;;  %v5146_v40 = vld [vmem:[#allocation7 + $0x164] sm:$0xf] }
 0x1cd   :  { %3281 = vmatpush.bf16.msrb.mxu1 %v5091_v34  ;;  %v3011_v34 = vadd.f32 %v3010_v8, %v2997_v12  ;;  %v2999_v43 = vadd.f32 %v2998_v35, %v2985_v30  ;;  %v3695_v61 = vor.u32 %v5146_v40, %v3692_v48  ;;  %v5336_v30 = vld [vmem:[#allocation7 + $0x754] sm:$0xf]  ;;  %v650_v12 = vperm.slane %v5837_v41, 5 }
 0x1ce   :  { %3233 = vmatmul.bf16.vlgmr.msra.gmra.mxu1 %v5727_v33  ;;  %v5116_v35 = vld [vmem:[#allocation7 + $0x74] sm:$0xf]  ;;  %v4775_v48 = vor.u32 %v5416_v28, %v4772_v29  ;;  %v4612_v29 = vld [vmem:[#allocation7 + $0x8b8] sm:$0xf0] }
 0x1cf   :  { %3246 = vmatpush.bf16.msrb.mxu2 %v3851_v2  ;;  %v3369_v52 = vmax.f32 %v3011_v34, 0.0  ;;  %v5351_v2 = vld [vmem:[#allocation7 + $0x7c4] sm:$0xf0]  ;;  %v5196_v40 = vld [vmem:[#allocation7 + $0x2f4] sm:$0xf] }
 0x1d0   :  { %3260 = vmatpush.bf16.msra.mxu3 %v4171_v5  ;;  %3270 = vmatpush.bf16.msra.mxu0 %v4651_v42  ;;  %v5216_v5 = vld [vmem:[#allocation7 + $0x394] sm:$0xf]  ;;  %v3972_v42 = vld [vmem:[#allocation7 + $0x3b8] sm:$0xf0]  ;;  %v4491_v47 = vor.u32 %v5351_v2, %v4490_v59  ;;  %v3532_v59 = vld [vmem:[#allocation7 + $0x48] sm:$0xf0] }
 0x1d1   :  { %3282 = vmatpush.bf16.msrb.mxu1 %v5051_v56  ;;  %v4531_v56 = vor.u32 %v5361_v39, %v4530_v38  ;;  %v3413_v60 = vmul.f32 %v3393_v20, %v3369_v52  ;;  %v3975_v15 = vor.u32 %v5216_v5, %v3972_v42  ;;  %v3572_v39 = vld [vmem:[#allocation7 + $0x98] sm:$0xf0]  ;;  %v4732_v52 = vld [vmem:[#allocation7 + $0x9a8] sm:$0xf0]  ;;  %v5376_v28 = vld [vmem:[#allocation7 + $0x894] sm:$0xf] }
 0x1d2   :  { %3247 = vmatmul.bf16.vlgmr.msrb.gmra.mxu2 %v5731_v57  ;;  %v3575_v53 = vor.u32 %v5116_v35, %v3572_v39  ;;  %v4735_v51 = vor.u32 %v5406_v54, %v4732_v52  ;;  %v5092_v5 = vld [vmem:[#allocation7 + $0xc78] sm:$0xf0]  ;;  %v4615_v39 = vor.u32 %v5376_v28, %v4612_v29  ;;  %v5266_v54 = vld [vmem:[#allocation7 + $0x524] sm:$0xf] }
 0x1d3   :  { %3295 = vmatpush.bf16.msra.mxu2 %v3815_v7  ;;  %3261 = vmatmul.bf16.vlgmr.msra.gmra.mxu3 %v5733_v58  ;;  %v5859_v62 = vadd.f32 %v5835_v27, %v3413_v60  ;;  %v4452_v7 = vld [vmem:[#allocation7 + $0x778] sm:$0xf0]  ;;  %v3012_v6 = vpop.f32.mrf.mxu1 }
 0x1d4   :  { %3309 = vmatpush.bf16.msrb.mxu3 %v4135_v44  ;;  %3271 = vmatpush.bf16.msra.mxu0 %v4611_v19  ;;  %v4850_v44 = vld [vmem:[#allocation7 + $0xa70] sm:$0xf]  ;;  %v4455_v19 = vor.u32 %v5336_v30, %v4452_v7  ;;  %v5396_v30 = vld [vmem:[#allocation7 + $0x934] sm:$0xf]  ;;  %v4692_v7 = vld [vmem:[#allocation7 + $0x958] sm:$0xf0] }
 0x1d5   :  { %3283 = vmatpush.bf16.msrb.mxu1 %v5011_v13  ;;  %v3013_v13 = vadd.f32 %v3012_v6, %v2999_v43  ;;  %v4851_v27 = vor.u32 %v5441_v11, %v4850_v44  ;;  %v3024_v17 = vpop.f32.mrf.mxu2  ;;  %v3892_v43 = vld [vmem:[#allocation7 + $0x318] sm:$0xf0] }
 0x1d6   :  { %v3025_v21 = vadd.f32 %v3024_v17, %v650_v12  ;;  %v3038_v10 = vpop.f32.mrf.mxu3  ;;  %v3895_v55 = vor.u32 %v5196_v40, %v3892_v43  ;;  %v5286_v17 = vld [vmem:[#allocation7 + $0x5c4] sm:$0xf]  ;;  %v4212_v40 = vld [vmem:[#allocation7 + $0x598] sm:$0xf0] }
 0x1d7   :  { %3296 = vmatpush.bf16.msra.mxu2 %v3775_v14  ;;  %v3932_v14 = vld [vmem:[#allocation7 + $0x368] sm:$0xf0]  ;;  %v3379_v9 = vmax.f32 %v3013_v13, 0.0  ;;  %v5466_v43 = vld [vmem:[#allocation7 + $0xb64] sm:$0xf] }
 0x1d8   :  { %3310 = vmatpush.bf16.msrb.mxu3 %v4095_v0  ;;  %3272 = vmatpush.bf16.msra.mxu0 %v4571_v32  ;;  %v5326_v0 = vld [vmem:[#allocation7 + $0x704] sm:$0xf]  ;;  %v3615_v32 = vor.u32 %v5126_v16, %v3612_v18  ;;  %v3935_v34 = vor.u32 %v5206_v49, %v3932_v14  ;;  %v5296_v16 = vld [vmem:[#allocation7 + $0x614] sm:$0xf]  ;;  %v4695_v49 = vor.u32 %v5396_v30, %v4692_v7 }
 0x1d9   :  { %3284 = vmatpush.bf16.msrb.mxu1 %v4971_v23  ;;  %v4810_v23 = vld [vmem:[#allocation7 + $0xa20] sm:$0xf]  ;;  %v3423_v8 = vmul.f32 %v3393_v20, %v3379_v9  ;;  %v5316_v20 = vld [vmem:[#allocation7 + $0x6b4] sm:$0xf]  ;;  %v5386_v14 = vld [vmem:[#allocation7 + $0x8e4] sm:$0xf] }
 0x1da   :  { %v4811_v38 = vor.u32 %v5431_v24, %v4810_v23  ;;  %v4375_v60 = vor.u32 %v5316_v20, %v4372_v50  ;;  %v4252_v24 = vld [vmem:[#allocation7 + $0x5e8] sm:$0xf0]  ;;  %v5366_v20 = vld [vmem:[#allocation7 + $0x844] sm:$0xf] }
 0x1db   :  { %3297 = vmatpush.bf16.msra.mxu2 %v3735_v36  ;;  %v3039_v36 = vadd.f32 %v3038_v10, %v3025_v21  ;;  %v5476_v21 = vld [vmem:[#allocation7 + $0xbb4] sm:$0xf]  ;;  %v5012_v10 = vld [vmem:[#allocation7 + $0xbd8] sm:$0xf0]  ;;  %v4255_v35 = vor.u32 %v5286_v17, %v4252_v24 }
 0x1dc   :  { %3311 = vmatpush.bf16.msrb.mxu3 %v4055_v37  ;;  %3273 = vmatpush.bf16.msra.mxu0 %v4531_v56  ;;  %v4415_v37 = vor.u32 %v5326_v0, %v4412_v22  ;;  %v5106_v56 = vld [vmem:[#allocation7 + $0x24] sm:$0xf]  ;;  %v4652_v0 = vld [vmem:[#allocation7 + $0x908] sm:$0xf0] }
 0x1dd   :  { %3285 = vmatpush.bf16.msrb.mxu1 %v4931_v46  ;;  %v5867_v46 = vadd.f32 %v5843_v3, %v3423_v8  ;;  %v5306_v3 = vld [vmem:[#allocation7 + $0x664] sm:$0xf]  ;;  %v3026_v2 = vpop.f32.mrf.mxu2  ;;  %v3535_v11 = vor.u32 %v5106_v56, %v3532_v59  ;;  %v4655_v23 = vor.u32 %v5386_v14, %v4652_v0  ;;  %v4932_v56 = vld [vmem:[#allocation7 + $0xb38] sm:$0xf0]  ;;  %v5356_v59 = vld [vmem:[#allocation7 + $0x7f4] sm:$0xf] }
 0x1de   :  { %v3027_v42 = vadd.f32 %v3026_v2, %v650_v12  ;;  %v3040_v44 = vpop.f32.mrf.mxu3  ;;  %v5486_v12 = vld [vmem:[#allocation7 + $0xc04] sm:$0xf] }
 0x1df   :  { %3298 = vmatpush.bf16.msra.mxu2 %v3695_v61  ;;  %v5186_v61 = vld [vmem:[#allocation7 + $0x2a4] sm:$0xf] }
 0x1e0   :  { %3312 = vmatpush.bf16.msrb.mxu3 %v4015_v63  ;;  %3274 = vmatpush.bf16.msra.mxu0 %v4491_v47  ;;  %v3852_v63 = vld [vmem:[#allocation7 + $0x2c8] sm:$0xf0]  ;;  %v3041_v47 = vadd.f32 %v3040_v44, %v3027_v42  ;;  %v3052_v13 = vpop.f32.mrf.mxu0  ;;  %v3394_v44 = vperm.slane %v5853_v31, 5 }
 0x1e1   :  { %3286 = vmatpush.bf16.msrb.mxu1 %v4891_v4  ;;  %v5496_v4 = vld [vmem:[#allocation7 + $0xc54] sm:$0xf]  ;;  %v3855_v6 = vor.u32 %v5186_v61, %v3852_v63  ;;  %v3053_v18 = vadd.f32 %v3052_v13, %v3039_v36  ;;  %v5015_v36 = vor.u32 %v5476_v21, %v5012_v10  ;;  %v4492_v42 = vld [vmem:[#allocation7 + $0x7c8] sm:$0xf0]  ;;  %v4852_v13 = vld [vmem:[#allocation7 + $0xa98] sm:$0xf0] }
 0x1e3   :  { %3299 = vmatpush.bf16.msra.mxu2 %v3655_v1  ;;  %3275 = vmatmul.bf16.vlgmr.msra.gmra.mxu0 %v5741_v45  ;;  %v4335_v1 = vor.u32 %v5306_v3, %v4332_v26  ;;  %v5446_v26 = vld [vmem:[#allocation7 + $0xac4] sm:$0xf] }
 0x1e4   :  { %3313 = vmatpush.bf16.msrb.mxu3 %v3975_v15  ;;  %3323 = vmatpush.bf16.msrb.mxu0 %v4455_v19  ;;  %v5095_v15 = vor.u32 %v5496_v4, %v5092_v5  ;;  %v4292_v19 = vld [vmem:[#allocation7 + $0x638] sm:$0xf0]  ;;  %v4892_v4 = vld [vmem:[#allocation7 + $0xae8] sm:$0xf0]  ;;  %v5346_v5 = vld [vmem:[#allocation7 + $0x7a4] sm:$0xf] }
 0x1e5   :  { %3287 = vmatpush.bf16.msrb.mxu1 %v4851_v27  ;;  %v5052_v27 = vld [vmem:[#allocation7 + $0xc28] sm:$0xf0]  ;;  %v4295_v22 = vor.u32 %v5296_v16, %v4292_v19 }
 0x1e6   :  { %v5055_v9 = vor.u32 %v5486_v12, %v5052_v27 }
 0x1e7   :  { %3300 = vmatpush.bf16.msra.mxu2 %v3615_v32 }
 0x1e8   :  { %3314 = vmatpush.bf16.msrb.mxu3 %v3935_v34  ;;  %3324 = vmatpush.bf16.msrb.mxu0 %v4415_v37  ;;  %v3054_v34 = vpop.f32.mrf.mxu0  ;;  %v5276_v37 = vld [vmem:[#allocation7 + $0x574] sm:$0xf] }
 0x1e9   :  { %3288 = vmatpush.bf16.msrb.mxu1 %v4811_v38  ;;  %v3055_v38 = vadd.f32 %v3054_v34, %v3041_v47  ;;  %v5436_v47 = vld [vmem:[#allocation7 + $0xa74] sm:$0xf] }
 0x1ea   :  { %v4855_v16 = vor.u32 %v5436_v47, %v4852_v13 }
 0x1eb   :  { %3301 = vmatpush.bf16.msra.mxu2 %v3575_v53  ;;  %v3066_v8 = vpop.f32.mrf.mxu1  ;;  %v4172_v53 = vld [vmem:[#allocation7 + $0x548] sm:$0xf0] }
 0x1ec   :  { %3315 = vmatpush.bf16.msrb.mxu3 %v3895_v55  ;;  %3325 = vmatpush.bf16.msrb.mxu0 %v4375_v60  ;;  %v3067_v32 = vadd.f32 %v3066_v8, %v3053_v18  ;;  %v5456_v55 = vld [vmem:[#allocation7 + $0xb14] sm:$0xf]  ;;  %v4532_v60 = vld [vmem:[#allocation7 + $0x818] sm:$0xf0]  ;;  %v4175_v3 = vor.u32 %v5266_v54, %v4172_v53  ;;  %v5426_v18 = vld [vmem:[#allocation7 + $0xa24] sm:$0xf] }
 0x1ed   :  { %3337 = vmatpush.bf16.msra.mxu1 %v4775_v48  ;;  %v4972_v48 = vld [vmem:[#allocation7 + $0xb88] sm:$0xf0]  ;;  %v4935_v2 = vor.u32 %v5456_v55, %v4932_v56  ;;  %v652_v54 = vperm.slane %v5837_v41, 7 }
 0x1ee   :  { %3289 = vmatmul.bf16.vlgmr.msrb.gmra.mxu1 %v5738_v25  ;;  %v4975_v50 = vor.u32 %v5466_v43, %v4972_v48 }
 0x1ef   :  { %3302 = vmatpush.bf16.msra.mxu2 %v3535_v11  ;;  %v4895_v11 = vor.u32 %v5446_v26, %v4892_v4 }
 0x1f0   :  { %3316 = vmatpush.bf16.msrb.mxu3 %v3855_v6  ;;  %3326 = vmatpush.bf16.msrb.mxu0 %v4335_v1  ;;  %v4495_v6 = vor.u32 %v5346_v5, %v4492_v42 }
 0x1f1   :  { %3338 = vmatpush.bf16.msra.mxu1 %v4735_v51  ;;  %v4535_v51 = vor.u32 %v5356_v59, %v4532_v60 }
 0x1f2   :  { %3303 = vmatmul.bf16.vlgmr.msra.gmra.mxu2 %v5727_v33  ;;  %v4572_v33 = vld [vmem:[#allocation7 + $0x868] sm:$0xf0] }
 0x1f3   :  { %3351 = vmatpush.bf16.msrb.mxu2 %v5095_v15  ;;  %3317 = vmatmul.bf16.vlgmr.msrb.gmra.mxu3 %v5731_v57  ;;  %v4215_v57 = vor.u32 %v5276_v37, %v4212_v40  ;;  %v4575_v52 = vor.u32 %v5366_v20, %v4572_v33  ;;  %v3068_v61 = vpop.f32.mrf.mxu1  ;;  %v651_v33 = vperm.slane %v5837_v41, 6 }
 0x1f4   :  { %3327 = vmatpush.bf16.msrb.mxu0 %v4295_v22  ;;  %v3069_v63 = vadd.f32 %v3068_v61, %v3055_v38 }
 0x1f5   :  { %3339 = vmatpush.bf16.msra.mxu1 %v4695_v49  ;;  %v3080_v30 = vpop.f32.mrf.mxu2  ;;  %v4812_v49 = vld [vmem:[#allocation7 + $0xa48] sm:$0xf0] }
 0x1f6   :  { %v3081_v7 = vadd.f32 %v3080_v30, %v3067_v32  ;;  %v4815_v14 = vor.u32 %v5426_v18, %v4812_v49 }
 0x1f7   :  { %3352 = vmatpush.bf16.msrb.mxu2 %v5055_v9  ;;  %v3094_v9 = vpop.f32.mrf.mxu3 }
 0x1f8   :  { %3328 = vmatpush.bf16.msrb.mxu0 %v4255_v35  ;;  %v3370_v1 = vmax.f32 %v3081_v7, 0.0  ;;  %v3095_v55 = vadd.f32 %v3094_v9, %v651_v33 }
 0x1f9   :  { %3340 = vmatpush.bf16.msra.mxu1 %v4655_v23 }
 0x1fa   :  { %v3414_v15 = vmul.f32 %v3394_v44, %v3370_v1 }
 0x1fb   :  { %3353 = vmatpush.bf16.msrb.mxu2 %v5015_v36 }
 0x1fc   :  { %3329 = vmatpush.bf16.msrb.mxu0 %v4215_v57  ;;  %v5878_v19 = vadd.f32 %v5859_v62, %v3414_v15 }
 0x1fd   :  { %3341 = vmatpush.bf16.msra.mxu1 %v4615_v39  ;;  %v3082_v12 = vpop.f32.mrf.mxu2 }
 0x1fe   :  { %v3083_v27 = vadd.f32 %v3082_v12, %v3069_v63 }
 0x1ff   :  { %3354 = vmatpush.bf16.msrb.mxu2 %v4975_v50  ;;  %v3096_v62 = vpop.f32.mrf.mxu3 }
 0x200   :  { %3330 = vmatpush.bf16.msrb.mxu0 %v4175_v3  ;;  %v3380_v0 = vmax.f32 %v3083_v27, 0.0  ;;  %v3108_v17 = vpop.f32.mrf.mxu0  ;;  %v3097_v30 = vadd.f32 %v3096_v62, %v651_v33 }
 0x201   :  { %3342 = vmatpush.bf16.msra.mxu1 %v4575_v52  ;;  %v642_v52 = vld [vmem:[#allocation8 + $0x8] sm:$0x3]  ;;  %v3109_v59 = vadd.f32 %v3108_v17, %v3095_v55 }
 0x202   :  { %v3424_v22 = vmul.f32 %v3394_v44, %v3380_v0  ;;  %v653_v56 = vperm.slane %v642_v52, 0  ;;  %v654_v44 = vperm.slane %v642_v52, 1  ;;  %v3395_v0 = vperm.slane %v5853_v31, 6 }
 0x203   :  { %3355 = vmatpush.bf16.msrb.mxu2 %v4935_v2  ;;  %3331 = vmatmul.bf16.vlgmr.msrb.gmra.mxu0 %v5733_v58 }
 0x204   :  { %v5882_v58 = vadd.f32 %v5867_v46, %v3424_v22 }
 0x205   :  { %3343 = vmatpush.bf16.msra.mxu1 %v4535_v51 }
 0x207   :  { %3356 = vmatpush.bf16.msrb.mxu2 %v4895_v11 }
 0x208   :  { %v3110_v21 = vpop.f32.mrf.mxu0 }
 0x209   :  { %3344 = vmatpush.bf16.msra.mxu1 %v4495_v6  ;;  %v3111_v11 = vadd.f32 %v3110_v21, %v3097_v30 }
 0x20b   :  { %3357 = vmatpush.bf16.msrb.mxu2 %v4855_v16  ;;  %v3122_v23 = vpop.f32.mrf.mxu1 }
 0x20c   :  { %3345 = vmatmul.bf16.vlgmr.msra.gmra.mxu1 %v5741_v45  ;;  %v3123_v61 = vadd.f32 %v3122_v23, %v3109_v59 }
 0x20f   :  { %3358 = vmatpush.bf16.msrb.mxu2 %v4815_v14 }
 0x212   :  { %3359 = vmatmul.bf16.vlgmr.msrb.gmra.mxu2 %v5738_v25 }
 0x213   :  { %v3124_v10 = vpop.f32.mrf.mxu1 }
 0x214   :  { %v3125_v1 = vadd.f32 %v3124_v10, %v3111_v11 }
 0x215   :  { %v3136_v24 = vpop.f32.mrf.mxu2 }
 0x216   :  { %v3150_v28 = vpop.f32.mrf.mxu3  ;;  %v3137_v26 = vadd.f32 %v3136_v24, %v3123_v61 }
 0x218   :  { %v3151_v41 = vadd.f32 %v3150_v28, %v3137_v26  ;;  %v3396_v28 = vperm.slane %v5853_v31, 7 }
 0x21a   :  { %v3371_v14 = vmax.f32 %v3151_v41, 0.0 }
 0x21d   :  { %v3138_v29 = vpop.f32.mrf.mxu2 }
 0x21e   :  { %v3152_v34 = vpop.f32.mrf.mxu3  ;;  %v3139_v22 = vadd.f32 %v3138_v29, %v3125_v1  ;;  %v5511_v1 = vld [vmem:[#allocation2] ss:$0 sm:$0xff] }
 0x220   :  { %v3164_v8 = vpop.f32.mrf.mxu0 }
 0x221   :  { %v3165_v60 = vadd.f32 %v3164_v8, %v652_v54  ;;  %v3386_v8 = vld [vmem:[#allocation10 + $0x8] sm:$0x3] }
 0x222   :  { %v3398_v55 = vperm.slane %v3386_v8, 1 }
 0x228   :  { %v3166_v35 = vpop.f32.mrf.mxu0 }
 0x229   :  { %v3167_v6 = vadd.f32 %v3166_v35, %v652_v54  ;;  %v3153_v35 = vadd.f32 %v3152_v34, %v3139_v22 }
 0x22b   :  { %v3178_v45 = vpop.f32.mrf.mxu1 }
 0x22c   :  { %v3179_v63 = vadd.f32 %v3178_v45, %v3165_v60 }
 0x233   :  { %v3180_v36 = vpop.f32.mrf.mxu1 }
 0x234   :  { %v3181_v15 = vadd.f32 %v3180_v36, %v3167_v6 }
 0x235   :  { %v3192_v32 = vpop.f32.mrf.mxu2 }
 0x236   :  { %v3206_v37 = vpop.f32.mrf.mxu3  ;;  %v3193_v4 = vadd.f32 %v3192_v32, %v3179_v63  ;;  %v3415_v32 = vmul.f32 %v3395_v0, %v3371_v14 }
 0x238   :  { %v3207_v47 = vadd.f32 %v3206_v37, %v3193_v4 }
 0x23d   :  { %v3194_v46 = vpop.f32.mrf.mxu2 }
 0x23e   :  { %v3208_v40 = vpop.f32.mrf.mxu3  ;;  %v3195_v9 = vadd.f32 %v3194_v46, %v3181_v15 }
 0x240   :  { %v3220_v38 = vpop.f32.mrf.mxu0  ;;  %v3209_v36 = vadd.f32 %v3208_v40, %v3195_v9 }
 0x241   :  { %v3221_v16 = vadd.f32 %v3220_v38, %v3207_v47 }
 0x243   :  { %v3372_v21 = vmax.f32 %v3221_v16, 0.0 }
 0x248   :  { %v3222_v43 = vpop.f32.mrf.mxu0 }
 0x249   :  { %v3223_v29 = vadd.f32 %v3222_v43, %v3209_v36 }
 0x24b   :  { %v3234_v39 = vpop.f32.mrf.mxu1  ;;  %v3382_v40 = vmax.f32 %v3223_v29, 0.0 }
 0x24c   :  { %v3235_v2 = vadd.f32 %v3234_v39, %v653_v56  ;;  %v3397_v39 = vperm.slane %v3386_v8, 0 }
 0x24d   :  { %v3426_v4 = vmul.f32 %v3396_v28, %v3382_v40 }
 0x253   :  { %v3236_v48 = vpop.f32.mrf.mxu1 }
 0x254   :  { %v3237_v18 = vadd.f32 %v3236_v48, %v653_v56  ;;  %v3416_v48 = vmul.f32 %v3396_v28, %v3372_v21 }
 0x255   :  { %v3248_v25 = vpop.f32.mrf.mxu2 }
 0x256   :  { %v3262_v20 = vpop.f32.mrf.mxu3  ;;  %v3249_v42 = vadd.f32 %v3248_v25, %v3235_v2 }
 0x258   :  { %v3263_v13 = vadd.f32 %v3262_v20, %v3249_v42 }
 0x25d   :  { %v3250_v57 = vpop.f32.mrf.mxu2 }
 0x25e   :  { %v3264_v51 = vpop.f32.mrf.mxu3  ;;  %v3251_v24 = vadd.f32 %v3250_v57, %v3237_v18  ;;  %v3434_v57 = vadd.f32 %v5878_v19, %v3415_v32 }
 0x260   :  { %v3276_v50 = vpop.f32.mrf.mxu0  ;;  %v3265_v37 = vadd.f32 %v3264_v51, %v3251_v24  ;;  %v3435_v61 = vadd.f32 %v3434_v57, %v3416_v48 }
 0x261   :  { %v3277_v49 = vadd.f32 %v3276_v50, %v3263_v13  ;;  %v3381_v50 = vmax.f32 %v3153_v35, 0.0 }
 0x263   :  { %v3425_v63 = vmul.f32 %v3395_v0, %v3381_v50 }
 0x265   :  { %v3445_v30 = vadd.f32 %v5882_v58, %v3425_v63 }
 0x267   :  { %v3446_v11 = vadd.f32 %v3445_v30, %v3426_v4 }
 0x268   :  { %v3278_v5 = vpop.f32.mrf.mxu0 }
 0x269   :  { %v3279_v46 = vadd.f32 %v3278_v5, %v3265_v37 }
 0x26b   :  { %v3290_v53 = vpop.f32.mrf.mxu1 }
 0x26c   :  { %v3291_v62 = vadd.f32 %v3290_v53, %v3277_v49 }
 0x26e   :  { %v3373_v38 = vmax.f32 %v3291_v62, 0.0 }
 0x270   :  { %v3417_v31 = vmul.f32 %v3397_v39, %v3373_v38 }
 0x272   :  { %v3436_v26 = vadd.f32 %v3435_v61, %v3417_v31 }
 0x273   :  { %v3292_v7 = vpop.f32.mrf.mxu1 }
 0x274   :  { %v3293_v52 = vadd.f32 %v3292_v7, %v3279_v46 }
 0x275   :  { %v3304_v3 = vpop.f32.mrf.mxu2 }
 0x276   :  { %v3305_v12 = vadd.f32 %v3304_v3, %v654_v44  ;;  %v3318_v27 = vpop.f32.mrf.mxu3  ;;  %v3383_v43 = vmax.f32 %v3293_v52, 0.0 }
 0x278   :  { %v3319_v45 = vadd.f32 %v3318_v27, %v3305_v12  ;;  %v3427_v7 = vmul.f32 %v3397_v39, %v3383_v43 }
 0x27a   :  { %v3447_v47 = vadd.f32 %v3446_v11, %v3427_v7 }
 0x27d   :  { %v3306_v17 = vpop.f32.mrf.mxu2 }
 0x27e   :  { %v3307_v20 = vadd.f32 %v3306_v17, %v654_v44  ;;  %v3320_v56 = vpop.f32.mrf.mxu3 }
 0x280   :  { %v3332_v23 = vpop.f32.mrf.mxu0  ;;  %v3321_v59 = vadd.f32 %v3320_v56, %v3307_v20 }
 0x281   :  { %v3333_v25 = vadd.f32 %v3332_v23, %v3319_v45 }
 0x288   :  { %v3334_v34 = vpop.f32.mrf.mxu0 }
 0x289   :  { %v3346_v10 = vpop.f32.mrf.mxu1  ;;  %v3335_v2 = vadd.f32 %v3334_v34, %v3321_v59 }
 0x28a   :  { %v3347_v33 = vadd.f32 %v3346_v10, %v3333_v25 }
 0x291   :  { %v3348_v3 = vpop.f32.mrf.mxu1 }
 0x292   :  { %v3349_v19 = vadd.f32 %v3348_v3, %v3335_v2 }
 0x295   :  { %v3360_v54 = vpop.f32.mrf.mxu2 }
 0x296   :  { %v3361_v53 = vadd.f32 %v3360_v54, %v3347_v33 }
 0x298   :  { %v3374_v60 = vmax.f32 %v3361_v53, 0.0 }
 0x29a   :  { %v3418_v51 = vmul.f32 %v3398_v55, %v3374_v60 }
 0x29c   :  { %v3437_v5 = vadd.f32 %v3436_v26, %v3418_v51 }
 0x29d   :  { %v3362_v42 = vpop.f32.mrf.mxu2 }
 0x29e   :  { %v3363_v44 = vadd.f32 %v3362_v42, %v3349_v19  ;;  %3438 = vadd.xlane.f32.xlu0 %v3437_v5 }
 0x2a0   :  { %v3384_v41 = vmax.f32 %v3363_v44, 0.0 }
 0x2a2   :  { %v3428_v6 = vmul.f32 %v3398_v55, %v3384_v41 }
 0x2a4   :  { %v3448_v13 = vadd.f32 %v3447_v47, %v3428_v6 }
 0x2a6   :  { %3449 = vadd.xlane.f32.xlu0 %v3448_v13 }
 0x311   :  { %v3439_v15 = vpop.xlane.xlu0 %3438 }
 0x312   :  { %v3455_v16 = vadd.f32 %v5511_v1, %v3439_v15 }
 0x314   :  { %3458 = vst.msk [vmem:[%s5904_s7] sm:$0xff] %vm3457_vm1, %v3455_v16 }
 0x319   :  { %v3450_v18 = vpop.xlane.xlu0 %3449 }
 0x31a   :  { %v3456_v49 = vadd.f32 %v5511_v1, %v3450_v18 }
 0x31c   :  { %3459 = vst.msk [vmem:[%s5904_s7 + $0x8] sm:$0xff] %vm3457_vm1, %v3456_v49 }
 0x31d   :  { %3464 = vsyncpa [#allocation4], 1 }
 0x31e   :  { %3465 = vsyncpa [#allocation6], 1 }
 0x31f   :  { %3466 = vsyncpa [#allocation9], 1 }

</bundles_post_ra>
